<compile_context>
chip_gen: v7x
topology: tpu7x:2x2x1
jax: 0.10.0
libtpu: 0.0.40
codegen_flags: <defaults>
</compile_context>

<pallas_src>
import numpy as np
import jax
import jax.numpy as jnp
from jax.experimental import pallas as pl
from jax.experimental.pallas import tpu as pltpu

NUM_STATE = 2
H1 = 16
H2 = 8
OUT = 1

LANES = 128                      # batch elements per row of the flat view
ROW_WIDTH = NUM_STATE * LANES    # 256 interleaved f32 per row (f0,f1,f0,f1,...)
DEFAULT_BLOCK_ROWS = 512         # 512 rows * 128 = 65536 batch elems per grid step


def _round_up(n, m):
    return ((n + m - 1) // m) * m


def _build_deinterleave_selector():
    """S (256,256) with S[2c, c] = 1 and S[2c+1, 128+c] = 1.

    For an interleaved row  r = [e0f0, e0f1, e1f0, e1f1, ...]  we get
    (r @ S)[:128] = feature-0 of the 128 elements and (r @ S)[128:] = feature-1,
    i.e. the MXU performs the lane de-interleave/compaction for us.
    """
    eye = jnp.eye(LANES, dtype=jnp.float32)
    zero = jnp.zeros((LANES, LANES), jnp.float32)
    a = jnp.concatenate([eye, zero], axis=1)   # row c -> column c
    b = jnp.concatenate([zero, eye], axis=1)   # row c -> column 128 + c
    return jnp.stack([a, b], axis=1).reshape(ROW_WIDTH, ROW_WIDTH)


def critic_kernel(x_ref, sel_ref, w1_ref, b1_ref, w2_ref, b2_ref, w3_ref, b3_ref,
                  o_ref):
    # x_ref : (R, 256) raw row-major slab of the (B, 2) input (128 elems/row).
    # sel_ref: (256, 256) constant de-interleave selector (VMEM resident).
    # w*/b* : small parameter tables in SMEM (PyTorch orientation).
    # o_ref : (R, 128) state values, same element order as the input slab.
    xi = x_ref[...]

    # ---- de-interleave on the MXU (exact: 0/1 selector, full f32 precision) ----
    x01 = jnp.dot(xi, sel_ref[...],
                  precision=jax.lax.Precision.HIGHEST,
                  preferred_element_type=jnp.float32)      # (R, 256)
    x0 = x01[:, :LANES]                                     # feature 0, (R, 128)
    x1 = x01[:, LANES:]                                     # feature 1, (R, 128)

    # ---- fc1 -> ReLU -> fc2 accumulation on the VPU ----
    # Only one h1 channel is live at a time (keeps VMEM pressure low).
    h2 = [jnp.zeros_like(x0) + b2_ref[k] for k in range(H2)]
    for j in range(H1):
        h1j = jnp.maximum(w1_ref[j, 0] * x0 + w1_ref[j, 1] * x1 + b1_ref[j], 0.0)
        for k in range(H2):
            h2[k] = h2[k] + w2_ref[k, j] * h1j

    # ---- ReLU(fc2) and state_value head ----
    v = jnp.zeros_like(x0) + b3_ref[0]
    for k in range(H2):
        v = v + w3_ref[k] * jnp.maximum(h2[k], 0.0)

    # Single lane-dense store per tile.
    o_ref[...] = v


def _pick_block_rows(m, block_rows):
    """Block rows: multiple of 8 (unless == m), capped so we get >= 2 grid steps
    when there is enough work (megacore sharding on v7x)."""
    block_rows = max(8, (int(block_rows) // 8) * 8)
    half = _round_up(pl.cdiv(m, 2), 8)
    r = min(block_rows, max(8, half))
    if r >= m:
        return m
    return r


def critic_forward(x, params, *, block_rows=DEFAULT_BLOCK_ROWS):
    """x: (B, NUM_STATE) float32 -> (B, 1) float32 (PyTorch Critic semantics)."""
    w1, b1, w2, b2, w3, b3 = params
    B = x.shape[0]
    assert x.shape == (B, NUM_STATE)

    # Free reshape views of the row-major buffer — no transpose, no copy.
    x_flat = x.reshape(-1)                         # (2B,)
    Bp = _round_up(B, LANES)
    if Bp != B:
        # Only when B is not a multiple of 128: pad the flat stream by < 256
        # floats so a sublane-dense (M, 256) view exists.  (For 128-multiple
        # batches the whole path is copy-free.)
        x_flat = jnp.pad(x_flat, (0, NUM_STATE * (Bp - B)))
    M = (NUM_STATE * Bp) // ROW_WIDTH              # = Bp // 128
    xv = x_flat.reshape(M, ROW_WIDTH)              # free view

    R = _pick_block_rows(M, block_rows)
    grid = (pl.cdiv(M, R),)                        # partial last block is masked

    sel = _build_deinterleave_selector()
    smem = pl.BlockSpec(memory_space=pltpu.MemorySpace.SMEM)

    out = pl.pallas_call(
        critic_kernel,
        out_shape=jax.ShapeDtypeStruct((M, LANES), jnp.float32),
        grid=grid,
        in_specs=[
            pl.BlockSpec((R, ROW_WIDTH), lambda i: (i, 0)),        # input slab
            pl.BlockSpec((ROW_WIDTH, ROW_WIDTH), lambda i: (0, 0)),  # selector
            smem,  # w1 (16, 2)
            smem,  # b1 (16,)
            smem,  # w2 (8, 16)
            smem,  # b2 (8,)
            smem,  # w3 (8,)
            smem,  # b3 (1,)
        ],
        out_specs=pl.BlockSpec((R, LANES), lambda i: (i, 0)),
        compiler_params=pltpu.CompilerParams(
            dimension_semantics=("parallel",),
            vmem_limit_bytes=32 * 1024 * 1024,
        ),
    )(xv, sel, w1, b1, w2, b2, w3, b3)

    # Element b lives at flat position b of the (M, 128) output: free reshape,
    # plus a tail slice only when we had to pad.
    v = out.reshape(-1)
    if Bp != B:
        v = v[:B]
    return v.reshape(B, OUT)


def init_params(key):
    """Parameters in PyTorch nn.Linear orientation (weight: (out, in)).

    U(-1/sqrt(fan_in), 1/sqrt(fan_in)) like PyTorch's default init.
    w3 (torch shape (1, 8)) is stored as (8,); b3 as (1,).
    """
    ks = jax.random.split(key, 6)

    def uni(k, shape, fan_in):
        bound = 1.0 / np.sqrt(float(fan_in))
        return jax.random.uniform(k, shape, jnp.float32, -bound, bound)

    w1 = uni(ks[0], (H1, NUM_STATE), NUM_STATE)
    b1 = uni(ks[1], (H1,), NUM_STATE)
    w2 = uni(ks[2], (H2, H1), H1)
    b2 = uni(ks[3], (H2,), H1)
    w3 = uni(ks[4], (H2,), H2)
    b3 = uni(ks[5], (OUT,), H2)
    return (w1, b1, w2, b2, w3, b3)


def critic_reference(x, params):
    """Full-precision (float64 numpy) reference for correctness checking."""
    w1, b1, w2, b2, w3, b3 = [np.asarray(p, dtype=np.float64) for p in params]
    xx = np.asarray(x, dtype=np.float64)
    h1 = np.maximum(xx @ w1.T + b1, 0.0)
    h2 = np.maximum(h1 @ w2.T + b2, 0.0)
    return h2 @ w3.reshape(H2, OUT) + b3


if __name__ == "__main__":
    key = jax.random.PRNGKey(0)
    pkey, k1, k2, k3 = jax.random.split(key, 4)
    params = init_params(pkey)

    # 1) Tiny batch (exercises the ragged/padded path, single block).
    x_a = jax.random.normal(k1, (8, NUM_STATE), dtype=jnp.float32)
    out_a = jax.block_until_ready(critic_forward(x_a, params))
    assert out_a.shape == (8, OUT)
    assert np.allclose(np.asarray(out_a), critic_reference(x_a, params),
                       atol=1e-5, rtol=1e-5)

    # 2) Ragged batch (B not a multiple of 128).
    x_b = jax.random.normal(k2, (133, NUM_STATE), dtype=jnp.float32)
    out_b = jax.block_until_ready(critic_forward(x_b, params))
    assert out_b.shape == (133, OUT)
    assert np.allclose(np.asarray(out_b), critic_reference(x_b, params),
                       atol=1e-5, rtol=1e-5)

    # 3) 128-multiple batch (fully copy-free path) with a multi-step grid and a
    #    partial last block (M = 10 rows, R = 8 -> grid of 2, last block ragged).
    x_c = jax.random.normal(k3, (1280, NUM_STATE), dtype=jnp.float32)
    out_c = jax.block_until_ready(critic_forward(x_c, params, block_rows=8))
    assert out_c.shape == (1280, OUT)
    assert np.allclose(np.asarray(out_c), critic_reference(x_c, params),
                       atol=1e-5, rtol=1e-5)

    print("KERNEL_OK")
</pallas_src>

<mosaic_0001>
module attributes {stable_mosaic.version = 11 : i64} {
  func.func @critic_kernel(%arg0: i32, %arg1: memref<1x256xf32, #tpu.memory_space<vmem>>, %arg2: memref<256x256xf32, #tpu.memory_space<vmem>>, %arg3: memref<16x2xf32, #tpu.memory_space<smem>>, %arg4: memref<16xf32, #tpu.memory_space<smem>>, %arg5: memref<8x16xf32, #tpu.memory_space<smem>>, %arg6: memref<8xf32, #tpu.memory_space<smem>>, %arg7: memref<8xf32, #tpu.memory_space<smem>>, %arg8: memref<1xf32, #tpu.memory_space<smem>>, %arg9: memref<1x128xf32, #tpu.memory_space<vmem>>) attributes {dimension_semantics = [#tpu.dimension_semantics<parallel>], iteration_bounds = array<i64: 1>, scalar_prefetch = 0 : i64, scratch_operands = 0 : i64, tpu.core_type = #tpu.core_type<tc>, window_params = [{transform_indices = @transform_0, window_bounds = array<i64: 1, 256>}, {pipeline_mode = #tpu.pipeline_mode<synchronous>, transform_indices = @transform_1, window_bounds = array<i64: 256, 256>}, {transform_indices = @transform_2, window_bounds = array<i64: 16, 2>}, {transform_indices = @transform_3, window_bounds = array<i64: 16>}, {transform_indices = @transform_4, window_bounds = array<i64: 8, 16>}, {transform_indices = @transform_5, window_bounds = array<i64: 8>}, {transform_indices = @transform_6, window_bounds = array<i64: 8>}, {transform_indices = @transform_7, window_bounds = array<i64: 1>}, {transform_indices = @transform_8, window_bounds = array<i64: 1, 128>}]} {
    %c0 = arith.constant 0 : index
    %c0_0 = arith.constant 0 : index
    %0 = vector.load %arg1[%c0, %c0_0] : memref<1x256xf32, #tpu.memory_space<vmem>>, vector<1x256xf32>
    %c0_1 = arith.constant 0 : index
    %c0_2 = arith.constant 0 : index
    %1 = vector.load %arg2[%c0_1, %c0_2] : memref<256x256xf32, #tpu.memory_space<vmem>>, vector<256x256xf32>
    %cst = arith.constant dense<0.000000e+00> : vector<1x256xf32>
    %2 = tpu.matmul %0, %1, %cst {dimension_numbers = #tpu.dot_dimension_numbers<[1], [0], [0], [1], [0, 0, 1, 1], [], []>, precision = #tpu.contract_precision<fp32>} : vector<1x256xf32>, vector<256x256xf32>, vector<1x256xf32> -> vector<1x256xf32>
    %3 = vector.extract_strided_slice %2 {offsets = [0, 0], sizes = [1, 128], strides = [1, 1]} : vector<1x256xf32> to vector<1x128xf32>
    %4 = vector.extract_strided_slice %2 {offsets = [0, 128], sizes = [1, 128], strides = [1, 1]} : vector<1x256xf32> to vector<1x128xf32>
    %cst_3 = arith.constant 0.000000e+00 : f32
    %5 = vector.broadcast %cst_3 : f32 to vector<1x128xf32>
    %c0_4 = arith.constant 0 : index
    %6 = memref.load %arg6[%c0_4] : memref<8xf32, #tpu.memory_space<smem>>
    %7 = vector.broadcast %6 : f32 to vector<1x128xf32>
    %8 = arith.addf %5, %7 : vector<1x128xf32>
    %cst_5 = arith.constant 0.000000e+00 : f32
    %9 = vector.broadcast %cst_5 : f32 to vector<1x128xf32>
    %c1 = arith.constant 1 : index
    %10 = memref.load %arg6[%c1] : memref<8xf32, #tpu.memory_space<smem>>
    %11 = vector.broadcast %10 : f32 to vector<1x128xf32>
    %12 = arith.addf %9, %11 : vector<1x128xf32>
    %cst_6 = arith.constant 0.000000e+00 : f32
    %13 = vector.broadcast %cst_6 : f32 to vector<1x128xf32>
    %c2 = arith.constant 2 : index
    %14 = memref.load %arg6[%c2] : memref<8xf32, #tpu.memory_space<smem>>
    %15 = vector.broadcast %14 : f32 to vector<1x128xf32>
    %16 = arith.addf %13, %15 : vector<1x128xf32>
    %cst_7 = arith.constant 0.000000e+00 : f32
    %17 = vector.broadcast %cst_7 : f32 to vector<1x128xf32>
    %c3 = arith.constant 3 : index
    %18 = memref.load %arg6[%c3] : memref<8xf32, #tpu.memory_space<smem>>
    %19 = vector.broadcast %18 : f32 to vector<1x128xf32>
    %20 = arith.addf %17, %19 : vector<1x128xf32>
    %cst_8 = arith.constant 0.000000e+00 : f32
    %21 = vector.broadcast %cst_8 : f32 to vector<1x128xf32>
    %c4 = arith.constant 4 : index
    %22 = memref.load %arg6[%c4] : memref<8xf32, #tpu.memory_space<smem>>
    %23 = vector.broadcast %22 : f32 to vector<1x128xf32>
    %24 = arith.addf %21, %23 : vector<1x128xf32>
    %cst_9 = arith.constant 0.000000e+00 : f32
    %25 = vector.broadcast %cst_9 : f32 to vector<1x128xf32>
    %c5 = arith.constant 5 : index
    %26 = memref.load %arg6[%c5] : memref<8xf32, #tpu.memory_space<smem>>
    %27 = vector.broadcast %26 : f32 to vector<1x128xf32>
    %28 = arith.addf %25, %27 : vector<1x128xf32>
    %cst_10 = arith.constant 0.000000e+00 : f32
    %29 = vector.broadcast %cst_10 : f32 to vector<1x128xf32>
    %c6 = arith.constant 6 : index
    %30 = memref.load %arg6[%c6] : memref<8xf32, #tpu.memory_space<smem>>
    %31 = vector.broadcast %30 : f32 to vector<1x128xf32>
    %32 = arith.addf %29, %31 : vector<1x128xf32>
    %cst_11 = arith.constant 0.000000e+00 : f32
    %33 = vector.broadcast %cst_11 : f32 to vector<1x128xf32>
    %c7 = arith.constant 7 : index
    %34 = memref.load %arg6[%c7] : memref<8xf32, #tpu.memory_space<smem>>
    %35 = vector.broadcast %34 : f32 to vector<1x128xf32>
    %36 = arith.addf %33, %35 : vector<1x128xf32>
    %c0_12 = arith.constant 0 : index
    %c0_13 = arith.constant 0 : index
    %37 = memref.load %arg3[%c0_12, %c0_13] : memref<16x2xf32, #tpu.memory_space<smem>>
    %38 = vector.broadcast %37 : f32 to vector<1x128xf32>
    %39 = arith.mulf %38, %3 : vector<1x128xf32>
    %c0_14 = arith.constant 0 : index
    %c1_15 = arith.constant 1 : index
    %40 = memref.load %arg3[%c0_14, %c1_15] : memref<16x2xf32, #tpu.memory_space<smem>>
    %41 = vector.broadcast %40 : f32 to vector<1x128xf32>
    %42 = arith.mulf %41, %4 : vector<1x128xf32>
    %43 = arith.addf %39, %42 : vector<1x128xf32>
    %c0_16 = arith.constant 0 : index
    %44 = memref.load %arg4[%c0_16] : memref<16xf32, #tpu.memory_space<smem>>
    %45 = vector.broadcast %44 : f32 to vector<1x128xf32>
    %46 = arith.addf %43, %45 : vector<1x128xf32>
    %cst_17 = arith.constant 0.000000e+00 : f32
    %47 = vector.broadcast %cst_17 : f32 to vector<1x128xf32>
    %48 = arith.maximumf %46, %47 : vector<1x128xf32>
    %c0_18 = arith.constant 0 : index
    %c0_19 = arith.constant 0 : index
    %49 = memref.load %arg5[%c0_18, %c0_19] : memref<8x16xf32, #tpu.memory_space<smem>>
    %50 = vector.broadcast %49 : f32 to vector<1x128xf32>
    %51 = arith.mulf %50, %48 : vector<1x128xf32>
    %52 = arith.addf %8, %51 : vector<1x128xf32>
    %c1_20 = arith.constant 1 : index
    %c0_21 = arith.constant 0 : index
    %53 = memref.load %arg5[%c1_20, %c0_21] : memref<8x16xf32, #tpu.memory_space<smem>>
    %54 = vector.broadcast %53 : f32 to vector<1x128xf32>
    %55 = arith.mulf %54, %48 : vector<1x128xf32>
    %56 = arith.addf %12, %55 : vector<1x128xf32>
    %c2_22 = arith.constant 2 : index
    %c0_23 = arith.constant 0 : index
    %57 = memref.load %arg5[%c2_22, %c0_23] : memref<8x16xf32, #tpu.memory_space<smem>>
    %58 = vector.broadcast %57 : f32 to vector<1x128xf32>
    %59 = arith.mulf %58, %48 : vector<1x128xf32>
    %60 = arith.addf %16, %59 : vector<1x128xf32>
    %c3_24 = arith.constant 3 : index
    %c0_25 = arith.constant 0 : index
    %61 = memref.load %arg5[%c3_24, %c0_25] : memref<8x16xf32, #tpu.memory_space<smem>>
    %62 = vector.broadcast %61 : f32 to vector<1x128xf32>
    %63 = arith.mulf %62, %48 : vector<1x128xf32>
    %64 = arith.addf %20, %63 : vector<1x128xf32>
    %c4_26 = arith.constant 4 : index
    %c0_27 = arith.constant 0 : index
    %65 = memref.load %arg5[%c4_26, %c0_27] : memref<8x16xf32, #tpu.memory_space<smem>>
    %66 = vector.broadcast %65 : f32 to vector<1x128xf32>
    %67 = arith.mulf %66, %48 : vector<1x128xf32>
    %68 = arith.addf %24, %67 : vector<1x128xf32>
    %c5_28 = arith.constant 5 : index
    %c0_29 = arith.constant 0 : index
    %69 = memref.load %arg5[%c5_28, %c0_29] : memref<8x16xf32, #tpu.memory_space<smem>>
    %70 = vector.broadcast %69 : f32 to vector<1x128xf32>
    %71 = arith.mulf %70, %48 : vector<1x128xf32>
    %72 = arith.addf %28, %71 : vector<1x128xf32>
    %c6_30 = arith.constant 6 : index
    %c0_31 = arith.constant 0 : index
    %73 = memref.load %arg5[%c6_30, %c0_31] : memref<8x16xf32, #tpu.memory_space<smem>>
    %74 = vector.broadcast %73 : f32 to vector<1x128xf32>
    %75 = arith.mulf %74, %48 : vector<1x128xf32>
    %76 = arith.addf %32, %75 : vector<1x128xf32>
    %c7_32 = arith.constant 7 : index
    %c0_33 = arith.constant 0 : index
    %77 = memref.load %arg5[%c7_32, %c0_33] : memref<8x16xf32, #tpu.memory_space<smem>>
    %78 = vector.broadcast %77 : f32 to vector<1x128xf32>
    %79 = arith.mulf %78, %48 : vector<1x128xf32>
    %80 = arith.addf %36, %79 : vector<1x128xf32>
    %c1_34 = arith.constant 1 : index
    %c0_35 = arith.constant 0 : index
    %81 = memref.load %arg3[%c1_34, %c0_35] : memref<16x2xf32, #tpu.memory_space<smem>>
    %82 = vector.broadcast %81 : f32 to vector<1x128xf32>
    %83 = arith.mulf %82, %3 : vector<1x128xf32>
    %c1_36 = arith.constant 1 : index
    %c1_37 = arith.constant 1 : index
    %84 = memref.load %arg3[%c1_36, %c1_37] : memref<16x2xf32, #tpu.memory_space<smem>>
    %85 = vector.broadcast %84 : f32 to vector<1x128xf32>
    %86 = arith.mulf %85, %4 : vector<1x128xf32>
    %87 = arith.addf %83, %86 : vector<1x128xf32>
    %c1_38 = arith.constant 1 : index
    %88 = memref.load %arg4[%c1_38] : memref<16xf32, #tpu.memory_space<smem>>
    %89 = vector.broadcast %88 : f32 to vector<1x128xf32>
    %90 = arith.addf %87, %89 : vector<1x128xf32>
    %cst_39 = arith.constant 0.000000e+00 : f32
    %91 = vector.broadcast %cst_39 : f32 to vector<1x128xf32>
    %92 = arith.maximumf %90, %91 : vector<1x128xf32>
    %c0_40 = arith.constant 0 : index
    %c1_41 = arith.constant 1 : index
    %93 = memref.load %arg5[%c0_40, %c1_41] : memref<8x16xf32, #tpu.memory_space<smem>>
    %94 = vector.broadcast %93 : f32 to vector<1x128xf32>
    %95 = arith.mulf %94, %92 : vector<1x128xf32>
    %96 = arith.addf %52, %95 : vector<1x128xf32>
    %c1_42 = arith.constant 1 : index
    %c1_43 = arith.constant 1 : index
    %97 = memref.load %arg5[%c1_42, %c1_43] : memref<8x16xf32, #tpu.memory_space<smem>>
    %98 = vector.broadcast %97 : f32 to vector<1x128xf32>
    %99 = arith.mulf %98, %92 : vector<1x128xf32>
    %100 = arith.addf %56, %99 : vector<1x128xf32>
    %c2_44 = arith.constant 2 : index
    %c1_45 = arith.constant 1 : index
    %101 = memref.load %arg5[%c2_44, %c1_45] : memref<8x16xf32, #tpu.memory_space<smem>>
    %102 = vector.broadcast %101 : f32 to vector<1x128xf32>
    %103 = arith.mulf %102, %92 : vector<1x128xf32>
    %104 = arith.addf %60, %103 : vector<1x128xf32>
    %c3_46 = arith.constant 3 : index
    %c1_47 = arith.constant 1 : index
    %105 = memref.load %arg5[%c3_46, %c1_47] : memref<8x16xf32, #tpu.memory_space<smem>>
    %106 = vector.broadcast %105 : f32 to vector<1x128xf32>
    %107 = arith.mulf %106, %92 : vector<1x128xf32>
    %108 = arith.addf %64, %107 : vector<1x128xf32>
    %c4_48 = arith.constant 4 : index
    %c1_49 = arith.constant 1 : index
    %109 = memref.load %arg5[%c4_48, %c1_49] : memref<8x16xf32, #tpu.memory_space<smem>>
    %110 = vector.broadcast %109 : f32 to vector<1x128xf32>
    %111 = arith.mulf %110, %92 : vector<1x128xf32>
    %112 = arith.addf %68, %111 : vector<1x128xf32>
    %c5_50 = arith.constant 5 : index
    %c1_51 = arith.constant 1 : index
    %113 = memref.load %arg5[%c5_50, %c1_51] : memref<8x16xf32, #tpu.memory_space<smem>>
    %114 = vector.broadcast %113 : f32 to vector<1x128xf32>
    %115 = arith.mulf %114, %92 : vector<1x128xf32>
    %116 = arith.addf %72, %115 : vector<1x128xf32>
    %c6_52 = arith.constant 6 : index
    %c1_53 = arith.constant 1 : index
    %117 = memref.load %arg5[%c6_52, %c1_53] : memref<8x16xf32, #tpu.memory_space<smem>>
    %118 = vector.broadcast %117 : f32 to vector<1x128xf32>
    %119 = arith.mulf %118, %92 : vector<1x128xf32>
    %120 = arith.addf %76, %119 : vector<1x128xf32>
    %c7_54 = arith.constant 7 : index
    %c1_55 = arith.constant 1 : index
    %121 = memref.load %arg5[%c7_54, %c1_55] : memref<8x16xf32, #tpu.memory_space<smem>>
    %122 = vector.broadcast %121 : f32 to vector<1x128xf32>
    %123 = arith.mulf %122, %92 : vector<1x128xf32>
    %124 = arith.addf %80, %123 : vector<1x128xf32>
    %c2_56 = arith.constant 2 : index
    %c0_57 = arith.constant 0 : index
    %125 = memref.load %arg3[%c2_56, %c0_57] : memref<16x2xf32, #tpu.memory_space<smem>>
    %126 = vector.broadcast %125 : f32 to vector<1x128xf32>
    %127 = arith.mulf %126, %3 : vector<1x128xf32>
    %c2_58 = arith.constant 2 : index
    %c1_59 = arith.constant 1 : index
    %128 = memref.load %arg3[%c2_58, %c1_59] : memref<16x2xf32, #tpu.memory_space<smem>>
    %129 = vector.broadcast %128 : f32 to vector<1x128xf32>
    %130 = arith.mulf %129, %4 : vector<1x128xf32>
    %131 = arith.addf %127, %130 : vector<1x128xf32>
    %c2_60 = arith.constant 2 : index
    %132 = memref.load %arg4[%c2_60] : memref<16xf32, #tpu.memory_space<smem>>
    %133 = vector.broadcast %132 : f32 to vector<1x128xf32>
    %134 = arith.addf %131, %133 : vector<1x128xf32>
    %cst_61 = arith.constant 0.000000e+00 : f32
    %135 = vector.broadcast %cst_61 : f32 to vector<1x128xf32>
    %136 = arith.maximumf %134, %135 : vector<1x128xf32>
    %c0_62 = arith.constant 0 : index
    %c2_63 = arith.constant 2 : index
    %137 = memref.load %arg5[%c0_62, %c2_63] : memref<8x16xf32, #tpu.memory_space<smem>>
    %138 = vector.broadcast %137 : f32 to vector<1x128xf32>
    %139 = arith.mulf %138, %136 : vector<1x128xf32>
    %140 = arith.addf %96, %139 : vector<1x128xf32>
    %c1_64 = arith.constant 1 : index
    %c2_65 = arith.constant 2 : index
    %141 = memref.load %arg5[%c1_64, %c2_65] : memref<8x16xf32, #tpu.memory_space<smem>>
    %142 = vector.broadcast %141 : f32 to vector<1x128xf32>
    %143 = arith.mulf %142, %136 : vector<1x128xf32>
    %144 = arith.addf %100, %143 : vector<1x128xf32>
    %c2_66 = arith.constant 2 : index
    %c2_67 = arith.constant 2 : index
    %145 = memref.load %arg5[%c2_66, %c2_67] : memref<8x16xf32, #tpu.memory_space<smem>>
    %146 = vector.broadcast %145 : f32 to vector<1x128xf32>
    %147 = arith.mulf %146, %136 : vector<1x128xf32>
    %148 = arith.addf %104, %147 : vector<1x128xf32>
    %c3_68 = arith.constant 3 : index
    %c2_69 = arith.constant 2 : index
    %149 = memref.load %arg5[%c3_68, %c2_69] : memref<8x16xf32, #tpu.memory_space<smem>>
    %150 = vector.broadcast %149 : f32 to vector<1x128xf32>
    %151 = arith.mulf %150, %136 : vector<1x128xf32>
    %152 = arith.addf %108, %151 : vector<1x128xf32>
    %c4_70 = arith.constant 4 : index
    %c2_71 = arith.constant 2 : index
    %153 = memref.load %arg5[%c4_70, %c2_71] : memref<8x16xf32, #tpu.memory_space<smem>>
    %154 = vector.broadcast %153 : f32 to vector<1x128xf32>
    %155 = arith.mulf %154, %136 : vector<1x128xf32>
    %156 = arith.addf %112, %155 : vector<1x128xf32>
    %c5_72 = arith.constant 5 : index
    %c2_73 = arith.constant 2 : index
    %157 = memref.load %arg5[%c5_72, %c2_73] : memref<8x16xf32, #tpu.memory_space<smem>>
    %158 = vector.broadcast %157 : f32 to vector<1x128xf32>
    %159 = arith.mulf %158, %136 : vector<1x128xf32>
    %160 = arith.addf %116, %159 : vector<1x128xf32>
    %c6_74 = arith.constant 6 : index
    %c2_75 = arith.constant 2 : index
    %161 = memref.load %arg5[%c6_74, %c2_75] : memref<8x16xf32, #tpu.memory_space<smem>>
    %162 = vector.broadcast %161 : f32 to vector<1x128xf32>
    %163 = arith.mulf %162, %136 : vector<1x128xf32>
    %164 = arith.addf %120, %163 : vector<1x128xf32>
    %c7_76 = arith.constant 7 : index
    %c2_77 = arith.constant 2 : index
    %165 = memref.load %arg5[%c7_76, %c2_77] : memref<8x16xf32, #tpu.memory_space<smem>>
    %166 = vector.broadcast %165 : f32 to vector<1x128xf32>
    %167 = arith.mulf %166, %136 : vector<1x128xf32>
    %168 = arith.addf %124, %167 : vector<1x128xf32>
    %c3_78 = arith.constant 3 : index
    %c0_79 = arith.constant 0 : index
    %169 = memref.load %arg3[%c3_78, %c0_79] : memref<16x2xf32, #tpu.memory_space<smem>>
    %170 = vector.broadcast %169 : f32 to vector<1x128xf32>
    %171 = arith.mulf %170, %3 : vector<1x128xf32>
    %c3_80 = arith.constant 3 : index
    %c1_81 = arith.constant 1 : index
    %172 = memref.load %arg3[%c3_80, %c1_81] : memref<16x2xf32, #tpu.memory_space<smem>>
    %173 = vector.broadcast %172 : f32 to vector<1x128xf32>
    %174 = arith.mulf %173, %4 : vector<1x128xf32>
    %175 = arith.addf %171, %174 : vector<1x128xf32>
    %c3_82 = arith.constant 3 : index
    %176 = memref.load %arg4[%c3_82] : memref<16xf32, #tpu.memory_space<smem>>
    %177 = vector.broadcast %176 : f32 to vector<1x128xf32>
    %178 = arith.addf %175, %177 : vector<1x128xf32>
    %cst_83 = arith.constant 0.000000e+00 : f32
    %179 = vector.broadcast %cst_83 : f32 to vector<1x128xf32>
    %180 = arith.maximumf %178, %179 : vector<1x128xf32>
    %c0_84 = arith.constant 0 : index
    %c3_85 = arith.constant 3 : index
    %181 = memref.load %arg5[%c0_84, %c3_85] : memref<8x16xf32, #tpu.memory_space<smem>>
    %182 = vector.broadcast %181 : f32 to vector<1x128xf32>
    %183 = arith.mulf %182, %180 : vector<1x128xf32>
    %184 = arith.addf %140, %183 : vector<1x128xf32>
    %c1_86 = arith.constant 1 : index
    %c3_87 = arith.constant 3 : index
    %185 = memref.load %arg5[%c1_86, %c3_87] : memref<8x16xf32, #tpu.memory_space<smem>>
    %186 = vector.broadcast %185 : f32 to vector<1x128xf32>
    %187 = arith.mulf %186, %180 : vector<1x128xf32>
    %188 = arith.addf %144, %187 : vector<1x128xf32>
    %c2_88 = arith.constant 2 : index
    %c3_89 = arith.constant 3 : index
    %189 = memref.load %arg5[%c2_88, %c3_89] : memref<8x16xf32, #tpu.memory_space<smem>>
    %190 = vector.broadcast %189 : f32 to vector<1x128xf32>
    %191 = arith.mulf %190, %180 : vector<1x128xf32>
    %192 = arith.addf %148, %191 : vector<1x128xf32>
    %c3_90 = arith.constant 3 : index
    %c3_91 = arith.constant 3 : index
    %193 = memref.load %arg5[%c3_90, %c3_91] : memref<8x16xf32, #tpu.memory_space<smem>>
    %194 = vector.broadcast %193 : f32 to vector<1x128xf32>
    %195 = arith.mulf %194, %180 : vector<1x128xf32>
    %196 = arith.addf %152, %195 : vector<1x128xf32>
    %c4_92 = arith.constant 4 : index
    %c3_93 = arith.constant 3 : index
    %197 = memref.load %arg5[%c4_92, %c3_93] : memref<8x16xf32, #tpu.memory_space<smem>>
    %198 = vector.broadcast %197 : f32 to vector<1x128xf32>
    %199 = arith.mulf %198, %180 : vector<1x128xf32>
    %200 = arith.addf %156, %199 : vector<1x128xf32>
    %c5_94 = arith.constant 5 : index
    %c3_95 = arith.constant 3 : index
    %201 = memref.load %arg5[%c5_94, %c3_95] : memref<8x16xf32, #tpu.memory_space<smem>>
    %202 = vector.broadcast %201 : f32 to vector<1x128xf32>
    %203 = arith.mulf %202, %180 : vector<1x128xf32>
    %204 = arith.addf %160, %203 : vector<1x128xf32>
    %c6_96 = arith.constant 6 : index
    %c3_97 = arith.constant 3 : index
    %205 = memref.load %arg5[%c6_96, %c3_97] : memref<8x16xf32, #tpu.memory_space<smem>>
    %206 = vector.broadcast %205 : f32 to vector<1x128xf32>
    %207 = arith.mulf %206, %180 : vector<1x128xf32>
    %208 = arith.addf %164, %207 : vector<1x128xf32>
    %c7_98 = arith.constant 7 : index
    %c3_99 = arith.constant 3 : index
    %209 = memref.load %arg5[%c7_98, %c3_99] : memref<8x16xf32, #tpu.memory_space<smem>>
    %210 = vector.broadcast %209 : f32 to vector<1x128xf32>
    %211 = arith.mulf %210, %180 : vector<1x128xf32>
    %212 = arith.addf %168, %211 : vector<1x128xf32>
    %c4_100 = arith.constant 4 : index
    %c0_101 = arith.constant 0 : index
    %213 = memref.load %arg3[%c4_100, %c0_101] : memref<16x2xf32, #tpu.memory_space<smem>>
    %214 = vector.broadcast %213 : f32 to vector<1x128xf32>
    %215 = arith.mulf %214, %3 : vector<1x128xf32>
    %c4_102 = arith.constant 4 : index
    %c1_103 = arith.constant 1 : index
    %216 = memref.load %arg3[%c4_102, %c1_103] : memref<16x2xf32, #tpu.memory_space<smem>>
    %217 = vector.broadcast %216 : f32 to vector<1x128xf32>
    %218 = arith.mulf %217, %4 : vector<1x128xf32>
    %219 = arith.addf %215, %218 : vector<1x128xf32>
    %c4_104 = arith.constant 4 : index
    %220 = memref.load %arg4[%c4_104] : memref<16xf32, #tpu.memory_space<smem>>
    %221 = vector.broadcast %220 : f32 to vector<1x128xf32>
    %222 = arith.addf %219, %221 : vector<1x128xf32>
    %cst_105 = arith.constant 0.000000e+00 : f32
    %223 = vector.broadcast %cst_105 : f32 to vector<1x128xf32>
    %224 = arith.maximumf %222, %223 : vector<1x128xf32>
    %c0_106 = arith.constant 0 : index
    %c4_107 = arith.constant 4 : index
    %225 = memref.load %arg5[%c0_106, %c4_107] : memref<8x16xf32, #tpu.memory_space<smem>>
    %226 = vector.broadcast %225 : f32 to vector<1x128xf32>
    %227 = arith.mulf %226, %224 : vector<1x128xf32>
    %228 = arith.addf %184, %227 : vector<1x128xf32>
    %c1_108 = arith.constant 1 : index
    %c4_109 = arith.constant 4 : index
    %229 = memref.load %arg5[%c1_108, %c4_109] : memref<8x16xf32, #tpu.memory_space<smem>>
    %230 = vector.broadcast %229 : f32 to vector<1x128xf32>
    %231 = arith.mulf %230, %224 : vector<1x128xf32>
    %232 = arith.addf %188, %231 : vector<1x128xf32>
    %c2_110 = arith.constant 2 : index
    %c4_111 = arith.constant 4 : index
    %233 = memref.load %arg5[%c2_110, %c4_111] : memref<8x16xf32, #tpu.memory_space<smem>>
    %234 = vector.broadcast %233 : f32 to vector<1x128xf32>
    %235 = arith.mulf %234, %224 : vector<1x128xf32>
    %236 = arith.addf %192, %235 : vector<1x128xf32>
    %c3_112 = arith.constant 3 : index
    %c4_113 = arith.constant 4 : index
    %237 = memref.load %arg5[%c3_112, %c4_113] : memref<8x16xf32, #tpu.memory_space<smem>>
    %238 = vector.broadcast %237 : f32 to vector<1x128xf32>
    %239 = arith.mulf %238, %224 : vector<1x128xf32>
    %240 = arith.addf %196, %239 : vector<1x128xf32>
    %c4_114 = arith.constant 4 : index
    %c4_115 = arith.constant 4 : index
    %241 = memref.load %arg5[%c4_114, %c4_115] : memref<8x16xf32, #tpu.memory_space<smem>>
    %242 = vector.broadcast %241 : f32 to vector<1x128xf32>
    %243 = arith.mulf %242, %224 : vector<1x128xf32>
    %244 = arith.addf %200, %243 : vector<1x128xf32>
    %c5_116 = arith.constant 5 : index
    %c4_117 = arith.constant 4 : index
    %245 = memref.load %arg5[%c5_116, %c4_117] : memref<8x16xf32, #tpu.memory_space<smem>>
    %246 = vector.broadcast %245 : f32 to vector<1x128xf32>
    %247 = arith.mulf %246, %224 : vector<1x128xf32>
    %248 = arith.addf %204, %247 : vector<1x128xf32>
    %c6_118 = arith.constant 6 : index
    %c4_119 = arith.constant 4 : index
    %249 = memref.load %arg5[%c6_118, %c4_119] : memref<8x16xf32, #tpu.memory_space<smem>>
    %250 = vector.broadcast %249 : f32 to vector<1x128xf32>
    %251 = arith.mulf %250, %224 : vector<1x128xf32>
    %252 = arith.addf %208, %251 : vector<1x128xf32>
    %c7_120 = arith.constant 7 : index
    %c4_121 = arith.constant 4 : index
    %253 = memref.load %arg5[%c7_120, %c4_121] : memref<8x16xf32, #tpu.memory_space<smem>>
    %254 = vector.broadcast %253 : f32 to vector<1x128xf32>
    %255 = arith.mulf %254, %224 : vector<1x128xf32>
    %256 = arith.addf %212, %255 : vector<1x128xf32>
    %c5_122 = arith.constant 5 : index
    %c0_123 = arith.constant 0 : index
    %257 = memref.load %arg3[%c5_122, %c0_123] : memref<16x2xf32, #tpu.memory_space<smem>>
    %258 = vector.broadcast %257 : f32 to vector<1x128xf32>
    %259 = arith.mulf %258, %3 : vector<1x128xf32>
    %c5_124 = arith.constant 5 : index
    %c1_125 = arith.constant 1 : index
    %260 = memref.load %arg3[%c5_124, %c1_125] : memref<16x2xf32, #tpu.memory_space<smem>>
    %261 = vector.broadcast %260 : f32 to vector<1x128xf32>
    %262 = arith.mulf %261, %4 : vector<1x128xf32>
    %263 = arith.addf %259, %262 : vector<1x128xf32>
    %c5_126 = arith.constant 5 : index
    %264 = memref.load %arg4[%c5_126] : memref<16xf32, #tpu.memory_space<smem>>
    %265 = vector.broadcast %264 : f32 to vector<1x128xf32>
    %266 = arith.addf %263, %265 : vector<1x128xf32>
    %cst_127 = arith.constant 0.000000e+00 : f32
    %267 = vector.broadcast %cst_127 : f32 to vector<1x128xf32>
    %268 = arith.maximumf %266, %267 : vector<1x128xf32>
    %c0_128 = arith.constant 0 : index
    %c5_129 = arith.constant 5 : index
    %269 = memref.load %arg5[%c0_128, %c5_129] : memref<8x16xf32, #tpu.memory_space<smem>>
    %270 = vector.broadcast %269 : f32 to vector<1x128xf32>
    %271 = arith.mulf %270, %268 : vector<1x128xf32>
    %272 = arith.addf %228, %271 : vector<1x128xf32>
    %c1_130 = arith.constant 1 : index
    %c5_131 = arith.constant 5 : index
    %273 = memref.load %arg5[%c1_130, %c5_131] : memref<8x16xf32, #tpu.memory_space<smem>>
    %274 = vector.broadcast %273 : f32 to vector<1x128xf32>
    %275 = arith.mulf %274, %268 : vector<1x128xf32>
    %276 = arith.addf %232, %275 : vector<1x128xf32>
    %c2_132 = arith.constant 2 : index
    %c5_133 = arith.constant 5 : index
    %277 = memref.load %arg5[%c2_132, %c5_133] : memref<8x16xf32, #tpu.memory_space<smem>>
    %278 = vector.broadcast %277 : f32 to vector<1x128xf32>
    %279 = arith.mulf %278, %268 : vector<1x128xf32>
    %280 = arith.addf %236, %279 : vector<1x128xf32>
    %c3_134 = arith.constant 3 : index
    %c5_135 = arith.constant 5 : index
    %281 = memref.load %arg5[%c3_134, %c5_135] : memref<8x16xf32, #tpu.memory_space<smem>>
    %282 = vector.broadcast %281 : f32 to vector<1x128xf32>
    %283 = arith.mulf %282, %268 : vector<1x128xf32>
    %284 = arith.addf %240, %283 : vector<1x128xf32>
    %c4_136 = arith.constant 4 : index
    %c5_137 = arith.constant 5 : index
    %285 = memref.load %arg5[%c4_136, %c5_137] : memref<8x16xf32, #tpu.memory_space<smem>>
    %286 = vector.broadcast %285 : f32 to vector<1x128xf32>
    %287 = arith.mulf %286, %268 : vector<1x128xf32>
    %288 = arith.addf %244, %287 : vector<1x128xf32>
    %c5_138 = arith.constant 5 : index
    %c5_139 = arith.constant 5 : index
    %289 = memref.load %arg5[%c5_138, %c5_139] : memref<8x16xf32, #tpu.memory_space<smem>>
    %290 = vector.broadcast %289 : f32 to vector<1x128xf32>
    %291 = arith.mulf %290, %268 : vector<1x128xf32>
    %292 = arith.addf %248, %291 : vector<1x128xf32>
    %c6_140 = arith.constant 6 : index
    %c5_141 = arith.constant 5 : index
    %293 = memref.load %arg5[%c6_140, %c5_141] : memref<8x16xf32, #tpu.memory_space<smem>>
    %294 = vector.broadcast %293 : f32 to vector<1x128xf32>
    %295 = arith.mulf %294, %268 : vector<1x128xf32>
    %296 = arith.addf %252, %295 : vector<1x128xf32>
    %c7_142 = arith.constant 7 : index
    %c5_143 = arith.constant 5 : index
    %297 = memref.load %arg5[%c7_142, %c5_143] : memref<8x16xf32, #tpu.memory_space<smem>>
    %298 = vector.broadcast %297 : f32 to vector<1x128xf32>
    %299 = arith.mulf %298, %268 : vector<1x128xf32>
    %300 = arith.addf %256, %299 : vector<1x128xf32>
    %c6_144 = arith.constant 6 : index
    %c0_145 = arith.constant 0 : index
    %301 = memref.load %arg3[%c6_144, %c0_145] : memref<16x2xf32, #tpu.memory_space<smem>>
    %302 = vector.broadcast %301 : f32 to vector<1x128xf32>
    %303 = arith.mulf %302, %3 : vector<1x128xf32>
    %c6_146 = arith.constant 6 : index
    %c1_147 = arith.constant 1 : index
    %304 = memref.load %arg3[%c6_146, %c1_147] : memref<16x2xf32, #tpu.memory_space<smem>>
    %305 = vector.broadcast %304 : f32 to vector<1x128xf32>
    %306 = arith.mulf %305, %4 : vector<1x128xf32>
    %307 = arith.addf %303, %306 : vector<1x128xf32>
    %c6_148 = arith.constant 6 : index
    %308 = memref.load %arg4[%c6_148] : memref<16xf32, #tpu.memory_space<smem>>
    %309 = vector.broadcast %308 : f32 to vector<1x128xf32>
    %310 = arith.addf %307, %309 : vector<1x128xf32>
    %cst_149 = arith.constant 0.000000e+00 : f32
    %311 = vector.broadcast %cst_149 : f32 to vector<1x128xf32>
    %312 = arith.maximumf %310, %311 : vector<1x128xf32>
    %c0_150 = arith.constant 0 : index
    %c6_151 = arith.constant 6 : index
    %313 = memref.load %arg5[%c0_150, %c6_151] : memref<8x16xf32, #tpu.memory_space<smem>>
    %314 = vector.broadcast %313 : f32 to vector<1x128xf32>
    %315 = arith.mulf %314, %312 : vector<1x128xf32>
    %316 = arith.addf %272, %315 : vector<1x128xf32>
    %c1_152 = arith.constant 1 : index
    %c6_153 = arith.constant 6 : index
    %317 = memref.load %arg5[%c1_152, %c6_153] : memref<8x16xf32, #tpu.memory_space<smem>>
    %318 = vector.broadcast %317 : f32 to vector<1x128xf32>
    %319 = arith.mulf %318, %312 : vector<1x128xf32>
    %320 = arith.addf %276, %319 : vector<1x128xf32>
    %c2_154 = arith.constant 2 : index
    %c6_155 = arith.constant 6 : index
    %321 = memref.load %arg5[%c2_154, %c6_155] : memref<8x16xf32, #tpu.memory_space<smem>>
    %322 = vector.broadcast %321 : f32 to vector<1x128xf32>
    %323 = arith.mulf %322, %312 : vector<1x128xf32>
    %324 = arith.addf %280, %323 : vector<1x128xf32>
    %c3_156 = arith.constant 3 : index
    %c6_157 = arith.constant 6 : index
    %325 = memref.load %arg5[%c3_156, %c6_157] : memref<8x16xf32, #tpu.memory_space<smem>>
    %326 = vector.broadcast %325 : f32 to vector<1x128xf32>
    %327 = arith.mulf %326, %312 : vector<1x128xf32>
    %328 = arith.addf %284, %327 : vector<1x128xf32>
    %c4_158 = arith.constant 4 : index
    %c6_159 = arith.constant 6 : index
    %329 = memref.load %arg5[%c4_158, %c6_159] : memref<8x16xf32, #tpu.memory_space<smem>>
    %330 = vector.broadcast %329 : f32 to vector<1x128xf32>
    %331 = arith.mulf %330, %312 : vector<1x128xf32>
    %332 = arith.addf %288, %331 : vector<1x128xf32>
    %c5_160 = arith.constant 5 : index
    %c6_161 = arith.constant 6 : index
    %333 = memref.load %arg5[%c5_160, %c6_161] : memref<8x16xf32, #tpu.memory_space<smem>>
    %334 = vector.broadcast %333 : f32 to vector<1x128xf32>
    %335 = arith.mulf %334, %312 : vector<1x128xf32>
    %336 = arith.addf %292, %335 : vector<1x128xf32>
    %c6_162 = arith.constant 6 : index
    %c6_163 = arith.constant 6 : index
    %337 = memref.load %arg5[%c6_162, %c6_163] : memref<8x16xf32, #tpu.memory_space<smem>>
    %338 = vector.broadcast %337 : f32 to vector<1x128xf32>
    %339 = arith.mulf %338, %312 : vector<1x128xf32>
    %340 = arith.addf %296, %339 : vector<1x128xf32>
    %c7_164 = arith.constant 7 : index
    %c6_165 = arith.constant 6 : index
    %341 = memref.load %arg5[%c7_164, %c6_165] : memref<8x16xf32, #tpu.memory_space<smem>>
    %342 = vector.broadcast %341 : f32 to vector<1x128xf32>
    %343 = arith.mulf %342, %312 : vector<1x128xf32>
    %344 = arith.addf %300, %343 : vector<1x128xf32>
    %c7_166 = arith.constant 7 : index
    %c0_167 = arith.constant 0 : index
    %345 = memref.load %arg3[%c7_166, %c0_167] : memref<16x2xf32, #tpu.memory_space<smem>>
    %346 = vector.broadcast %345 : f32 to vector<1x128xf32>
    %347 = arith.mulf %346, %3 : vector<1x128xf32>
    %c7_168 = arith.constant 7 : index
    %c1_169 = arith.constant 1 : index
    %348 = memref.load %arg3[%c7_168, %c1_169] : memref<16x2xf32, #tpu.memory_space<smem>>
    %349 = vector.broadcast %348 : f32 to vector<1x128xf32>
    %350 = arith.mulf %349, %4 : vector<1x128xf32>
    %351 = arith.addf %347, %350 : vector<1x128xf32>
    %c7_170 = arith.constant 7 : index
    %352 = memref.load %arg4[%c7_170] : memref<16xf32, #tpu.memory_space<smem>>
    %353 = vector.broadcast %352 : f32 to vector<1x128xf32>
    %354 = arith.addf %351, %353 : vector<1x128xf32>
    %cst_171 = arith.constant 0.000000e+00 : f32
    %355 = vector.broadcast %cst_171 : f32 to vector<1x128xf32>
    %356 = arith.maximumf %354, %355 : vector<1x128xf32>
    %c0_172 = arith.constant 0 : index
    %c7_173 = arith.constant 7 : index
    %357 = memref.load %arg5[%c0_172, %c7_173] : memref<8x16xf32, #tpu.memory_space<smem>>
    %358 = vector.broadcast %357 : f32 to vector<1x128xf32>
    %359 = arith.mulf %358, %356 : vector<1x128xf32>
    %360 = arith.addf %316, %359 : vector<1x128xf32>
    %c1_174 = arith.constant 1 : index
    %c7_175 = arith.constant 7 : index
    %361 = memref.load %arg5[%c1_174, %c7_175] : memref<8x16xf32, #tpu.memory_space<smem>>
    %362 = vector.broadcast %361 : f32 to vector<1x128xf32>
    %363 = arith.mulf %362, %356 : vector<1x128xf32>
    %364 = arith.addf %320, %363 : vector<1x128xf32>
    %c2_176 = arith.constant 2 : index
    %c7_177 = arith.constant 7 : index
    %365 = memref.load %arg5[%c2_176, %c7_177] : memref<8x16xf32, #tpu.memory_space<smem>>
    %366 = vector.broadcast %365 : f32 to vector<1x128xf32>
    %367 = arith.mulf %366, %356 : vector<1x128xf32>
    %368 = arith.addf %324, %367 : vector<1x128xf32>
    %c3_178 = arith.constant 3 : index
    %c7_179 = arith.constant 7 : index
    %369 = memref.load %arg5[%c3_178, %c7_179] : memref<8x16xf32, #tpu.memory_space<smem>>
    %370 = vector.broadcast %369 : f32 to vector<1x128xf32>
    %371 = arith.mulf %370, %356 : vector<1x128xf32>
    %372 = arith.addf %328, %371 : vector<1x128xf32>
    %c4_180 = arith.constant 4 : index
    %c7_181 = arith.constant 7 : index
    %373 = memref.load %arg5[%c4_180, %c7_181] : memref<8x16xf32, #tpu.memory_space<smem>>
    %374 = vector.broadcast %373 : f32 to vector<1x128xf32>
    %375 = arith.mulf %374, %356 : vector<1x128xf32>
    %376 = arith.addf %332, %375 : vector<1x128xf32>
    %c5_182 = arith.constant 5 : index
    %c7_183 = arith.constant 7 : index
    %377 = memref.load %arg5[%c5_182, %c7_183] : memref<8x16xf32, #tpu.memory_space<smem>>
    %378 = vector.broadcast %377 : f32 to vector<1x128xf32>
    %379 = arith.mulf %378, %356 : vector<1x128xf32>
    %380 = arith.addf %336, %379 : vector<1x128xf32>
    %c6_184 = arith.constant 6 : index
    %c7_185 = arith.constant 7 : index
    %381 = memref.load %arg5[%c6_184, %c7_185] : memref<8x16xf32, #tpu.memory_space<smem>>
    %382 = vector.broadcast %381 : f32 to vector<1x128xf32>
    %383 = arith.mulf %382, %356 : vector<1x128xf32>
    %384 = arith.addf %340, %383 : vector<1x128xf32>
    %c7_186 = arith.constant 7 : index
    %c7_187 = arith.constant 7 : index
    %385 = memref.load %arg5[%c7_186, %c7_187] : memref<8x16xf32, #tpu.memory_space<smem>>
    %386 = vector.broadcast %385 : f32 to vector<1x128xf32>
    %387 = arith.mulf %386, %356 : vector<1x128xf32>
    %388 = arith.addf %344, %387 : vector<1x128xf32>
    %c8 = arith.constant 8 : index
    %c0_188 = arith.constant 0 : index
    %389 = memref.load %arg3[%c8, %c0_188] : memref<16x2xf32, #tpu.memory_space<smem>>
    %390 = vector.broadcast %389 : f32 to vector<1x128xf32>
    %391 = arith.mulf %390, %3 : vector<1x128xf32>
    %c8_189 = arith.constant 8 : index
    %c1_190 = arith.constant 1 : index
    %392 = memref.load %arg3[%c8_189, %c1_190] : memref<16x2xf32, #tpu.memory_space<smem>>
    %393 = vector.broadcast %392 : f32 to vector<1x128xf32>
    %394 = arith.mulf %393, %4 : vector<1x128xf32>
    %395 = arith.addf %391, %394 : vector<1x128xf32>
    %c8_191 = arith.constant 8 : index
    %396 = memref.load %arg4[%c8_191] : memref<16xf32, #tpu.memory_space<smem>>
    %397 = vector.broadcast %396 : f32 to vector<1x128xf32>
    %398 = arith.addf %395, %397 : vector<1x128xf32>
    %cst_192 = arith.constant 0.000000e+00 : f32
    %399 = vector.broadcast %cst_192 : f32 to vector<1x128xf32>
    %400 = arith.maximumf %398, %399 : vector<1x128xf32>
    %c0_193 = arith.constant 0 : index
    %c8_194 = arith.constant 8 : index
    %401 = memref.load %arg5[%c0_193, %c8_194] : memref<8x16xf32, #tpu.memory_space<smem>>
    %402 = vector.broadcast %401 : f32 to vector<1x128xf32>
    %403 = arith.mulf %402, %400 : vector<1x128xf32>
    %404 = arith.addf %360, %403 : vector<1x128xf32>
    %c1_195 = arith.constant 1 : index
    %c8_196 = arith.constant 8 : index
    %405 = memref.load %arg5[%c1_195, %c8_196] : memref<8x16xf32, #tpu.memory_space<smem>>
    %406 = vector.broadcast %405 : f32 to vector<1x128xf32>
    %407 = arith.mulf %406, %400 : vector<1x128xf32>
    %408 = arith.addf %364, %407 : vector<1x128xf32>
    %c2_197 = arith.constant 2 : index
    %c8_198 = arith.constant 8 : index
    %409 = memref.load %arg5[%c2_197, %c8_198] : memref<8x16xf32, #tpu.memory_space<smem>>
    %410 = vector.broadcast %409 : f32 to vector<1x128xf32>
    %411 = arith.mulf %410, %400 : vector<1x128xf32>
    %412 = arith.addf %368, %411 : vector<1x128xf32>
    %c3_199 = arith.constant 3 : index
    %c8_200 = arith.constant 8 : index
    %413 = memref.load %arg5[%c3_199, %c8_200] : memref<8x16xf32, #tpu.memory_space<smem>>
    %414 = vector.broadcast %413 : f32 to vector<1x128xf32>
    %415 = arith.mulf %414, %400 : vector<1x128xf32>
    %416 = arith.addf %372, %415 : vector<1x128xf32>
    %c4_201 = arith.constant 4 : index
    %c8_202 = arith.constant 8 : index
    %417 = memref.load %arg5[%c4_201, %c8_202] : memref<8x16xf32, #tpu.memory_space<smem>>
    %418 = vector.broadcast %417 : f32 to vector<1x128xf32>
    %419 = arith.mulf %418, %400 : vector<1x128xf32>
    %420 = arith.addf %376, %419 : vector<1x128xf32>
    %c5_203 = arith.constant 5 : index
    %c8_204 = arith.constant 8 : index
    %421 = memref.load %arg5[%c5_203, %c8_204] : memref<8x16xf32, #tpu.memory_space<smem>>
    %422 = vector.broadcast %421 : f32 to vector<1x128xf32>
    %423 = arith.mulf %422, %400 : vector<1x128xf32>
    %424 = arith.addf %380, %423 : vector<1x128xf32>
    %c6_205 = arith.constant 6 : index
    %c8_206 = arith.constant 8 : index
    %425 = memref.load %arg5[%c6_205, %c8_206] : memref<8x16xf32, #tpu.memory_space<smem>>
    %426 = vector.broadcast %425 : f32 to vector<1x128xf32>
    %427 = arith.mulf %426, %400 : vector<1x128xf32>
    %428 = arith.addf %384, %427 : vector<1x128xf32>
    %c7_207 = arith.constant 7 : index
    %c8_208 = arith.constant 8 : index
    %429 = memref.load %arg5[%c7_207, %c8_208] : memref<8x16xf32, #tpu.memory_space<smem>>
    %430 = vector.broadcast %429 : f32 to vector<1x128xf32>
    %431 = arith.mulf %430, %400 : vector<1x128xf32>
    %432 = arith.addf %388, %431 : vector<1x128xf32>
    %c9 = arith.constant 9 : index
    %c0_209 = arith.constant 0 : index
    %433 = memref.load %arg3[%c9, %c0_209] : memref<16x2xf32, #tpu.memory_space<smem>>
    %434 = vector.broadcast %433 : f32 to vector<1x128xf32>
    %435 = arith.mulf %434, %3 : vector<1x128xf32>
    %c9_210 = arith.constant 9 : index
    %c1_211 = arith.constant 1 : index
    %436 = memref.load %arg3[%c9_210, %c1_211] : memref<16x2xf32, #tpu.memory_space<smem>>
    %437 = vector.broadcast %436 : f32 to vector<1x128xf32>
    %438 = arith.mulf %437, %4 : vector<1x128xf32>
    %439 = arith.addf %435, %438 : vector<1x128xf32>
    %c9_212 = arith.constant 9 : index
    %440 = memref.load %arg4[%c9_212] : memref<16xf32, #tpu.memory_space<smem>>
    %441 = vector.broadcast %440 : f32 to vector<1x128xf32>
    %442 = arith.addf %439, %441 : vector<1x128xf32>
    %cst_213 = arith.constant 0.000000e+00 : f32
    %443 = vector.broadcast %cst_213 : f32 to vector<1x128xf32>
    %444 = arith.maximumf %442, %443 : vector<1x128xf32>
    %c0_214 = arith.constant 0 : index
    %c9_215 = arith.constant 9 : index
    %445 = memref.load %arg5[%c0_214, %c9_215] : memref<8x16xf32, #tpu.memory_space<smem>>
    %446 = vector.broadcast %445 : f32 to vector<1x128xf32>
    %447 = arith.mulf %446, %444 : vector<1x128xf32>
    %448 = arith.addf %404, %447 : vector<1x128xf32>
    %c1_216 = arith.constant 1 : index
    %c9_217 = arith.constant 9 : index
    %449 = memref.load %arg5[%c1_216, %c9_217] : memref<8x16xf32, #tpu.memory_space<smem>>
    %450 = vector.broadcast %449 : f32 to vector<1x128xf32>
    %451 = arith.mulf %450, %444 : vector<1x128xf32>
    %452 = arith.addf %408, %451 : vector<1x128xf32>
    %c2_218 = arith.constant 2 : index
    %c9_219 = arith.constant 9 : index
    %453 = memref.load %arg5[%c2_218, %c9_219] : memref<8x16xf32, #tpu.memory_space<smem>>
    %454 = vector.broadcast %453 : f32 to vector<1x128xf32>
    %455 = arith.mulf %454, %444 : vector<1x128xf32>
    %456 = arith.addf %412, %455 : vector<1x128xf32>
    %c3_220 = arith.constant 3 : index
    %c9_221 = arith.constant 9 : index
    %457 = memref.load %arg5[%c3_220, %c9_221] : memref<8x16xf32, #tpu.memory_space<smem>>
    %458 = vector.broadcast %457 : f32 to vector<1x128xf32>
    %459 = arith.mulf %458, %444 : vector<1x128xf32>
    %460 = arith.addf %416, %459 : vector<1x128xf32>
    %c4_222 = arith.constant 4 : index
    %c9_223 = arith.constant 9 : index
    %461 = memref.load %arg5[%c4_222, %c9_223] : memref<8x16xf32, #tpu.memory_space<smem>>
    %462 = vector.broadcast %461 : f32 to vector<1x128xf32>
    %463 = arith.mulf %462, %444 : vector<1x128xf32>
    %464 = arith.addf %420, %463 : vector<1x128xf32>
    %c5_224 = arith.constant 5 : index
    %c9_225 = arith.constant 9 : index
    %465 = memref.load %arg5[%c5_224, %c9_225] : memref<8x16xf32, #tpu.memory_space<smem>>
    %466 = vector.broadcast %465 : f32 to vector<1x128xf32>
    %467 = arith.mulf %466, %444 : vector<1x128xf32>
    %468 = arith.addf %424, %467 : vector<1x128xf32>
    %c6_226 = arith.constant 6 : index
    %c9_227 = arith.constant 9 : index
    %469 = memref.load %arg5[%c6_226, %c9_227] : memref<8x16xf32, #tpu.memory_space<smem>>
    %470 = vector.broadcast %469 : f32 to vector<1x128xf32>
    %471 = arith.mulf %470, %444 : vector<1x128xf32>
    %472 = arith.addf %428, %471 : vector<1x128xf32>
    %c7_228 = arith.constant 7 : index
    %c9_229 = arith.constant 9 : index
    %473 = memref.load %arg5[%c7_228, %c9_229] : memref<8x16xf32, #tpu.memory_space<smem>>
    %474 = vector.broadcast %473 : f32 to vector<1x128xf32>
    %475 = arith.mulf %474, %444 : vector<1x128xf32>
    %476 = arith.addf %432, %475 : vector<1x128xf32>
    %c10 = arith.constant 10 : index
    %c0_230 = arith.constant 0 : index
    %477 = memref.load %arg3[%c10, %c0_230] : memref<16x2xf32, #tpu.memory_space<smem>>
    %478 = vector.broadcast %477 : f32 to vector<1x128xf32>
    %479 = arith.mulf %478, %3 : vector<1x128xf32>
    %c10_231 = arith.constant 10 : index
    %c1_232 = arith.constant 1 : index
    %480 = memref.load %arg3[%c10_231, %c1_232] : memref<16x2xf32, #tpu.memory_space<smem>>
    %481 = vector.broadcast %480 : f32 to vector<1x128xf32>
    %482 = arith.mulf %481, %4 : vector<1x128xf32>
    %483 = arith.addf %479, %482 : vector<1x128xf32>
    %c10_233 = arith.constant 10 : index
    %484 = memref.load %arg4[%c10_233] : memref<16xf32, #tpu.memory_space<smem>>
    %485 = vector.broadcast %484 : f32 to vector<1x128xf32>
    %486 = arith.addf %483, %485 : vector<1x128xf32>
    %cst_234 = arith.constant 0.000000e+00 : f32
    %487 = vector.broadcast %cst_234 : f32 to vector<1x128xf32>
    %488 = arith.maximumf %486, %487 : vector<1x128xf32>
    %c0_235 = arith.constant 0 : index
    %c10_236 = arith.constant 10 : index
    %489 = memref.load %arg5[%c0_235, %c10_236] : memref<8x16xf32, #tpu.memory_space<smem>>
    %490 = vector.broadcast %489 : f32 to vector<1x128xf32>
    %491 = arith.mulf %490, %488 : vector<1x128xf32>
    %492 = arith.addf %448, %491 : vector<1x128xf32>
    %c1_237 = arith.constant 1 : index
    %c10_238 = arith.constant 10 : index
    %493 = memref.load %arg5[%c1_237, %c10_238] : memref<8x16xf32, #tpu.memory_space<smem>>
    %494 = vector.broadcast %493 : f32 to vector<1x128xf32>
    %495 = arith.mulf %494, %488 : vector<1x128xf32>
    %496 = arith.addf %452, %495 : vector<1x128xf32>
    %c2_239 = arith.constant 2 : index
    %c10_240 = arith.constant 10 : index
    %497 = memref.load %arg5[%c2_239, %c10_240] : memref<8x16xf32, #tpu.memory_space<smem>>
    %498 = vector.broadcast %497 : f32 to vector<1x128xf32>
    %499 = arith.mulf %498, %488 : vector<1x128xf32>
    %500 = arith.addf %456, %499 : vector<1x128xf32>
    %c3_241 = arith.constant 3 : index
    %c10_242 = arith.constant 10 : index
    %501 = memref.load %arg5[%c3_241, %c10_242] : memref<8x16xf32, #tpu.memory_space<smem>>
    %502 = vector.broadcast %501 : f32 to vector<1x128xf32>
    %503 = arith.mulf %502, %488 : vector<1x128xf32>
    %504 = arith.addf %460, %503 : vector<1x128xf32>
    %c4_243 = arith.constant 4 : index
    %c10_244 = arith.constant 10 : index
    %505 = memref.load %arg5[%c4_243, %c10_244] : memref<8x16xf32, #tpu.memory_space<smem>>
    %506 = vector.broadcast %505 : f32 to vector<1x128xf32>
    %507 = arith.mulf %506, %488 : vector<1x128xf32>
    %508 = arith.addf %464, %507 : vector<1x128xf32>
    %c5_245 = arith.constant 5 : index
    %c10_246 = arith.constant 10 : index
    %509 = memref.load %arg5[%c5_245, %c10_246] : memref<8x16xf32, #tpu.memory_space<smem>>
    %510 = vector.broadcast %509 : f32 to vector<1x128xf32>
    %511 = arith.mulf %510, %488 : vector<1x128xf32>
    %512 = arith.addf %468, %511 : vector<1x128xf32>
    %c6_247 = arith.constant 6 : index
    %c10_248 = arith.constant 10 : index
    %513 = memref.load %arg5[%c6_247, %c10_248] : memref<8x16xf32, #tpu.memory_space<smem>>
    %514 = vector.broadcast %513 : f32 to vector<1x128xf32>
    %515 = arith.mulf %514, %488 : vector<1x128xf32>
    %516 = arith.addf %472, %515 : vector<1x128xf32>
    %c7_249 = arith.constant 7 : index
    %c10_250 = arith.constant 10 : index
    %517 = memref.load %arg5[%c7_249, %c10_250] : memref<8x16xf32, #tpu.memory_space<smem>>
    %518 = vector.broadcast %517 : f32 to vector<1x128xf32>
    %519 = arith.mulf %518, %488 : vector<1x128xf32>
    %520 = arith.addf %476, %519 : vector<1x128xf32>
    %c11 = arith.constant 11 : index
    %c0_251 = arith.constant 0 : index
    %521 = memref.load %arg3[%c11, %c0_251] : memref<16x2xf32, #tpu.memory_space<smem>>
    %522 = vector.broadcast %521 : f32 to vector<1x128xf32>
    %523 = arith.mulf %522, %3 : vector<1x128xf32>
    %c11_252 = arith.constant 11 : index
    %c1_253 = arith.constant 1 : index
    %524 = memref.load %arg3[%c11_252, %c1_253] : memref<16x2xf32, #tpu.memory_space<smem>>
    %525 = vector.broadcast %524 : f32 to vector<1x128xf32>
    %526 = arith.mulf %525, %4 : vector<1x128xf32>
    %527 = arith.addf %523, %526 : vector<1x128xf32>
    %c11_254 = arith.constant 11 : index
    %528 = memref.load %arg4[%c11_254] : memref<16xf32, #tpu.memory_space<smem>>
    %529 = vector.broadcast %528 : f32 to vector<1x128xf32>
    %530 = arith.addf %527, %529 : vector<1x128xf32>
    %cst_255 = arith.constant 0.000000e+00 : f32
    %531 = vector.broadcast %cst_255 : f32 to vector<1x128xf32>
    %532 = arith.maximumf %530, %531 : vector<1x128xf32>
    %c0_256 = arith.constant 0 : index
    %c11_257 = arith.constant 11 : index
    %533 = memref.load %arg5[%c0_256, %c11_257] : memref<8x16xf32, #tpu.memory_space<smem>>
    %534 = vector.broadcast %533 : f32 to vector<1x128xf32>
    %535 = arith.mulf %534, %532 : vector<1x128xf32>
    %536 = arith.addf %492, %535 : vector<1x128xf32>
    %c1_258 = arith.constant 1 : index
    %c11_259 = arith.constant 11 : index
    %537 = memref.load %arg5[%c1_258, %c11_259] : memref<8x16xf32, #tpu.memory_space<smem>>
    %538 = vector.broadcast %537 : f32 to vector<1x128xf32>
    %539 = arith.mulf %538, %532 : vector<1x128xf32>
    %540 = arith.addf %496, %539 : vector<1x128xf32>
    %c2_260 = arith.constant 2 : index
    %c11_261 = arith.constant 11 : index
    %541 = memref.load %arg5[%c2_260, %c11_261] : memref<8x16xf32, #tpu.memory_space<smem>>
    %542 = vector.broadcast %541 : f32 to vector<1x128xf32>
    %543 = arith.mulf %542, %532 : vector<1x128xf32>
    %544 = arith.addf %500, %543 : vector<1x128xf32>
    %c3_262 = arith.constant 3 : index
    %c11_263 = arith.constant 11 : index
    %545 = memref.load %arg5[%c3_262, %c11_263] : memref<8x16xf32, #tpu.memory_space<smem>>
    %546 = vector.broadcast %545 : f32 to vector<1x128xf32>
    %547 = arith.mulf %546, %532 : vector<1x128xf32>
    %548 = arith.addf %504, %547 : vector<1x128xf32>
    %c4_264 = arith.constant 4 : index
    %c11_265 = arith.constant 11 : index
    %549 = memref.load %arg5[%c4_264, %c11_265] : memref<8x16xf32, #tpu.memory_space<smem>>
    %550 = vector.broadcast %549 : f32 to vector<1x128xf32>
    %551 = arith.mulf %550, %532 : vector<1x128xf32>
    %552 = arith.addf %508, %551 : vector<1x128xf32>
    %c5_266 = arith.constant 5 : index
    %c11_267 = arith.constant 11 : index
    %553 = memref.load %arg5[%c5_266, %c11_267] : memref<8x16xf32, #tpu.memory_space<smem>>
    %554 = vector.broadcast %553 : f32 to vector<1x128xf32>
    %555 = arith.mulf %554, %532 : vector<1x128xf32>
    %556 = arith.addf %512, %555 : vector<1x128xf32>
    %c6_268 = arith.constant 6 : index
    %c11_269 = arith.constant 11 : index
    %557 = memref.load %arg5[%c6_268, %c11_269] : memref<8x16xf32, #tpu.memory_space<smem>>
    %558 = vector.broadcast %557 : f32 to vector<1x128xf32>
    %559 = arith.mulf %558, %532 : vector<1x128xf32>
    %560 = arith.addf %516, %559 : vector<1x128xf32>
    %c7_270 = arith.constant 7 : index
    %c11_271 = arith.constant 11 : index
    %561 = memref.load %arg5[%c7_270, %c11_271] : memref<8x16xf32, #tpu.memory_space<smem>>
    %562 = vector.broadcast %561 : f32 to vector<1x128xf32>
    %563 = arith.mulf %562, %532 : vector<1x128xf32>
    %564 = arith.addf %520, %563 : vector<1x128xf32>
    %c12 = arith.constant 12 : index
    %c0_272 = arith.constant 0 : index
    %565 = memref.load %arg3[%c12, %c0_272] : memref<16x2xf32, #tpu.memory_space<smem>>
    %566 = vector.broadcast %565 : f32 to vector<1x128xf32>
    %567 = arith.mulf %566, %3 : vector<1x128xf32>
    %c12_273 = arith.constant 12 : index
    %c1_274 = arith.constant 1 : index
    %568 = memref.load %arg3[%c12_273, %c1_274] : memref<16x2xf32, #tpu.memory_space<smem>>
    %569 = vector.broadcast %568 : f32 to vector<1x128xf32>
    %570 = arith.mulf %569, %4 : vector<1x128xf32>
    %571 = arith.addf %567, %570 : vector<1x128xf32>
    %c12_275 = arith.constant 12 : index
    %572 = memref.load %arg4[%c12_275] : memref<16xf32, #tpu.memory_space<smem>>
    %573 = vector.broadcast %572 : f32 to vector<1x128xf32>
    %574 = arith.addf %571, %573 : vector<1x128xf32>
    %cst_276 = arith.constant 0.000000e+00 : f32
    %575 = vector.broadcast %cst_276 : f32 to vector<1x128xf32>
    %576 = arith.maximumf %574, %575 : vector<1x128xf32>
    %c0_277 = arith.constant 0 : index
    %c12_278 = arith.constant 12 : index
    %577 = memref.load %arg5[%c0_277, %c12_278] : memref<8x16xf32, #tpu.memory_space<smem>>
    %578 = vector.broadcast %577 : f32 to vector<1x128xf32>
    %579 = arith.mulf %578, %576 : vector<1x128xf32>
    %580 = arith.addf %536, %579 : vector<1x128xf32>
    %c1_279 = arith.constant 1 : index
    %c12_280 = arith.constant 12 : index
    %581 = memref.load %arg5[%c1_279, %c12_280] : memref<8x16xf32, #tpu.memory_space<smem>>
    %582 = vector.broadcast %581 : f32 to vector<1x128xf32>
    %583 = arith.mulf %582, %576 : vector<1x128xf32>
    %584 = arith.addf %540, %583 : vector<1x128xf32>
    %c2_281 = arith.constant 2 : index
    %c12_282 = arith.constant 12 : index
    %585 = memref.load %arg5[%c2_281, %c12_282] : memref<8x16xf32, #tpu.memory_space<smem>>
    %586 = vector.broadcast %585 : f32 to vector<1x128xf32>
    %587 = arith.mulf %586, %576 : vector<1x128xf32>
    %588 = arith.addf %544, %587 : vector<1x128xf32>
    %c3_283 = arith.constant 3 : index
    %c12_284 = arith.constant 12 : index
    %589 = memref.load %arg5[%c3_283, %c12_284] : memref<8x16xf32, #tpu.memory_space<smem>>
    %590 = vector.broadcast %589 : f32 to vector<1x128xf32>
    %591 = arith.mulf %590, %576 : vector<1x128xf32>
    %592 = arith.addf %548, %591 : vector<1x128xf32>
    %c4_285 = arith.constant 4 : index
    %c12_286 = arith.constant 12 : index
    %593 = memref.load %arg5[%c4_285, %c12_286] : memref<8x16xf32, #tpu.memory_space<smem>>
    %594 = vector.broadcast %593 : f32 to vector<1x128xf32>
    %595 = arith.mulf %594, %576 : vector<1x128xf32>
    %596 = arith.addf %552, %595 : vector<1x128xf32>
    %c5_287 = arith.constant 5 : index
    %c12_288 = arith.constant 12 : index
    %597 = memref.load %arg5[%c5_287, %c12_288] : memref<8x16xf32, #tpu.memory_space<smem>>
    %598 = vector.broadcast %597 : f32 to vector<1x128xf32>
    %599 = arith.mulf %598, %576 : vector<1x128xf32>
    %600 = arith.addf %556, %599 : vector<1x128xf32>
    %c6_289 = arith.constant 6 : index
    %c12_290 = arith.constant 12 : index
    %601 = memref.load %arg5[%c6_289, %c12_290] : memref<8x16xf32, #tpu.memory_space<smem>>
    %602 = vector.broadcast %601 : f32 to vector<1x128xf32>
    %603 = arith.mulf %602, %576 : vector<1x128xf32>
    %604 = arith.addf %560, %603 : vector<1x128xf32>
    %c7_291 = arith.constant 7 : index
    %c12_292 = arith.constant 12 : index
    %605 = memref.load %arg5[%c7_291, %c12_292] : memref<8x16xf32, #tpu.memory_space<smem>>
    %606 = vector.broadcast %605 : f32 to vector<1x128xf32>
    %607 = arith.mulf %606, %576 : vector<1x128xf32>
    %608 = arith.addf %564, %607 : vector<1x128xf32>
    %c13 = arith.constant 13 : index
    %c0_293 = arith.constant 0 : index
    %609 = memref.load %arg3[%c13, %c0_293] : memref<16x2xf32, #tpu.memory_space<smem>>
    %610 = vector.broadcast %609 : f32 to vector<1x128xf32>
    %611 = arith.mulf %610, %3 : vector<1x128xf32>
    %c13_294 = arith.constant 13 : index
    %c1_295 = arith.constant 1 : index
    %612 = memref.load %arg3[%c13_294, %c1_295] : memref<16x2xf32, #tpu.memory_space<smem>>
    %613 = vector.broadcast %612 : f32 to vector<1x128xf32>
    %614 = arith.mulf %613, %4 : vector<1x128xf32>
    %615 = arith.addf %611, %614 : vector<1x128xf32>
    %c13_296 = arith.constant 13 : index
    %616 = memref.load %arg4[%c13_296] : memref<16xf32, #tpu.memory_space<smem>>
    %617 = vector.broadcast %616 : f32 to vector<1x128xf32>
    %618 = arith.addf %615, %617 : vector<1x128xf32>
    %cst_297 = arith.constant 0.000000e+00 : f32
    %619 = vector.broadcast %cst_297 : f32 to vector<1x128xf32>
    %620 = arith.maximumf %618, %619 : vector<1x128xf32>
    %c0_298 = arith.constant 0 : index
    %c13_299 = arith.constant 13 : index
    %621 = memref.load %arg5[%c0_298, %c13_299] : memref<8x16xf32, #tpu.memory_space<smem>>
    %622 = vector.broadcast %621 : f32 to vector<1x128xf32>
    %623 = arith.mulf %622, %620 : vector<1x128xf32>
    %624 = arith.addf %580, %623 : vector<1x128xf32>
    %c1_300 = arith.constant 1 : index
    %c13_301 = arith.constant 13 : index
    %625 = memref.load %arg5[%c1_300, %c13_301] : memref<8x16xf32, #tpu.memory_space<smem>>
    %626 = vector.broadcast %625 : f32 to vector<1x128xf32>
    %627 = arith.mulf %626, %620 : vector<1x128xf32>
    %628 = arith.addf %584, %627 : vector<1x128xf32>
    %c2_302 = arith.constant 2 : index
    %c13_303 = arith.constant 13 : index
    %629 = memref.load %arg5[%c2_302, %c13_303] : memref<8x16xf32, #tpu.memory_space<smem>>
    %630 = vector.broadcast %629 : f32 to vector<1x128xf32>
    %631 = arith.mulf %630, %620 : vector<1x128xf32>
    %632 = arith.addf %588, %631 : vector<1x128xf32>
    %c3_304 = arith.constant 3 : index
    %c13_305 = arith.constant 13 : index
    %633 = memref.load %arg5[%c3_304, %c13_305] : memref<8x16xf32, #tpu.memory_space<smem>>
    %634 = vector.broadcast %633 : f32 to vector<1x128xf32>
    %635 = arith.mulf %634, %620 : vector<1x128xf32>
    %636 = arith.addf %592, %635 : vector<1x128xf32>
    %c4_306 = arith.constant 4 : index
    %c13_307 = arith.constant 13 : index
    %637 = memref.load %arg5[%c4_306, %c13_307] : memref<8x16xf32, #tpu.memory_space<smem>>
    %638 = vector.broadcast %637 : f32 to vector<1x128xf32>
    %639 = arith.mulf %638, %620 : vector<1x128xf32>
    %640 = arith.addf %596, %639 : vector<1x128xf32>
    %c5_308 = arith.constant 5 : index
    %c13_309 = arith.constant 13 : index
    %641 = memref.load %arg5[%c5_308, %c13_309] : memref<8x16xf32, #tpu.memory_space<smem>>
    %642 = vector.broadcast %641 : f32 to vector<1x128xf32>
    %643 = arith.mulf %642, %620 : vector<1x128xf32>
    %644 = arith.addf %600, %643 : vector<1x128xf32>
    %c6_310 = arith.constant 6 : index
    %c13_311 = arith.constant 13 : index
    %645 = memref.load %arg5[%c6_310, %c13_311] : memref<8x16xf32, #tpu.memory_space<smem>>
    %646 = vector.broadcast %645 : f32 to vector<1x128xf32>
    %647 = arith.mulf %646, %620 : vector<1x128xf32>
    %648 = arith.addf %604, %647 : vector<1x128xf32>
    %c7_312 = arith.constant 7 : index
    %c13_313 = arith.constant 13 : index
    %649 = memref.load %arg5[%c7_312, %c13_313] : memref<8x16xf32, #tpu.memory_space<smem>>
    %650 = vector.broadcast %649 : f32 to vector<1x128xf32>
    %651 = arith.mulf %650, %620 : vector<1x128xf32>
    %652 = arith.addf %608, %651 : vector<1x128xf32>
    %c14 = arith.constant 14 : index
    %c0_314 = arith.constant 0 : index
    %653 = memref.load %arg3[%c14, %c0_314] : memref<16x2xf32, #tpu.memory_space<smem>>
    %654 = vector.broadcast %653 : f32 to vector<1x128xf32>
    %655 = arith.mulf %654, %3 : vector<1x128xf32>
    %c14_315 = arith.constant 14 : index
    %c1_316 = arith.constant 1 : index
    %656 = memref.load %arg3[%c14_315, %c1_316] : memref<16x2xf32, #tpu.memory_space<smem>>
    %657 = vector.broadcast %656 : f32 to vector<1x128xf32>
    %658 = arith.mulf %657, %4 : vector<1x128xf32>
    %659 = arith.addf %655, %658 : vector<1x128xf32>
    %c14_317 = arith.constant 14 : index
    %660 = memref.load %arg4[%c14_317] : memref<16xf32, #tpu.memory_space<smem>>
    %661 = vector.broadcast %660 : f32 to vector<1x128xf32>
    %662 = arith.addf %659, %661 : vector<1x128xf32>
    %cst_318 = arith.constant 0.000000e+00 : f32
    %663 = vector.broadcast %cst_318 : f32 to vector<1x128xf32>
    %664 = arith.maximumf %662, %663 : vector<1x128xf32>
    %c0_319 = arith.constant 0 : index
    %c14_320 = arith.constant 14 : index
    %665 = memref.load %arg5[%c0_319, %c14_320] : memref<8x16xf32, #tpu.memory_space<smem>>
    %666 = vector.broadcast %665 : f32 to vector<1x128xf32>
    %667 = arith.mulf %666, %664 : vector<1x128xf32>
    %668 = arith.addf %624, %667 : vector<1x128xf32>
    %c1_321 = arith.constant 1 : index
    %c14_322 = arith.constant 14 : index
    %669 = memref.load %arg5[%c1_321, %c14_322] : memref<8x16xf32, #tpu.memory_space<smem>>
    %670 = vector.broadcast %669 : f32 to vector<1x128xf32>
    %671 = arith.mulf %670, %664 : vector<1x128xf32>
    %672 = arith.addf %628, %671 : vector<1x128xf32>
    %c2_323 = arith.constant 2 : index
    %c14_324 = arith.constant 14 : index
    %673 = memref.load %arg5[%c2_323, %c14_324] : memref<8x16xf32, #tpu.memory_space<smem>>
    %674 = vector.broadcast %673 : f32 to vector<1x128xf32>
    %675 = arith.mulf %674, %664 : vector<1x128xf32>
    %676 = arith.addf %632, %675 : vector<1x128xf32>
    %c3_325 = arith.constant 3 : index
    %c14_326 = arith.constant 14 : index
    %677 = memref.load %arg5[%c3_325, %c14_326] : memref<8x16xf32, #tpu.memory_space<smem>>
    %678 = vector.broadcast %677 : f32 to vector<1x128xf32>
    %679 = arith.mulf %678, %664 : vector<1x128xf32>
    %680 = arith.addf %636, %679 : vector<1x128xf32>
    %c4_327 = arith.constant 4 : index
    %c14_328 = arith.constant 14 : index
    %681 = memref.load %arg5[%c4_327, %c14_328] : memref<8x16xf32, #tpu.memory_space<smem>>
    %682 = vector.broadcast %681 : f32 to vector<1x128xf32>
    %683 = arith.mulf %682, %664 : vector<1x128xf32>
    %684 = arith.addf %640, %683 : vector<1x128xf32>
    %c5_329 = arith.constant 5 : index
    %c14_330 = arith.constant 14 : index
    %685 = memref.load %arg5[%c5_329, %c14_330] : memref<8x16xf32, #tpu.memory_space<smem>>
    %686 = vector.broadcast %685 : f32 to vector<1x128xf32>
    %687 = arith.mulf %686, %664 : vector<1x128xf32>
    %688 = arith.addf %644, %687 : vector<1x128xf32>
    %c6_331 = arith.constant 6 : index
    %c14_332 = arith.constant 14 : index
    %689 = memref.load %arg5[%c6_331, %c14_332] : memref<8x16xf32, #tpu.memory_space<smem>>
    %690 = vector.broadcast %689 : f32 to vector<1x128xf32>
    %691 = arith.mulf %690, %664 : vector<1x128xf32>
    %692 = arith.addf %648, %691 : vector<1x128xf32>
    %c7_333 = arith.constant 7 : index
    %c14_334 = arith.constant 14 : index
    %693 = memref.load %arg5[%c7_333, %c14_334] : memref<8x16xf32, #tpu.memory_space<smem>>
    %694 = vector.broadcast %693 : f32 to vector<1x128xf32>
    %695 = arith.mulf %694, %664 : vector<1x128xf32>
    %696 = arith.addf %652, %695 : vector<1x128xf32>
    %c15 = arith.constant 15 : index
    %c0_335 = arith.constant 0 : index
    %697 = memref.load %arg3[%c15, %c0_335] : memref<16x2xf32, #tpu.memory_space<smem>>
    %698 = vector.broadcast %697 : f32 to vector<1x128xf32>
    %699 = arith.mulf %698, %3 : vector<1x128xf32>
    %c15_336 = arith.constant 15 : index
    %c1_337 = arith.constant 1 : index
    %700 = memref.load %arg3[%c15_336, %c1_337] : memref<16x2xf32, #tpu.memory_space<smem>>
    %701 = vector.broadcast %700 : f32 to vector<1x128xf32>
    %702 = arith.mulf %701, %4 : vector<1x128xf32>
    %703 = arith.addf %699, %702 : vector<1x128xf32>
    %c15_338 = arith.constant 15 : index
    %704 = memref.load %arg4[%c15_338] : memref<16xf32, #tpu.memory_space<smem>>
    %705 = vector.broadcast %704 : f32 to vector<1x128xf32>
    %706 = arith.addf %703, %705 : vector<1x128xf32>
    %cst_339 = arith.constant 0.000000e+00 : f32
    %707 = vector.broadcast %cst_339 : f32 to vector<1x128xf32>
    %708 = arith.maximumf %706, %707 : vector<1x128xf32>
    %c0_340 = arith.constant 0 : index
    %c15_341 = arith.constant 15 : index
    %709 = memref.load %arg5[%c0_340, %c15_341] : memref<8x16xf32, #tpu.memory_space<smem>>
    %710 = vector.broadcast %709 : f32 to vector<1x128xf32>
    %711 = arith.mulf %710, %708 : vector<1x128xf32>
    %712 = arith.addf %668, %711 : vector<1x128xf32>
    %c1_342 = arith.constant 1 : index
    %c15_343 = arith.constant 15 : index
    %713 = memref.load %arg5[%c1_342, %c15_343] : memref<8x16xf32, #tpu.memory_space<smem>>
    %714 = vector.broadcast %713 : f32 to vector<1x128xf32>
    %715 = arith.mulf %714, %708 : vector<1x128xf32>
    %716 = arith.addf %672, %715 : vector<1x128xf32>
    %c2_344 = arith.constant 2 : index
    %c15_345 = arith.constant 15 : index
    %717 = memref.load %arg5[%c2_344, %c15_345] : memref<8x16xf32, #tpu.memory_space<smem>>
    %718 = vector.broadcast %717 : f32 to vector<1x128xf32>
    %719 = arith.mulf %718, %708 : vector<1x128xf32>
    %720 = arith.addf %676, %719 : vector<1x128xf32>
    %c3_346 = arith.constant 3 : index
    %c15_347 = arith.constant 15 : index
    %721 = memref.load %arg5[%c3_346, %c15_347] : memref<8x16xf32, #tpu.memory_space<smem>>
    %722 = vector.broadcast %721 : f32 to vector<1x128xf32>
    %723 = arith.mulf %722, %708 : vector<1x128xf32>
    %724 = arith.addf %680, %723 : vector<1x128xf32>
    %c4_348 = arith.constant 4 : index
    %c15_349 = arith.constant 15 : index
    %725 = memref.load %arg5[%c4_348, %c15_349] : memref<8x16xf32, #tpu.memory_space<smem>>
    %726 = vector.broadcast %725 : f32 to vector<1x128xf32>
    %727 = arith.mulf %726, %708 : vector<1x128xf32>
    %728 = arith.addf %684, %727 : vector<1x128xf32>
    %c5_350 = arith.constant 5 : index
    %c15_351 = arith.constant 15 : index
    %729 = memref.load %arg5[%c5_350, %c15_351] : memref<8x16xf32, #tpu.memory_space<smem>>
    %730 = vector.broadcast %729 : f32 to vector<1x128xf32>
    %731 = arith.mulf %730, %708 : vector<1x128xf32>
    %732 = arith.addf %688, %731 : vector<1x128xf32>
    %c6_352 = arith.constant 6 : index
    %c15_353 = arith.constant 15 : index
    %733 = memref.load %arg5[%c6_352, %c15_353] : memref<8x16xf32, #tpu.memory_space<smem>>
    %734 = vector.broadcast %733 : f32 to vector<1x128xf32>
    %735 = arith.mulf %734, %708 : vector<1x128xf32>
    %736 = arith.addf %692, %735 : vector<1x128xf32>
    %c7_354 = arith.constant 7 : index
    %c15_355 = arith.constant 15 : index
    %737 = memref.load %arg5[%c7_354, %c15_355] : memref<8x16xf32, #tpu.memory_space<smem>>
    %738 = vector.broadcast %737 : f32 to vector<1x128xf32>
    %739 = arith.mulf %738, %708 : vector<1x128xf32>
    %740 = arith.addf %696, %739 : vector<1x128xf32>
    %cst_356 = arith.constant 0.000000e+00 : f32
    %741 = vector.broadcast %cst_356 : f32 to vector<1x128xf32>
    %c0_357 = arith.constant 0 : index
    %742 = memref.load %arg8[%c0_357] : memref<1xf32, #tpu.memory_space<smem>>
    %743 = vector.broadcast %742 : f32 to vector<1x128xf32>
    %744 = arith.addf %741, %743 : vector<1x128xf32>
    %c0_358 = arith.constant 0 : index
    %745 = memref.load %arg7[%c0_358] : memref<8xf32, #tpu.memory_space<smem>>
    %cst_359 = arith.constant 0.000000e+00 : f32
    %746 = vector.broadcast %cst_359 : f32 to vector<1x128xf32>
    %747 = arith.maximumf %712, %746 : vector<1x128xf32>
    %748 = vector.broadcast %745 : f32 to vector<1x128xf32>
    %749 = arith.mulf %748, %747 : vector<1x128xf32>
    %750 = arith.addf %744, %749 : vector<1x128xf32>
    %c1_360 = arith.constant 1 : index
    %751 = memref.load %arg7[%c1_360] : memref<8xf32, #tpu.memory_space<smem>>
    %cst_361 = arith.constant 0.000000e+00 : f32
    %752 = vector.broadcast %cst_361 : f32 to vector<1x128xf32>
    %753 = arith.maximumf %716, %752 : vector<1x128xf32>
    %754 = vector.broadcast %751 : f32 to vector<1x128xf32>
    %755 = arith.mulf %754, %753 : vector<1x128xf32>
    %756 = arith.addf %750, %755 : vector<1x128xf32>
    %c2_362 = arith.constant 2 : index
    %757 = memref.load %arg7[%c2_362] : memref<8xf32, #tpu.memory_space<smem>>
    %cst_363 = arith.constant 0.000000e+00 : f32
    %758 = vector.broadcast %cst_363 : f32 to vector<1x128xf32>
    %759 = arith.maximumf %720, %758 : vector<1x128xf32>
    %760 = vector.broadcast %757 : f32 to vector<1x128xf32>
    %761 = arith.mulf %760, %759 : vector<1x128xf32>
    %762 = arith.addf %756, %761 : vector<1x128xf32>
    %c3_364 = arith.constant 3 : index
    %763 = memref.load %arg7[%c3_364] : memref<8xf32, #tpu.memory_space<smem>>
    %cst_365 = arith.constant 0.000000e+00 : f32
    %764 = vector.broadcast %cst_365 : f32 to vector<1x128xf32>
    %765 = arith.maximumf %724, %764 : vector<1x128xf32>
    %766 = vector.broadcast %763 : f32 to vector<1x128xf32>
    %767 = arith.mulf %766, %765 : vector<1x128xf32>
    %768 = arith.addf %762, %767 : vector<1x128xf32>
    %c4_366 = arith.constant 4 : index
    %769 = memref.load %arg7[%c4_366] : memref<8xf32, #tpu.memory_space<smem>>
    %cst_367 = arith.constant 0.000000e+00 : f32
    %770 = vector.broadcast %cst_367 : f32 to vector<1x128xf32>
    %771 = arith.maximumf %728, %770 : vector<1x128xf32>
    %772 = vector.broadcast %769 : f32 to vector<1x128xf32>
    %773 = arith.mulf %772, %771 : vector<1x128xf32>
    %774 = arith.addf %768, %773 : vector<1x128xf32>
    %c5_368 = arith.constant 5 : index
    %775 = memref.load %arg7[%c5_368] : memref<8xf32, #tpu.memory_space<smem>>
    %cst_369 = arith.constant 0.000000e+00 : f32
    %776 = vector.broadcast %cst_369 : f32 to vector<1x128xf32>
    %777 = arith.maximumf %732, %776 : vector<1x128xf32>
    %778 = vector.broadcast %775 : f32 to vector<1x128xf32>
    %779 = arith.mulf %778, %777 : vector<1x128xf32>
    %780 = arith.addf %774, %779 : vector<1x128xf32>
    %c6_370 = arith.constant 6 : index
    %781 = memref.load %arg7[%c6_370] : memref<8xf32, #tpu.memory_space<smem>>
    %cst_371 = arith.constant 0.000000e+00 : f32
    %782 = vector.broadcast %cst_371 : f32 to vector<1x128xf32>
    %783 = arith.maximumf %736, %782 : vector<1x128xf32>
    %784 = vector.broadcast %781 : f32 to vector<1x128xf32>
    %785 = arith.mulf %784, %783 : vector<1x128xf32>
    %786 = arith.addf %780, %785 : vector<1x128xf32>
    %c7_372 = arith.constant 7 : index
    %787 = memref.load %arg7[%c7_372] : memref<8xf32, #tpu.memory_space<smem>>
    %cst_373 = arith.constant 0.000000e+00 : f32
    %788 = vector.broadcast %cst_373 : f32 to vector<1x128xf32>
    %789 = arith.maximumf %740, %788 : vector<1x128xf32>
    %790 = vector.broadcast %787 : f32 to vector<1x128xf32>
    %791 = arith.mulf %790, %789 : vector<1x128xf32>
    %792 = arith.addf %786, %791 : vector<1x128xf32>
    %c0_374 = arith.constant 0 : index
    %c0_375 = arith.constant 0 : index
    %793 = vector.load %arg9[%c0_374, %c0_375] : memref<1x128xf32, #tpu.memory_space<vmem>>, vector<1x128xf32>
    tpu.vector_store %arg9[%c0_374, %c0_375], %792 {strides = array<i32>} : memref<1x128xf32, #tpu.memory_space<vmem>>, vector<1x128xf32>,
    return
  }
  func.func @transform_0(%arg0: i32) -> (i32, i32) {
    %c0_i32 = arith.constant 0 : i32
    %c0_i32_0 = arith.constant 0 : i32
    return %arg0, %c0_i32 : i32, i32
  }
  func.func @transform_1(%arg0: i32) -> (i32, i32) {
    %c0_i32 = arith.constant 0 : i32
    %c0_i32_0 = arith.constant 0 : i32
    %c0_i32_1 = arith.constant 0 : i32
    return %c0_i32, %c0_i32_0 : i32, i32
  }
  func.func @transform_2(%arg0: i32) -> (i32, i32) {
    %c0_i32 = arith.constant 0 : i32
    %c0_i32_0 = arith.constant 0 : i32
    %c0_i32_1 = arith.constant 0 : i32
    return %c0_i32, %c0_i32_0 : i32, i32
  }
  func.func @transform_3(%arg0: i32) -> i32 {
    %c0_i32 = arith.constant 0 : i32
    %c0_i32_0 = arith.constant 0 : i32
    return %c0_i32 : i32
  }
  func.func @transform_4(%arg0: i32) -> (i32, i32) {
    %c0_i32 = arith.constant 0 : i32
    %c0_i32_0 = arith.constant 0 : i32
    %c0_i32_1 = arith.constant 0 : i32
    return %c0_i32, %c0_i32_0 : i32, i32
  }
  func.func @transform_5(%arg0: i32) -> i32 {
    %c0_i32 = arith.constant 0 : i32
    %c0_i32_0 = arith.constant 0 : i32
    return %c0_i32 : i32
  }
  func.func @transform_6(%arg0: i32) -> i32 {
    %c0_i32 = arith.constant 0 : i32
    %c0_i32_0 = arith.constant 0 : i32
    return %c0_i32 : i32
  }
  func.func @transform_7(%arg0: i32) -> i32 {
    %c0_i32 = arith.constant 0 : i32
    %c0_i32_0 = arith.constant 0 : i32
    return %c0_i32 : i32
  }
  func.func @transform_8(%arg0: i32) -> (i32, i32) {
    %c0_i32 = arith.constant 0 : i32
    %c0_i32_0 = arith.constant 0 : i32
    return %arg0, %c0_i32 : i32, i32
  }
}

</mosaic_0001>

<bundles_post_ra>
// kernel: tpu_custom_call.1
= control target key start
LH: loop header
LB: loop body
LE: loop exit
PB: predicated region body
PF: predicated region fallthrough
CT: control target
= control target key end

     0   :  { %s4683_s0 = inlined_call_operand.vmem [shape: f32[1,256], index: 0, kind: input, shape index: {}]   ;;  %s4684_s1 = inlined_call_operand.hbm [shape: f32[256,256], index: 1, kind: input, shape index: {}]   ;;  %s4685_s2 = inlined_call_operand.vmem [shape: f32[16,2], index: 2, kind: input, shape index: {}]   ;;  %s4686_s3 = inlined_call_operand.vmem [shape: f32[16], index: 3, kind: input, shape index: {}]   ;;  %s4687_s4 = inlined_call_operand.vmem [shape: f32[8,16], index: 4, kind: input, shape index: {}]   ;;  %s4688_s5 = inlined_call_operand.vmem [shape: f32[8], index: 5, kind: input, shape index: {}]   ;;  %s4689_s6 = inlined_call_operand.vmem [shape: f32[8], index: 6, kind: input, shape index: {}]   ;;  %s4690_s7 = inlined_call_operand.<no memory space> [shape: f32[1], index: 7, kind: input, shape index: {}]   ;;  %s4691_s8 = inlined_call_operand.hbm [shape: f32[1,128], index: 8, kind: output, shape index: {}]  }
   0x1   :  { %4995 = sst [smem:[#allocation273_spill]] %s4690_s7 }
   0x2   :  { %4996 = sst [smem:[#allocation274_spill]] %s4691_s8 }
   0x3   :  { %14 = vsyncpa [#allocation4], 0 }
   0x4   :  { %15 = vsyncpa [#allocation6], 0 }
   0x5   :  { %16 = vsyncpa [#allocation9], 0 }
   0x6   :  { %17 = vsyncpa [#allocation12], 0  ;;  %s51_s29 = sshll.u32 %s4686_s3, 4  ;;  %s52_s29 = int_to_ptr.vmem [resolvable:$true] %s51_s29 }
   0x7   :  { %18 = vsyncpa [#allocation5], 0  ;;  %s71_s10 = sshll.u32 %s4688_s5, 4  ;;  %s2832_s11 = scalar_lea.vmem %s52_s29, 16  ;;  %s72_s10 = int_to_ptr.vmem [resolvable:$true] %s71_s10 }
   0x8   :  { %p2833_p0 = scmp.ne.s32.totalorder %s52_s29, %s2832_s11  ;;  %p2837_p1 = scmp.lt.s32.totalorder %s52_s29, %s52_s29 }
   0x9   :  { %p2838_p2 = scmp.lt.s32.totalorder %s2832_s11, %s2832_s11 }
   0xb   :  { %p2839_p3 = por %p2838_p2, %p2837_p1 }
   0xd   :  { %p2840_p4 = pnand %p2839_p3, %p2833_p0 }
   0xf   :  { %2843 = shalt.err (!%p2840_p4)
}
  0x10   :  { %s2946_s12 = smov [#allocation8]   ;;  %s2844_s13 = scalar_lea.vmem %s72_s10, 16 }
  0x11   :  { %54 = dma.vmem_to_smem %s52_s29, 16, %s2946_s12, [#allocation9]  }
  0x12   :  { %p2845_p5 = scmp.ne.s32.totalorder %s72_s10, %s2844_s13  ;;  %p2849_p6 = scmp.lt.s32.totalorder %s72_s10, %s72_s10 }
  0x13   :  { %p2850_p7 = scmp.lt.s32.totalorder %s2844_s13, %s2844_s13 }
  0x15   :  { %p2851_p8 = por %p2850_p7, %p2849_p6 }
  0x17   :  { %p2852_p9 = pnand %p2851_p8, %p2845_p5 }
  0x19   :  { %2855 = shalt.err (!%p2852_p9)
}
  0x1a   :  { %s2947_s3 = smov [#allocation11]   ;;  %s2948_s5 = smov [#allocation3]  }
  0x1b   :  { %74 = dma.vmem_to_smem %s72_s10, 16, %s2947_s3, [#allocation12]  }
  0x1c   :  { %s26_s14 = sshll.u32 %s2948_s5, 4  ;;  %s38_s17 = sshll.u32 %s4685_s2, 4  ;;  %s27_s14 = int_to_ptr.vmem [resolvable:$true] %s26_s14  ;;  %s39_s17 = int_to_ptr.vmem [resolvable:$true] %s38_s17 }
  0x1d   :  { %s2856_s20 = scalar_lea.hbm %s4684_s1, 8192 }
  0x1e   :  { %p2857_p10 = scmp.ne.s32.totalorder %s4684_s1, %s2856_s20  ;;  %p2860_p11 = scmp.lt.u32.totalorder %s2856_s20, %s4684_s1 }
  0x20   :  { %p2862_p12 = pnand %p2860_p11, %p2857_p10 }
  0x22   :  { %2865 = shalt.err (!%p2862_p12)
}
  0x23   :  { %s2866_s25 = scalar_lea.vmem %s27_s14, 8192  ;;  %p2871_p0 = scmp.lt.s32.totalorder %s27_s14, %s27_s14 }
  0x24   :  { %p2867_p13 = scmp.ne.s32.totalorder %s27_s14, %s2866_s25  ;;  %p2872_p1 = scmp.lt.s32.totalorder %s2866_s25, %s2866_s25 }
  0x26   :  { %p2873_p2 = por %p2872_p1, %p2871_p0 }
  0x28   :  { %p2874_p3 = pnand %p2873_p2, %p2867_p13 }
  0x2a   :  { %2877 = shalt.err (!%p2874_p3)
}
  0x2b   :  { %s2949_s2 = smov 256   ;;  %s2950_s26 = smov 16  }
  0x2c   :  { %32 = dma.hbm_to_vmem [thread:$0]  %s4684_s1, 8192, %s27_s14, [#allocation4], %s2949_s2, %s2949_s2, %s2950_s26  }
  0x2d   :  { %s2878_s29 = scalar_lea.vmem %s39_s17, 256  ;;  %p2883_p5 = scmp.lt.s32.totalorder %s39_s17, %s39_s17 }
  0x2e   :  { %p2879_p4 = scmp.ne.s32.totalorder %s39_s17, %s2878_s29  ;;  %p2884_p6 = scmp.lt.s32.totalorder %s2878_s29, %s2878_s29 }
  0x30   :  { %p2885_p7 = por %p2884_p6, %p2883_p5 }
  0x32   :  { %p2886_p8 = pnand %p2885_p7, %p2879_p4 }
  0x34   :  { %2889 = shalt.err (!%p2886_p8)
}
  0x35   :  { %s2951_s30 = smov [#allocation7]   ;;  %s2952_s9 = smov 128  }
  0x36   :  { %s2953_s10 = smov 8   ;;  %s61_s13 = sshll.u32 %s4687_s4, 4  ;;  %s62_s13 = int_to_ptr.vmem [resolvable:$true] %s61_s13 }
  0x37   :  { %44 = dma.vmem_to_smem %s39_s17, 256, %s2951_s30, [#allocation6], %s2952_s9, %s2952_s9, %s2953_s10  }
  0x38   :  { %s81_s1 = sshll.u32 %s4689_s6, 4  ;;  %s2890_s14 = scalar_lea.vmem %s62_s13, 128  ;;  %s82_s1 = int_to_ptr.vmem [resolvable:$true] %s81_s1 }
  0x39   :  { %p2891_p9 = scmp.ne.s32.totalorder %s62_s13, %s2890_s14  ;;  %p2895_p10 = scmp.lt.s32.totalorder %s62_s13, %s62_s13 }
  0x3a   :  { %p2896_p11 = scmp.lt.s32.totalorder %s2890_s14, %s2890_s14 }
  0x3c   :  { %p2897_p12 = por %p2896_p11, %p2895_p10 }
  0x3e   :  { %p2898_p13 = pnand %p2897_p12, %p2891_p9 }
  0x40   :  { %2901 = shalt.err (!%p2898_p13)
}
  0x41   :  { %s2954_s15 = smov [#allocation10]   ;;  %s2902_s16 = scalar_lea.vmem %s82_s1, 16 }
  0x42   :  { %64 = dma.vmem_to_smem %s62_s13, 128, %s2954_s15, [#allocation9]  }
  0x43   :  { %p2903_p0 = scmp.ne.s32.totalorder %s82_s1, %s2902_s16  ;;  %p2907_p1 = scmp.lt.s32.totalorder %s82_s1, %s82_s1 }
  0x44   :  { %p2908_p2 = scmp.lt.s32.totalorder %s2902_s16, %s2902_s16 }
  0x46   :  { %p2909_p3 = por %p2908_p2, %p2907_p1 }
  0x48   :  { %p2910_p4 = pnand %p2909_p3, %p2903_p0 }
  0x4a   :  { %2913 = shalt.err (!%p2910_p4)
}
  0x4b   :  { %s2955_s4 = smov [#allocation13]  }
  0x4c   :  { %84 = dma.vmem_to_smem %s82_s1, 16, %s2955_s4, [#allocation12]  }
  0x4d   :  { %2936 = dma.done.wait [#allocation4], 8192  }
  0x4e   :  { %2937 = vsyncadd [#allocation4], 4294959104 }
  0x4f   :  { %2938 = dma.done.wait [#allocation6], 256  }
  0x50   :  { %2939 = vsyncadd [#allocation6], 4294967040 }
  0x51   :  { %2940 = dma.done.wait [#allocation9], 144  }
  0x52   :  { %2941 = vsyncadd [#allocation9], 4294967152 }
  0x53   :  { %2942 = dma.done.wait [#allocation12], 32  }
  0x54   :  { %2943 = vsyncadd [#allocation12], 4294967264 }
  0x55   :  { %105 = sfence }
  0x56   :  { %v108_v0 = vld [vmem:[#allocation3 + $0x8] sm:$0xff]  ;;  %v110_v1 = vld [vmem:[#allocation3 + $0x18] sm:$0xff]  ;;  %v107_v2 = vld [vmem:[#allocation3] sm:$0xff]  ;;  %s3704_s18 = sld [smem:[#allocation7 + $0x1]]  ;;  %s3706_s19 = sld [smem:[#allocation7 + $0x80]] }
  0x57   :  { %v182_v3 = vand.u32 4294901760, %v108_v0  ;;  %v186_v4 = vand.u32 4294901760, %v110_v1  ;;  %v109_v5 = vld [vmem:[#allocation3 + $0x10] sm:$0xff]  ;;  %v184_v6 = vand.u32 4294901760, %v107_v2  ;;  %v112_v7 = vld [vmem:[#allocation3 + $0x28] sm:$0xff]  ;;  %v114_v8 = vld [vmem:[#allocation3 + $0x38] sm:$0xff] }
  0x58   :  { %v188_v9 = vand.u32 4294901760, %v109_v5  ;;  %v190_v10 = vand.u32 4294901760, %v112_v7  ;;  %v194_v11 = vand.u32 4294901760, %v114_v8  ;;  %v111_v12 = vld [vmem:[#allocation3 + $0x20] sm:$0xff]  ;;  %v113_v13 = vld [vmem:[#allocation3 + $0x30] sm:$0xff]  ;;  %v116_v14 = vld [vmem:[#allocation3 + $0x48] sm:$0xff] }
  0x59   :  { %v3029_v15 = vpack.c.bf16 %v186_v4, %v182_v3  ;;  %v118_v16 = vld [vmem:[#allocation3 + $0x58] sm:$0xff]  ;;  %v115_v17 = vld [vmem:[#allocation3 + $0x40] sm:$0xff]  ;;  %v3031_v18 = vld [vmem:[#allocation3 + $0x50] sm:$0xff]  ;;  %v192_v23 = vand.u32 4294901760, %v111_v12  ;;  %v196_v24 = vand.u32 4294901760, %v113_v13  ;;  %v198_v25 = vand.u32 4294901760, %v116_v14 }
  0x5a   :  { %v3033_v19 = vpack.c.bf16 %v188_v9, %v184_v6  ;;  %v3035_v20 = vpack.c.bf16 %v194_v11, %v190_v10  ;;  %v120_v21 = vld [vmem:[#allocation3 + $0x68] sm:$0xff]  ;;  %v122_v22 = vld [vmem:[#allocation3 + $0x78] sm:$0xff]  ;;  %v202_v26 = vand.u32 4294901760, %v118_v16  ;;  %v200_v27 = vand.u32 4294901760, %v115_v17  ;;  %v119_v32 = vld [vmem:[#allocation3 + $0x60] sm:$0xff]  ;;  %s3708_s20 = sld [smem:[#allocation7 + $0x81]] }
  0x5b   :  { %4997 = vst [vmem:[#allocation20_spill] sm:$0xff] %v3029_v15  ;;  %2428 = vmatprep.subr.bf16.mxu1 %v3029_v15  ;;  %2620 = vmatprep.subr.bf16.mxu0 %v3029_v15  ;;  %v204_v28 = vand.u32 4294901760, %v3031_v18  ;;  %v3044_v29 = vpack.c.bf16 %v196_v24, %v192_v23  ;;  %v206_v30 = vand.u32 4294901760, %v120_v21  ;;  %v210_v31 = vand.u32 4294901760, %v122_v22  ;;  %v121_v33 = vld [vmem:[#allocation3 + $0x70] sm:$0xff]  ;;  %v124_v35 = vld [vmem:[#allocation3 + $0x88] sm:$0xff] }
  0x5c   :  { %4998 = vst [vmem:[#allocation21_spill] sm:$0xff] %v3033_v19  ;;  %4999 = vst [vmem:[#allocation22_spill] sm:$0xff] %v3035_v20  ;;  %2430 = vmatpush1.bf16.msra.mxu1 %v3033_v19  ;;  %2622 = vmatpush1.bf16.msra.mxu0 %v3033_v19  ;;  %v3046_v34 = vpack.c.bf16 %v202_v26, %v198_v25  ;;  %v126_v36 = vld [vmem:[#allocation3 + $0x98] sm:$0xff]  ;;  %v208_v38 = vand.u32 4294901760, %v119_v32  ;;  %v212_v39 = vand.u32 4294901760, %v121_v33  ;;  %v214_v42 = vand.u32 4294901760, %v124_v35 }
  0x5d   :  { %2432 = vmatprep.subr.bf16.mxu1 %v3035_v20  ;;  %2624 = vmatprep.subr.bf16.mxu0 %v3035_v20  ;;  %5000 = vst [vmem:[#allocation23_spill] sm:$0xff] %v3044_v29  ;;  %v3050_v37 = vpack.c.bf16 %v204_v28, %v200_v27  ;;  %v3052_v40 = vsub.f32 %v108_v0, %v182_v3  ;;  %v218_v43 = vand.u32 4294901760, %v126_v36  ;;  %v123_v44 = vld [vmem:[#allocation3 + $0x80] sm:$0xff]  ;;  %v125_v45 = vld [vmem:[#allocation3 + $0x90] sm:$0xff]  ;;  %v128_v50 = vld [vmem:[#allocation3 + $0xa8] sm:$0xff]  ;;  %5257 = sst [smem:[#allocation112_spill]] %s3704_s18 }
  0x5e   :  { %5001 = vst [vmem:[#allocation24_spill] sm:$0xff] %v3046_v34  ;;  %v3056_v41 = vpack.c.bf16 %v210_v31, %v206_v30  ;;  %v3058_v46 = vsub.f32 %v110_v1, %v186_v4  ;;  %v3060_v47 = vsub.f32 %v107_v2, %v184_v6  ;;  %v3062_v48 = vsub.f32 %v109_v5, %v188_v9  ;;  %v130_v51 = vld [vmem:[#allocation3 + $0xb8] sm:$0xff]  ;;  %v127_v60 = vld [vmem:[#allocation3 + $0xa0] sm:$0xff]  ;;  %v129_v61 = vld [vmem:[#allocation3 + $0xb0] sm:$0xff]  ;;  %5258 = sst [smem:[#allocation113_spill]] %s3706_s19  ;;  %s3710_s21 = sld [smem:[#allocation8]] }
  0x5f   :  { %5002 = vst [vmem:[#allocation25_spill] sm:$0xff] %v3050_v37  ;;  %5003 = vst [vmem:[#allocation26_spill] sm:$0xff] %v3052_v40  ;;  %v3064_v49 = vsub.f32 %v112_v7, %v190_v10  ;;  %v3066_v52 = vsub.f32 %v114_v8, %v194_v11  ;;  %v3068_v53 = vsub.f32 %v111_v12, %v192_v23  ;;  %v216_v58 = vand.u32 4294901760, %v123_v44  ;;  %v132_v2 = vld [vmem:[#allocation3 + $0xc8] sm:$0xff]  ;;  %v134_v3 = vld [vmem:[#allocation3 + $0xd8] sm:$0xff]  ;;  %s3712_s22 = sld [smem:[#allocation7 + $0x100]] }
  0x60   :  { %2434 = vmatpush1.bf16.msra.mxu1 %v3044_v29  ;;  %2626 = vmatpush1.bf16.msra.mxu0 %v3044_v29  ;;  %5004 = vst [vmem:[#allocation27_spill] sm:$0xff] %v3056_v41  ;;  %5005 = vst [vmem:[#allocation28_spill] sm:$0xff] %v3058_v46  ;;  %v3070_v54 = vsub.f32 %v113_v13, %v196_v24  ;;  %v3072_v55 = vsub.f32 %v116_v14, %v198_v25  ;;  %v220_v59 = vand.u32 4294901760, %v125_v45  ;;  %v131_v8 = vld [vmem:[#allocation3 + $0xc0] sm:$0xff]  ;;  %v133_v9 = vld [vmem:[#allocation3 + $0xd0] sm:$0xff]  ;;  %5259 = sst [smem:[#allocation114_spill]] %s3708_s20 }
  0x61   :  { %2436 = vmatprep.subr.bf16.mxu1 %v3046_v34  ;;  %2628 = vmatprep.subr.bf16.mxu0 %v3046_v34  ;;  %5006 = vst [vmem:[#allocation29_spill] sm:$0xff] %v3060_v47  ;;  %5007 = vst [vmem:[#allocation30_spill] sm:$0xff] %v3062_v48  ;;  %v3074_v56 = vsub.f32 %v118_v16, %v202_v26  ;;  %v3078_v57 = vpack.c.bf16 %v212_v39, %v208_v38  ;;  %v222_v0 = vand.u32 4294901760, %v128_v50  ;;  %v147_v19 = vld [vmem:[#allocation3 + $0x140] sm:$0xff]  ;;  %v152_v15 = vld [vmem:[#allocation3 + $0x168] sm:$0xff]  ;;  %s3714_s23 = sld [smem:[#allocation11]] }
  0x62   :  { %5008 = vst [vmem:[#allocation31_spill] sm:$0xff] %v3064_v49  ;;  %5009 = vst [vmem:[#allocation32_spill] sm:$0xff] %v3066_v52  ;;  %v3080_v62 = vsub.f32 %v115_v17, %v200_v27  ;;  %v3084_v63 = vpack.c.bf16 %v218_v43, %v214_v42  ;;  %v226_v1 = vand.u32 4294901760, %v130_v51  ;;  %v3087_v4 = vsub.f32 %v3031_v18, %v204_v28  ;;  %v135_v27 = vld [vmem:[#allocation3 + $0xe0] sm:$0xff]  ;;  %v137_v28 = vld [vmem:[#allocation3 + $0xf0] sm:$0xff]  ;;  %s3716_s24 = sld [smem:[#allocation11 + $0x1]] }
  0x63   :  { %5010 = vst [vmem:[#allocation33_spill] sm:$0xff] %v3068_v53  ;;  %5011 = vst [vmem:[#allocation34_spill] sm:$0xff] %v3070_v54  ;;  %v3089_v5 = vsub.f32 %v120_v21, %v206_v30  ;;  %v3091_v6 = vsub.f32 %v122_v22, %v210_v31  ;;  %v3093_v7 = vsub.f32 %v119_v32, %v208_v38  ;;  %v224_v12 = vand.u32 4294901760, %v127_v60  ;;  %v136_v21 = vld [vmem:[#allocation3 + $0xe8] sm:$0xff]  ;;  %v138_v22 = vld [vmem:[#allocation3 + $0xf8] sm:$0xff]  ;;  %s3718_s25 = sld [smem:[#allocation11 + $0x2]] }
  0x64   :  { %2438 = vmatpush1.bf16.msra.mxu1 %v3050_v37  ;;  %2630 = vmatpush1.bf16.msra.mxu0 %v3050_v37  ;;  %5012 = vst [vmem:[#allocation35_spill] sm:$0xff] %v3078_v57  ;;  %5013 = vst [vmem:[#allocation36_spill] sm:$0xff] %v3084_v63  ;;  %v3095_v10 = vsub.f32 %v121_v33, %v212_v39  ;;  %v3097_v11 = vsub.f32 %v124_v35, %v214_v42  ;;  %v228_v13 = vand.u32 4294901760, %v129_v61  ;;  %v140_v35 = vld [vmem:[#allocation3 + $0x108] sm:$0xff]  ;;  %5260 = sst [smem:[#allocation115_spill]] %s3710_s21  ;;  %s3720_s2 = sld [smem:[#allocation11 + $0x3]] }
  0x65   :  { %2440 = vmatprep.subr.bf16.mxu1 %v3056_v41  ;;  %2632 = vmatprep.subr.bf16.mxu0 %v3056_v41  ;;  %5014 = vst [vmem:[#allocation37_spill] sm:$0xff] %v3089_v5  ;;  %5015 = vst [vmem:[#allocation38_spill] sm:$0xff] %v3091_v6  ;;  %v3101_v14 = vsub.f32 %v126_v36, %v218_v43  ;;  %v3103_v16 = vpack.c.bf16 %v220_v59, %v216_v58  ;;  %v230_v17 = vand.u32 4294901760, %v132_v2  ;;  %v142_v36 = vld [vmem:[#allocation3 + $0x118] sm:$0xff]  ;;  %v145_v41 = vld [vmem:[#allocation3 + $0x130] sm:$0xff]  ;;  %5261 = sst [smem:[#allocation116_spill]] %s3712_s22 }
  0x66   :  { %5016 = vst [vmem:[#allocation39_spill] sm:$0xff] %v3093_v7  ;;  %5017 = vst [vmem:[#allocation40_spill] sm:$0xff] %v3095_v10  ;;  %v234_v18 = vand.u32 4294901760, %v134_v3  ;;  %v3107_v23 = vsub.f32 %v123_v44, %v216_v58  ;;  %v3109_v24 = vpack.c.bf16 %v226_v1, %v222_v0  ;;  %v232_v25 = vand.u32 4294901760, %v131_v8  ;;  %v139_v44 = vld [vmem:[#allocation3 + $0x100] sm:$0xff]  ;;  %v141_v58 = vld [vmem:[#allocation3 + $0x110] sm:$0xff] }
  0x67   :  { %5018 = vst [vmem:[#allocation41_spill] sm:$0xff] %v3103_v16  ;;  %v236_v26 = vand.u32 4294901760, %v133_v9  ;;  %v3111_v30 = vsub.f32 %v125_v45, %v220_v59  ;;  %v3113_v31 = vsub.f32 %v128_v50, %v222_v0  ;;  %v3115_v32 = vsub.f32 %v130_v51, %v226_v1  ;;  %v146_v0 = vld [vmem:[#allocation3 + $0x138] sm:$0xff]  ;;  %5262 = sst [smem:[#allocation117_spill]] %s3714_s23  ;;  %s3722_s26 = sld [smem:[#allocation11 + $0x4]] }
  0x68   :  { %2442 = vmatpush1.bf16.msra.mxu1 %v3078_v57  ;;  %2634 = vmatpush1.bf16.msra.mxu0 %v3078_v57  ;;  %5019 = vst [vmem:[#allocation42_spill] sm:$0xff] %v3107_v23  ;;  %5020 = vst [vmem:[#allocation43_spill] sm:$0xff] %v3109_v24  ;;  %v3117_v33 = vsub.f32 %v127_v60, %v224_v12  ;;  %v3119_v38 = vpack.c.bf16 %v228_v13, %v224_v12  ;;  %v238_v42 = vand.u32 4294901760, %v136_v21  ;;  %v144_v60 = vld [vmem:[#allocation3 + $0x128] sm:$0xff]  ;;  %v143_v57 = vld [vmem:[#allocation3 + $0x120] sm:$0xff]  ;;  %5263 = sst [smem:[#allocation118_spill]] %s3716_s24 }
  0x69   :  { %2444 = vmatprep.subr.bf16.mxu1 %v3084_v63  ;;  %2636 = vmatprep.subr.bf16.mxu0 %v3084_v63  ;;  %5021 = vst [vmem:[#allocation44_spill] sm:$0xff] %v3111_v30  ;;  %5022 = vst [vmem:[#allocation45_spill] sm:$0xff] %v3113_v31  ;;  %v3121_v39 = vsub.f32 %v129_v61, %v228_v13  ;;  %v242_v43 = vand.u32 4294901760, %v138_v22  ;;  %v3125_v45 = vpack.c.bf16 %v234_v18, %v230_v17  ;;  %5264 = sst [smem:[#allocation119_spill]] %s3718_s25  ;;  %s3724_s27 = sld [smem:[#allocation11 + $0x5]] }
  0x6a   :  { %5023 = vst [vmem:[#allocation46_spill] sm:$0xff] %v3115_v32  ;;  %5024 = vst [vmem:[#allocation47_spill] sm:$0xff] %v3117_v33  ;;  %v3127_v50 = vsub.f32 %v132_v2, %v230_v17  ;;  %v240_v51 = vand.u32 4294901760, %v135_v27  ;;  %v244_v59 = vand.u32 4294901760, %v137_v28  ;;  %v3131_v61 = vsub.f32 %v134_v3, %v234_v18  ;;  %v148_v18 = vld [vmem:[#allocation3 + $0x148] sm:$0xff]  ;;  %5265 = sst [smem:[#allocation120_spill]] %s3720_s2 }
  0x6b   :  { %5025 = vst [vmem:[#allocation48_spill] sm:$0xff] %v3119_v38  ;;  %5026 = vst [vmem:[#allocation49_spill] sm:$0xff] %v3121_v39  ;;  %v3133_v1 = vpack.c.bf16 %v236_v26, %v232_v25  ;;  %v246_v12 = vand.u32 4294901760, %v140_v35  ;;  %v250_v13 = vand.u32 4294901760, %v142_v36  ;;  %v3135_v63 = vsub.f32 %v131_v8, %v232_v25  ;;  %v150_v25 = vld [vmem:[#allocation3 + $0x158] sm:$0xff]  ;;  %s3726_s28 = sld [smem:[#allocation11 + $0x6]] }
  0x6c   :  { %2446 = vmatpush1.bf16.msra.mxu1 %v3103_v16  ;;  %2638 = vmatpush1.bf16.msra.mxu0 %v3103_v16  ;;  %5027 = vst [vmem:[#allocation50_spill] sm:$0xff] %v3125_v45  ;;  %5028 = vst [vmem:[#allocation51_spill] sm:$0xff] %v3127_v50  ;;  %v3137_v16 = vsub.f32 %v133_v9, %v236_v26  ;;  %v248_v2 = vand.u32 4294901760, %v139_v44  ;;  %v252_v17 = vand.u32 4294901760, %v141_v58  ;;  %v254_v29 = vand.u32 4294901760, %v144_v60  ;;  %s3728_s29 = sld [smem:[#allocation11 + $0x7]] }
  0x6d   :  { %2448 = vmatprep.subr.bf16.mxu1 %v3109_v24  ;;  %2640 = vmatprep.subr.bf16.mxu0 %v3109_v24  ;;  %5029 = vst [vmem:[#allocation52_spill] sm:$0xff] %v3131_v61  ;;  %5030 = vst [vmem:[#allocation53_spill] sm:$0xff] %v3133_v1  ;;  %v3139_v37 = vpack.c.bf16 %v242_v43, %v238_v42  ;;  %v3141_v34 = vsub.f32 %v136_v21, %v238_v42  ;;  %v258_v24 = vand.u32 4294901760, %v146_v0  ;;  %5266 = sst [smem:[#allocation121_spill]] %s3722_s26  ;;  %s3730_s30 = sld [smem:[#allocation10]] }
  0x6e   :  { %5031 = vst [vmem:[#allocation54_spill] sm:$0xff] %v3135_v63  ;;  %5032 = vst [vmem:[#allocation55_spill] sm:$0xff] %v3137_v16  ;;  %v3145_v3 = vsub.f32 %v138_v22, %v242_v43  ;;  %v3147_v8 = vpack.c.bf16 %v244_v59, %v240_v51  ;;  %v3149_v9 = vsub.f32 %v135_v27, %v240_v51  ;;  %v256_v42 = vand.u32 4294901760, %v143_v57  ;;  %v166_v16 = vld [vmem:[#allocation3 + $0x1d8] sm:$0xff]  ;;  %s3732_s9 = sld [smem:[#allocation10 + $0x80]]  ;;  %s3746_s1 = sld [smem:[#allocation8 + $0x1]] }
  0x6f   :  { %5033 = vst [vmem:[#allocation56_spill] sm:$0xff] %v3139_v37  ;;  %5034 = vst [vmem:[#allocation57_spill] sm:$0xff] %v3141_v34  ;;  %v3153_v21 = vsub.f32 %v137_v28, %v244_v59  ;;  %v3155_v26 = vpack.c.bf16 %v250_v13, %v246_v12  ;;  %v260_v20 = vand.u32 4294901760, %v145_v41  ;;  %v3157_v22 = vsub.f32 %v140_v35, %v246_v12  ;;  %v153_v34 = vld [vmem:[#allocation3 + $0x170] sm:$0xff]  ;;  %5267 = sst [smem:[#allocation122_spill]] %s3724_s27  ;;  %s3734_s10 = sld [smem:[#allocation10 + $0x100]] }
  0x70   :  { %2450 = vmatpush1.bf16.msra.mxu1 %v3119_v38  ;;  %2642 = vmatpush1.bf16.msra.mxu0 %v3119_v38  ;;  %5035 = vst [vmem:[#allocation58_spill] sm:$0xff] %v3145_v3  ;;  %5036 = vst [vmem:[#allocation59_spill] sm:$0xff] %v3147_v8  ;;  %v149_v38 = vld [vmem:[#allocation3 + $0x150] sm:$0xff]  ;;  %v3159_v43 = vsub.f32 %v142_v36, %v250_v13  ;;  %v3161_v27 = vpack.c.bf16 %v252_v17, %v248_v2  ;;  %v262_v28 = vand.u32 4294901760, %v148_v18  ;;  %v151_v3 = vld [vmem:[#allocation3 + $0x160] sm:$0xff]  ;;  %s3736_s11 = sld [smem:[#allocation10 + $0x180]] }
  0x71   :  { %5037 = vst [vmem:[#allocation60_spill] sm:$0xff] %v3149_v9  ;;  %2452 = vmatprep.subr.bf16.mxu1 %v3125_v45  ;;  %2644 = vmatprep.subr.bf16.mxu0 %v3125_v45  ;;  %5038 = vst [vmem:[#allocation61_spill] sm:$0xff] %v3153_v21  ;;  %v3163_v51 = vsub.f32 %v139_v44, %v248_v2  ;;  %v3165_v9 = vsub.f32 %v141_v58, %v252_v17  ;;  %v266_v59 = vand.u32 4294901760, %v150_v25  ;;  %v154_v21 = vld [vmem:[#allocation3 + $0x178] sm:$0xff]  ;;  %v156_v13 = vld [vmem:[#allocation3 + $0x188] sm:$0xff]  ;;  %5268 = sst [smem:[#allocation123_spill]] %s3726_s28 }
  0x72   :  { %5039 = vst [vmem:[#allocation62_spill] sm:$0xff] %v3155_v26  ;;  %5040 = vst [vmem:[#allocation63_spill] sm:$0xff] %v3157_v22  ;;  %v3167_v45 = vpack.c.bf16 %v258_v24, %v254_v29  ;;  %v3171_v35 = vsub.f32 %v144_v60, %v254_v29  ;;  %v3173_v36 = vsub.f32 %v146_v0, %v258_v24  ;;  %v264_v44 = vand.u32 4294901760, %v147_v19  ;;  %v158_v58 = vld [vmem:[#allocation3 + $0x198] sm:$0xff]  ;;  %v155_v24 = vld [vmem:[#allocation3 + $0x180] sm:$0xff]  ;;  %5269 = sst [smem:[#allocation124_spill]] %s3728_s29 }
  0x73   :  { %5041 = vst [vmem:[#allocation64_spill] sm:$0xff] %v3159_v43  ;;  %5042 = vst [vmem:[#allocation65_spill] sm:$0xff] %v3161_v27  ;;  %v268_v12 = vand.u32 4294901760, %v149_v38  ;;  %v3177_v2 = vpack.c.bf16 %v260_v20, %v256_v42  ;;  %v3179_v17 = vsub.f32 %v143_v57, %v256_v42  ;;  %v272_v29 = vand.u32 4294901760, %v151_v3  ;;  %v157_v0 = vld [vmem:[#allocation3 + $0x190] sm:$0xff]  ;;  %v160_v42 = vld [vmem:[#allocation3 + $0x1a8] sm:$0xff] }
  0x74   :  { %5043 = vst [vmem:[#allocation66_spill] sm:$0xff] %v3163_v51  ;;  %5044 = vst [vmem:[#allocation67_spill] sm:$0xff] %v3165_v9  ;;  %2454 = vmatpush1.bf16.msra.mxu1 %v3133_v1  ;;  %2646 = vmatpush1.bf16.msra.mxu0 %v3133_v1  ;;  %v3181_v9 = vsub.f32 %v145_v41, %v260_v20  ;;  %v270_v51 = vand.u32 4294901760, %v152_v15  ;;  %v274_v1 = vand.u32 4294901760, %v154_v21  ;;  %v276_v60 = vand.u32 4294901760, %v153_v34  ;;  %5270 = sst [smem:[#allocation125_spill]] %s3730_s30 }
  0x75   :  { %5045 = vst [vmem:[#allocation68_spill] sm:$0xff] %v3167_v45  ;;  %5046 = vst [vmem:[#allocation69_spill] sm:$0xff] %v3171_v35  ;;  %2456 = vmatprep.subr.bf16.mxu1 %v3139_v37  ;;  %2648 = vmatprep.subr.bf16.mxu0 %v3139_v37  ;;  %v3185_v35 = vsub.f32 %v148_v18, %v262_v28  ;;  %v278_v43 = vand.u32 4294901760, %v156_v13  ;;  %v282_v22 = vand.u32 4294901760, %v158_v58  ;;  %v162_v37 = vld [vmem:[#allocation3 + $0x1b8] sm:$0xff]  ;;  %5271 = sst [smem:[#allocation126_spill]] %s3732_s9 }
  0x76   :  { %5047 = vst [vmem:[#allocation70_spill] sm:$0xff] %v3173_v36  ;;  %5048 = vst [vmem:[#allocation71_spill] sm:$0xff] %v3177_v2  ;;  %v3183_v36 = vpack.c.bf16 %v266_v59, %v262_v28  ;;  %v3189_v57 = vsub.f32 %v150_v25, %v266_v59  ;;  %v3191_v20 = vpack.c.bf16 %v268_v12, %v264_v44  ;;  %v161_v25 = vld [vmem:[#allocation3 + $0x1b0] sm:$0xff]  ;;  %5272 = sst [smem:[#allocation127_spill]] %s3734_s10  ;;  %s3748_s14 = sld [smem:[#allocation10 + $0x1]] }
  0x77   :  { %5049 = vst [vmem:[#allocation72_spill] sm:$0xff] %v3179_v17  ;;  %5050 = vst [vmem:[#allocation73_spill] sm:$0xff] %v3181_v9  ;;  %v3193_v41 = vsub.f32 %v147_v19, %v264_v44  ;;  %v172_v9 = vlaneseq  ;;  %v3197_v18 = vsub.f32 %v149_v38, %v268_v12  ;;  %v3199_v28 = vsub.f32 %v152_v15, %v270_v51  ;;  %5273 = sst [smem:[#allocation128_spill]] %s3736_s11  ;;  %s3738_s12 = sld [smem:[#allocation10 + $0x200]] }
  0x78   :  { %5051 = vst [vmem:[#allocation74_spill] sm:$0xff] %v3183_v36  ;;  %5052 = vst [vmem:[#allocation75_spill] sm:$0xff] %v3185_v35  ;;  %2458 = vmatpush1.bf16.msra.mxu1 %v3147_v8  ;;  %2650 = vmatpush1.bf16.msra.mxu0 %v3147_v8  ;;  %v280_v35 = vand.u32 4294901760, %v155_v24  ;;  %v284_v17 = vand.u32 4294901760, %v157_v0  ;;  %v159_v8 = vld [vmem:[#allocation3 + $0x1a0] sm:$0xff]  ;;  %v3201_v59 = vpack.c.bf16 %v274_v1, %v270_v51  ;;  %v286_v15 = vand.u32 4294901760, %v160_v42 }
  0x79   :  { %5053 = vst [vmem:[#allocation76_spill] sm:$0xff] %v3189_v57  ;;  %5054 = vst [vmem:[#allocation77_spill] sm:$0xff] %v3191_v20  ;;  %2460 = vmatprep.subr.bf16.mxu1 %v3155_v26  ;;  %2652 = vmatprep.subr.bf16.mxu0 %v3155_v26  ;;  %v3203_v57 = vsub.f32 %v154_v21, %v274_v1  ;;  %v3205_v19 = vpack.c.bf16 %v276_v60, %v272_v29  ;;  %v290_v12 = vand.u32 4294901760, %v162_v37  ;;  %v163_v26 = vld [vmem:[#allocation3 + $0x1c0] sm:$0xff]  ;;  %s3740_s13 = sld [smem:[#allocation10 + $0x280]]  ;;  %5278 = sst [smem:[#allocation133_spill]] %s3746_s1 }
  0x7a   :  { %5055 = vst [vmem:[#allocation78_spill] sm:$0xff] %v3193_v41  ;;  %5056 = vst [vmem:[#allocation79_spill] sm:$0xff] %v3199_v28  ;;  %v3207_v44 = vsub.f32 %v151_v3, %v272_v29  ;;  %v164_v41 = vld [vmem:[#allocation3 + $0x1c8] sm:$0xff]  ;;  %v3209_v63 = vsub.f32 %v153_v34, %v276_v60  ;;  %v3211_v38 = vpack.c.bf16 %v282_v22, %v278_v43  ;;  %v165_v28 = vld [vmem:[#allocation3 + $0x1d0] sm:$0xff]  ;;  %v288_v3 = vand.u32 4294901760, %v159_v8  ;;  %s3742_s3 = sld [smem:[#allocation10 + $0x300]] }
  0x7b   :  { %5057 = vst [vmem:[#allocation80_spill] sm:$0xff] %v3201_v59  ;;  %5058 = vst [vmem:[#allocation81_spill] sm:$0xff] %v3203_v57  ;;  %v3215_v1 = vsub.f32 %v156_v13, %v278_v43  ;;  %v3217_v21 = vsub.f32 %v158_v58, %v282_v22  ;;  %v292_v51 = vand.u32 4294901760, %v161_v25  ;;  %v3221_v34 = vpack.c.bf16 %v284_v17, %v280_v35  ;;  %v168_v43 = vld [vmem:[#allocation3 + $0x1e8] sm:$0xff]  ;;  %s3744_s5 = sld [smem:[#allocation10 + $0x380]]  ;;  %s3750_s15 = sld [smem:[#allocation10 + $0x81]] }
  0x7c   :  { %5059 = vst [vmem:[#allocation82_spill] sm:$0xff] %v3205_v19  ;;  %5060 = vst [vmem:[#allocation83_spill] sm:$0xff] %v3207_v44  ;;  %2462 = vmatpush1.bf16.msra.mxu1 %v3161_v27  ;;  %2654 = vmatpush1.bf16.msra.mxu0 %v3161_v27  ;;  %v3223_v29 = vsub.f32 %v155_v24, %v280_v35  ;;  %v294_v60 = vand.u32 4294901760, %v164_v41  ;;  %v3225_v44 = vsub.f32 %v157_v0, %v284_v17  ;;  %v106_v35 = vld [vmem:[%s4683_s0] sm:$0x3]  ;;  %s3702_s0 = sld [smem:[#allocation7]] }
  0x7d   :  { %5061 = vst [vmem:[#allocation84_spill] sm:$0xff] %v3209_v63  ;;  %5062 = vst [vmem:[#allocation85_spill] sm:$0xff] %v3211_v38  ;;  %2464 = vmatprep.subr.bf16.mxu1 %v3167_v45  ;;  %2656 = vmatprep.subr.bf16.mxu0 %v3167_v45  ;;  %v298_v63 = vand.u32 4294901760, %v166_v16  ;;  %v296_v57 = vand.u32 4294901760, %v163_v26  ;;  %v300_v27 = vand.u32 4294901760, %v165_v28  ;;  %v173_v13 = vshrl.u32 %v172_v9, 7 }
  0x7e   :  { %5063 = vst [vmem:[#allocation86_spill] sm:$0xff] %v3215_v1  ;;  %5064 = vst [vmem:[#allocation87_spill] sm:$0xff] %v3217_v21  ;;  %v3227_v22 = vpack.c.bf16 %v290_v12, %v286_v15  ;;  %v3229_v58 = vsub.f32 %v160_v42, %v286_v15  ;;  %v3231_v21 = vsub.f32 %v162_v37, %v290_v12  ;;  %v170_v45 = vld [vmem:[#allocation3 + $0x1f8] sm:$0xff]  ;;  %v302_v15 = vand.u32 4294901760, %v168_v43  ;;  %5274 = sst [smem:[#allocation129_spill]] %s3738_s12  ;;  %s3752_s16 = sld [smem:[#allocation10 + $0x101]] }
  0x7f   :  { %5065 = vst [vmem:[#allocation88_spill] sm:$0xff] %v3221_v34  ;;  %5066 = vst [vmem:[#allocation89_spill] sm:$0xff] %v3223_v29  ;;  %v3233_v1 = vsub.f32 %v159_v8, %v288_v3  ;;  %v3240_v17 = vpack.c.bf16 %v292_v51, %v288_v3  ;;  %v3242_v9 = vsub.f32 %v161_v25, %v292_v51  ;;  %v174_v24 = vsub.s32 0, %v173_v13  ;;  %v167_v3 = vld [vmem:[#allocation3 + $0x1e0] sm:$0xff]  ;;  %5275 = sst [smem:[#allocation130_spill]] %s3740_s13  ;;  %s3754_s4 = sld [smem:[#allocation10 + $0x181]] }
  0x80   :  { %5067 = vst [vmem:[#allocation90_spill] sm:$0xff] %v3225_v44  ;;  %5068 = vst [vmem:[#allocation91_spill] sm:$0xff] %v3227_v22  ;;  %2466 = vmatpush1.bf16.msra.mxu1 %v3177_v2  ;;  %2658 = vmatpush1.bf16.msra.mxu0 %v3177_v2  ;;  %v178_v0 = vsub.s32 1, %v173_v13  ;;  %v3246_v37 = vpack.c.bf16 %v298_v63, %v294_v60  ;;  %v3248_v8 = vsub.f32 %v164_v41, %v294_v60  ;;  %5276 = sst [smem:[#allocation131_spill]] %s3742_s3  ;;  %s3756_s6 = sld [smem:[#allocation10 + $0x201]] }
  0x81   :  { %5069 = vst [vmem:[#allocation92_spill] sm:$0xff] %v3229_v58  ;;  %5070 = vst [vmem:[#allocation93_spill] sm:$0xff] %v3231_v21  ;;  %2468 = vmatprep.subr.bf16.mxu1 %v3183_v36  ;;  %2660 = vmatprep.subr.bf16.mxu0 %v3183_v36  ;;  %v3250_v42 = vsub.f32 %v166_v16, %v298_v63  ;;  %v3252_v12 = vpack.c.bf16 %v300_v27, %v296_v57  ;;  %v306_v2 = vand.u32 4294901760, %v170_v45  ;;  %5277 = sst [smem:[#allocation132_spill]] %s3744_s5  ;;  %s3758_s17 = sld [smem:[#allocation10 + $0x281]] }
  0x82   :  { %5071 = vst [vmem:[#allocation94_spill] sm:$0xff] %v3233_v1  ;;  %5072 = vst [vmem:[#allocation95_spill] sm:$0xff] %v3240_v17  ;;  %v169_v1 = vld [vmem:[#allocation3 + $0x1f0] sm:$0xff]  ;;  %v175_v25 = vrot.slane %v106_v35, %v174_v24  ;;  %v179_v51 = vrot.slane %v106_v35, %v178_v0  ;;  %v3256_v13 = vsub.f32 %v165_v28, %v300_v27  ;;  %v329_v36 = vand.u32 4294901760, %v3052_v40  ;;  %5256 = sst [smem:[#allocation111_spill]] %s3702_s0  ;;  %s3760_s8 = sld [smem:[#allocation10 + $0x301]] }
  0x83   :  { %5073 = vst [vmem:[#allocation96_spill] sm:$0xff] %v3242_v9  ;;  %5074 = vst [vmem:[#allocation97_spill] sm:$0xff] %v3246_v37  ;;  %v3254_v9 = vsub.f32 %v163_v26, %v296_v57  ;;  %v341_v21 = vand.u32 4294901760, %v3058_v46  ;;  %v335_v41 = vand.u32 4294901760, %v3060_v47  ;;  %v347_v60 = vand.u32 4294901760, %v3062_v48  ;;  %5279 = sst [smem:[#allocation134_spill]] %s3748_s14 }
  0x84   :  { %5075 = vst [vmem:[#allocation98_spill] sm:$0xff] %v3250_v42  ;;  %5076 = vst [vmem:[#allocation99_spill] sm:$0xff] %v3252_v12  ;;  %2470 = vmatpush1.bf16.msra.mxu1 %v3191_v20  ;;  %2662 = vmatpush1.bf16.msra.mxu0 %v3191_v20  ;;  %v3262_v63 = vand.u32 4294901760, %v179_v51  ;;  %v3264_v16 = vand.u32 4294901760, %v175_v25  ;;  %v3270_v26 = vsub.f32 %v168_v43, %v302_v15  ;;  %v304_v27 = vand.u32 4294901760, %v167_v3  ;;  %5280 = sst [smem:[#allocation135_spill]] %s3750_s15 }
  0x85   :  { %5077 = vst [vmem:[#allocation100_spill] sm:$0xff] %v3254_v9  ;;  %5078 = vst [vmem:[#allocation101_spill] sm:$0xff] %v3256_v13  ;;  %2472 = vmatprep.subr.bf16.mxu1 %v3201_v59  ;;  %2664 = vmatprep.subr.bf16.mxu0 %v3201_v59  ;;  %v308_v57 = vand.u32 4294901760, %v169_v1  ;;  %v353_v28 = vand.u32 4294901760, %v3064_v49  ;;  %v3273_v35 = vpack.c.bf16 %v306_v2, %v302_v15  ;;  %v365_v20 = vand.u32 4294901760, %v3066_v52  ;;  %5281 = sst [smem:[#allocation136_spill]] %s3752_s16 }
  0x86   :  { %5079 = vst [vmem:[#allocation102_spill] sm:$0xff] %v3262_v63  ;;  %5080 = vst [vmem:[#allocation103_spill] sm:$0xff] %v3264_v16  ;;  %v3275_v24 = vsub.f32 %v170_v45, %v306_v2  ;;  %v3278_v0 = vsub.f32 %v179_v51, %v3262_v63  ;;  %v330_v13 = vsub.f32 %v3052_v40, %v329_v36  ;;  %v359_v43 = vand.u32 4294901760, %v3068_v53  ;;  %5282 = sst [smem:[#allocation137_spill]] %s3754_s4  ;;  %s3762_s7 = sld [smem:[#allocation10 + $0x381]] }
  0x87   :  { %5081 = vst [vmem:[#allocation104_spill] sm:$0xff] %v3270_v26  ;;  %5082 = vst [vmem:[#allocation105_spill] sm:$0xff] %v3273_v35  ;;  %v3283_v9 = vsub.f32 %v175_v25, %v3264_v16  ;;  %v371_v59 = vand.u32 4294901760, %v3070_v54  ;;  %v342_v2 = vsub.f32 %v3058_v46, %v341_v21  ;;  %v336_v15 = vsub.f32 %v3060_v47, %v335_v41  ;;  %5283 = sst [smem:[#allocation138_spill]] %s3756_s6  ;;  %s3764_s3 = sld [smem:[#allocation7 + $0x101]] }
  0x88   :  { %5083 = vst [vmem:[#allocation106_spill] sm:$0xff] %v3275_v24  ;;  %5084 = vst [vmem:[#allocation107_spill] sm:$0xff] %v3278_v0  ;;  %2474 = vmatpush1.bf16.msra.mxu1 %v3205_v19  ;;  %2666 = vmatpush1.bf16.msra.mxu0 %v3205_v19  ;;  %v312_v45 = vand.u32 4294901760, %v3278_v0  ;;  %v348_v51 = vsub.f32 %v3062_v48, %v347_v60  ;;  %v3295_v25 = vpack.c.bf16 %v308_v57, %v304_v27  ;;  %5284 = sst [smem:[#allocation139_spill]] %s3758_s17  ;;  %s3766_s5 = sld [smem:[#allocation8 + $0x2]] }
  0x89   :  { %5085 = vst [vmem:[#allocation108_spill] sm:$0xff] %v3283_v9  ;;  %2476 = vmatprep.subr.bf16.mxu1 %v3211_v38  ;;  %2668 = vmatprep.subr.bf16.mxu0 %v3211_v38  ;;  %v3297_v16 = vsub.f32 %v167_v3, %v304_v27  ;;  %v354_v40 = vsub.f32 %v3064_v49, %v353_v28  ;;  %v377_v46 = vand.u32 4294901760, %v3072_v55  ;;  %v389_v47 = vand.u32 4294901760, %v3074_v56  ;;  %5285 = sst [smem:[#allocation140_spill]] %s3760_s8  ;;  %s3768_s1 = sld [smem:[#allocation10 + $0x2]] }
  0x8a   :  { %5086 = vst [vmem:[#allocation109_spill] sm:$0xff] %v3295_v25  ;;  %v313_v19 = vsub.f32 %v3278_v0, %v312_v45  ;;  %1054 = vmatprep.mubr.f32.mxu0 %v312_v45  ;;  %v366_v24 = vsub.f32 %v3066_v52, %v365_v20  ;;  %v331_v48 = vand.u32 4294901760, %v330_v13  ;;  %v360_v38 = vsub.f32 %v3068_v53, %v359_v43  ;;  %s3770_s14 = sld [smem:[#allocation10 + $0x82]] }
  0x8b   :  { %v372_v42 = vsub.f32 %v3070_v54, %v371_v59  ;;  %v343_v27 = vand.u32 4294901760, %v342_v2  ;;  %v337_v45 = vand.u32 4294901760, %v336_v15  ;;  %v349_v0 = vand.u32 4294901760, %v348_v51  ;;  %s3772_s15 = sld [smem:[#allocation10 + $0x102]] }
  0x8c   :  { %2478 = vmatpush1.bf16.msra.mxu1 %v3221_v34  ;;  %2670 = vmatpush1.bf16.msra.mxu0 %v3221_v34  ;;  %v314_v3 = vand.u32 4294901760, %v313_v19  ;;  %v3311_v52 = vsub.f32 %v169_v1, %v308_v57  ;;  %v2683_v13 = vpack.c.bf16 %v341_v21, %v329_v36  ;;  %v3313_v26 = vpack.c.bf16 %v347_v60, %v335_v41  ;;  %5286 = sst [smem:[#allocation141_spill]] %s3762_s7  ;;  %s3774_s16 = sld [smem:[#allocation10 + $0x182]] }
  0x8d   :  { %2480 = vmatprep.subr.bf16.mxu1 %v3227_v22  ;;  %2672 = vmatprep.subr.bf16.mxu0 %v3227_v22  ;;  %v355_v49 = vand.u32 4294901760, %v354_v40  ;;  %v367_v54 = vand.u32 4294901760, %v366_v24  ;;  %v378_v53 = vsub.f32 %v3072_v55, %v377_v46  ;;  %v390_v34 = vsub.f32 %v3074_v56, %v389_v47  ;;  %5287 = sst [smem:[#allocation142_spill]] %s3764_s3  ;;  %s3776_s4 = sld [smem:[#allocation10 + $0x202]] }
  0x8e   :  { %5087 = vst [vmem:[#allocation110_spill] sm:$0xff] %v3311_v52  ;;  %315 = vmatprep.mubr.f32.mxu1 %v314_v3  ;;  %v383_v19 = vand.u32 4294901760, %v3080_v62  ;;  %v5088_v2 = vand.u32 4294901760, %v3283_v9  ;;  %v361_v51 = vand.u32 4294901760, %v360_v38  ;;  %v373_v22 = vand.u32 4294901760, %v372_v42  ;;  %5288 = sst [smem:[#allocation143_spill]] %s3766_s5 }
  0x8f   :  { %v395_v1 = vand.u32 4294901760, %v3087_v4  ;;  %v2491_v40 = vpack.c.bf16 %v343_v27, %v331_v48  ;;  %v2493_v36 = vpack.c.bf16 %v349_v0, %v337_v45  ;;  %v401_v21 = vand.u32 4294901760, %v3089_v5  ;;  %5289 = sst [smem:[#allocation144_spill]] %s3768_s1  ;;  %s3778_s6 = sld [smem:[#allocation10 + $0x282]] }
  0x90   :  { %v319_v15 = vsub.f32 %v3283_v9, %v5088_v2  ;;  %2482 = vmatpush1.bf16.msra.mxu1 %v3240_v17  ;;  %2674 = vmatpush1.bf16.msra.mxu0 %v3240_v17  ;;  %v413_v41 = vand.u32 4294901760, %v3091_v6  ;;  %v2687_v60 = vpack.c.bf16 %v365_v20, %v353_v28  ;;  %v3328_v57 = vpack.c.bf16 %v371_v59, %v359_v43  ;;  %5290 = sst [smem:[#allocation145_spill]] %s3770_s14  ;;  %s3784_s7 = sld [smem:[#allocation7 + $0x180]] }
  0x91   :  { %2484 = vmatprep.subr.bf16.mxu1 %v3246_v37  ;;  %2676 = vmatprep.subr.bf16.mxu0 %v3246_v37  ;;  %v407_v38 = vand.u32 4294901760, %v3093_v7  ;;  %v419_v42 = vand.u32 4294901760, %v3095_v10  ;;  %v2495_v24 = vpack.c.bf16 %v367_v54, %v355_v49  ;;  %v379_v3 = vand.u32 4294901760, %v378_v53  ;;  %5291 = sst [smem:[#allocation146_spill]] %s3772_s15  ;;  %s3780_s17 = sld [smem:[#allocation10 + $0x302]] }
  0x92   :  { %v391_v2 = vand.u32 4294901760, %v390_v34  ;;  %v384_v48 = vsub.f32 %v3080_v62, %v383_v19  ;;  %v320_v0 = vand.u32 4294901760, %v319_v15  ;;  %v3333_v27 = vpack.c.bf16 %v373_v22, %v361_v51  ;;  %5292 = sst [smem:[#allocation147_spill]] %s3774_s16  ;;  %s3782_s8 = sld [smem:[#allocation10 + $0x382]] }
  0x93   :  { %v3335_v45 = vpack.c.bf16 %v389_v47, %v377_v46  ;;  %v396_v17 = vsub.f32 %v3087_v4, %v395_v1  ;;  %v402_v20 = vsub.f32 %v3089_v5, %v401_v21  ;;  %v414_v59 = vsub.f32 %v3091_v6, %v413_v41  ;;  %5293 = sst [smem:[#allocation148_spill]] %s3776_s4  ;;  %s3786_s3 = sld [smem:[#allocation7 + $0x181]] }
  0x94   :  { %2486 = vmatpush1.bf16.msra.mxu1 %v3252_v12  ;;  %2678 = vmatpush1.bf16.msra.mxu0 %v3252_v12  ;;  %v425_v49 = vand.u32 4294901760, %v3097_v11  ;;  %v437_v53 = vand.u32 4294901760, %v3101_v14  ;;  %v408_v46 = vsub.f32 %v3093_v7, %v407_v38  ;;  %v420_v47 = vsub.f32 %v3095_v10, %v419_v42  ;;  %s3788_s5 = sld [smem:[#allocation8 + $0x3]] }
  0x95   :  { %2488 = vmatprep.subr.bf16.mxu1 %v3273_v35  ;;  %2680 = vmatprep.subr.bf16.mxu0 %v3273_v35  ;;  %v431_v54 = vand.u32 4294901760, %v3107_v23  ;;  %v443_v34 = vand.u32 4294901760, %v3111_v30  ;;  %v2499_v22 = vpack.c.bf16 %v391_v2, %v379_v3  ;;  %v385_v28 = vand.u32 4294901760, %v384_v48  ;;  %5294 = sst [smem:[#allocation149_spill]] %s3778_s6  ;;  %s3790_s1 = sld [smem:[#allocation10 + $0x3]] }
  0x96   :  { %v449_v43 = vand.u32 4294901760, %v3113_v31  ;;  %v461_v15 = vand.u32 4294901760, %v3115_v32  ;;  %v397_v51 = vand.u32 4294901760, %v396_v17  ;;  %v3352_v12 = vpack.c.bf16 %v395_v1, %v383_v19  ;;  %5297 = sst [smem:[#allocation152_spill]] %s3784_s7  ;;  %s3792_s14 = sld [smem:[#allocation10 + $0x83]] }
  0x97   :  { %v455_v37 = vand.u32 4294901760, %v3117_v33  ;;  %v467_v35 = vand.u32 4294901760, %v3121_v39  ;;  %v403_v52 = vand.u32 4294901760, %v402_v20  ;;  %v415_v10 = vand.u32 4294901760, %v414_v59  ;;  %5295 = sst [smem:[#allocation150_spill]] %s3780_s17  ;;  %s3794_s15 = sld [smem:[#allocation10 + $0x103]] }
  0x98   :  { %2490 = vmatpush1.bf16.msra.mxu1 %v3295_v25  ;;  %2682 = vmatpush1.bf16.msra.mxu0 %v3295_v25  ;;  %v426_v3 = vsub.f32 %v3097_v11, %v425_v49  ;;  %v438_v2 = vsub.f32 %v3101_v14, %v437_v53  ;;  %v409_v48 = vand.u32 4294901760, %v408_v46  ;;  %v421_v17 = vand.u32 4294901760, %v420_v47  ;;  %5296 = sst [smem:[#allocation151_spill]] %s3782_s8  ;;  %s3796_s16 = sld [smem:[#allocation10 + $0x183]] }
  0x99   :  { %2492 = vmatprep.subr.bf16.mxu1 %v2491_v40  ;;  %2684 = vmatprep.subr.bf16.mxu0 %v2683_v13  ;;  %v432_v19 = vsub.f32 %v3107_v23, %v431_v54  ;;  %v444_v1 = vsub.f32 %v3111_v30, %v443_v34  ;;  %v2695_v7 = vpack.c.bf16 %v413_v41, %v401_v21  ;;  %v473_v20 = vand.u32 4294901760, %v3127_v50  ;;  %5298 = sst [smem:[#allocation153_spill]] %s3786_s3  ;;  %s3798_s4 = sld [smem:[#allocation10 + $0x203]] }
  0x9a   :  { %v450_v6 = vsub.f32 %v3113_v31, %v449_v43  ;;  %v462_v5 = vsub.f32 %v3115_v32, %v461_v15  ;;  %v5089_v59 = vand.u32 4294901760, %v3283_v9  ;;  %v3367_v25 = vpack.c.bf16 %v419_v42, %v407_v38  ;;  %5299 = sst [smem:[#allocation154_spill]] %s3788_s5  ;;  %s3806_s7 = sld [smem:[#allocation7 + $0x200]] }
  0x9b   :  { %321 = vmatmul.mubr.f32.vlgmr.msra.gmra.mrb[0].mxu1 %v320_v0  ;;  %v456_v13 = vsub.f32 %v3117_v33, %v455_v37  ;;  %v468_v40 = vsub.f32 %v3121_v39, %v467_v35  ;;  %v485_v46 = vand.u32 4294901760, %v3131_v61  ;;  %v2501_v21 = vpack.c.bf16 %v397_v51, %v385_v28  ;;  %v5090_v39 = vld [vmem:[#allocation54_spill] sm:$0xff]  ;;  %5300 = sst [smem:[#allocation155_spill]] %s3790_s1  ;;  %s3800_s6 = sld [smem:[#allocation10 + $0x283]] }
  0x9c   :  { %1058 = vmatmul.mubr.f32.vlgmr.msra.gmra.mrb[0].mxu0 %v5089_v59  ;;  %2494 = vmatpush1.bf16.msra.mxu1 %v2493_v36  ;;  %v2503_v41 = vpack.c.bf16 %v415_v10, %v403_v52  ;;  %v427_v47 = vand.u32 4294901760, %v426_v3  ;;  %v439_v32 = vand.u32 4294901760, %v438_v2  ;;  %v2505_v0 = vpack.c.bf16 %v421_v17, %v409_v48  ;;  %v5091_v36 = vld [vmem:[#allocation55_spill] sm:$0xff]  ;;  %v5094_v2 = vld [vmem:[#allocation60_spill] sm:$0xff]  ;;  %v5095_v17 = vld [vmem:[#allocation61_spill] sm:$0xff]  ;;  %5301 = sst [smem:[#allocation156_spill]] %s3792_s14 }
  0x9d   :  { %2686 = vmatpush1.bf16.msra.mxu0 %v3313_v26  ;;  %2496 = vmatprep.subr.bf16.mxu1 %v2495_v24  ;;  %v2699_v9 = vpack.c.bf16 %v437_v53, %v425_v49  ;;  %v433_v59 = vand.u32 4294901760, %v432_v19  ;;  %v445_v38 = vand.u32 4294901760, %v444_v1  ;;  %v451_v42 = vand.u32 4294901760, %v450_v6  ;;  %v5092_v24 = vld [vmem:[#allocation57_spill] sm:$0xff]  ;;  %v5093_v53 = vld [vmem:[#allocation58_spill] sm:$0xff]  ;;  %5302 = sst [smem:[#allocation157_spill]] %s3794_s15 }
  0x9e   :  { %2688 = vmatprep.subr.bf16.mxu0 %v2687_v60  ;;  %v463_v31 = vand.u32 4294901760, %v462_v5  ;;  %v474_v33 = vsub.f32 %v3127_v50, %v473_v20  ;;  %v479_v30 = vand.u32 4294901760, %v5090_v39  ;;  %712 = vmatprep.mubr.f32.mxu1 %v3262_v63  ;;  %v457_v26 = vand.u32 4294901760, %v456_v13  ;;  %5303 = sst [smem:[#allocation158_spill]] %s3796_s16  ;;  %s3802_s17 = sld [smem:[#allocation10 + $0x303]] }
  0x9f   :  { %1321 = vmatprep.mubr.f32.mxu0 %v3262_v63  ;;  %v469_v52 = vand.u32 4294901760, %v468_v40  ;;  %v486_v10 = vsub.f32 %v3131_v61, %v485_v46  ;;  %v491_v60 = vand.u32 4294901760, %v5091_v36  ;;  %v2507_v6 = vpack.c.bf16 %v439_v32, %v427_v47  ;;  %v5098_v40 = vld [vmem:[#allocation66_spill] sm:$0xff]  ;;  %v5099_v47 = vld [vmem:[#allocation67_spill] sm:$0xff]  ;;  %5304 = sst [smem:[#allocation159_spill]] %s3798_s4  ;;  %s3804_s8 = sld [smem:[#allocation10 + $0x383]] }
  0xa0   :  { %2498 = vmatpush1.bf16.msra.mxu1 %v3333_v27  ;;  %v2701_v5 = vpack.c.bf16 %v443_v34, %v431_v54  ;;  %v497_v49 = vand.u32 4294901760, %v5092_v24  ;;  %v509_v28 = vand.u32 4294901760, %v5093_v53  ;;  %v2509_v51 = vpack.c.bf16 %v445_v38, %v433_v59  ;;  %v5100_v38 = vld [vmem:[#allocation69_spill] sm:$0xff]  ;;  %5308 = sst [smem:[#allocation163_spill]] %s3806_s7  ;;  %s3808_s3 = sld [smem:[#allocation7 + $0x201]] }
  0xa1   :  { %2690 = vmatpush1.bf16.msra.mxu0 %v3328_v57  ;;  %2500 = vmatprep.subr.bf16.mxu1 %v2499_v22  ;;  %v2703_v3 = vpack.c.bf16 %v461_v15, %v449_v43  ;;  %v503_v48 = vand.u32 4294901760, %v5094_v2  ;;  %v515_v19 = vand.u32 4294901760, %v5095_v17  ;;  %v2511_v1 = vpack.c.bf16 %v463_v31, %v451_v42  ;;  %v5096_v31 = vld [vmem:[#allocation63_spill] sm:$0xff]  ;;  %5305 = sst [smem:[#allocation160_spill]] %s3800_s6  ;;  %s3810_s5 = sld [smem:[#allocation8 + $0x4]] }
  0xa2   :  { %2692 = vmatprep.subr.bf16.mxu0 %v3335_v45  ;;  %v3386_v13 = vpack.c.bf16 %v467_v35, %v455_v37  ;;  %v475_v27 = vand.u32 4294901760, %v474_v33  ;;  %v480_v32 = vsub.f32 %v5090_v39, %v479_v30  ;;  %v3389_v57 = vpack.c.bf16 %v469_v52, %v457_v26  ;;  %v5097_v35 = vld [vmem:[#allocation64_spill] sm:$0xff]  ;;  %v5101_v26 = vld [vmem:[#allocation70_spill] sm:$0xff]  ;;  %s3812_s1 = sld [smem:[#allocation10 + $0x4]]  ;;  %s3828_s7 = sld [smem:[#allocation7 + $0x280]] }
  0xa3   :  { %v487_v54 = vand.u32 4294901760, %v486_v10  ;;  %v3391_v34 = vpack.c.bf16 %v485_v46, %v473_v20  ;;  %v492_v22 = vsub.f32 %v5091_v36, %v491_v60  ;;  %v498_v45 = vsub.f32 %v5092_v24, %v497_v49  ;;  %s3814_s14 = sld [smem:[#allocation10 + $0x84]] }
  0xa4   :  { %2502 = vmatpush1.bf16.msra.mxu1 %v2501_v21  ;;  %v510_v43 = vsub.f32 %v5093_v53, %v509_v28  ;;  %v521_v37 = vand.u32 4294901760, %v5096_v31  ;;  %v533_v33 = vand.u32 4294901760, %v5097_v35  ;;  %v504_v15 = vsub.f32 %v5094_v2, %v503_v48  ;;  %v5102_v53 = vld [vmem:[#allocation72_spill] sm:$0xff]  ;;  %5306 = sst [smem:[#allocation161_spill]] %s3802_s17  ;;  %s3816_s15 = sld [smem:[#allocation10 + $0x104]] }
  0xa5   :  { %2694 = vmatpush1.bf16.msra.mxu0 %v3352_v12  ;;  %2504 = vmatprep.subr.bf16.mxu1 %v2503_v41  ;;  %v516_v20 = vsub.f32 %v5095_v17, %v515_v19  ;;  %v527_v46 = vand.u32 4294901760, %v5098_v40  ;;  %v539_v21 = vand.u32 4294901760, %v5099_v47  ;;  %v481_v59 = vand.u32 4294901760, %v480_v32  ;;  %5307 = sst [smem:[#allocation162_spill]] %s3804_s8  ;;  %s3818_s16 = sld [smem:[#allocation10 + $0x184]] }
  0xa6   :  { %2696 = vmatprep.subr.bf16.mxu0 %v2695_v7  ;;  %v3403_v12 = vpack.c.bf16 %v491_v60, %v479_v30  ;;  %v545_v42 = vand.u32 4294901760, %v5100_v38  ;;  %v557_v52 = vand.u32 4294901760, %v5101_v26  ;;  %v2515_v10 = vpack.c.bf16 %v487_v54, %v475_v27  ;;  %v5103_v7 = vld [vmem:[#allocation73_spill] sm:$0xff]  ;;  %5309 = sst [smem:[#allocation164_spill]] %s3808_s3  ;;  %s3820_s4 = sld [smem:[#allocation10 + $0x204]] }
  0xa7   :  { %v493_v63 = vand.u32 4294901760, %v492_v22  ;;  %v551_v41 = vand.u32 4294901760, %v5102_v53  ;;  %v563_v24 = vand.u32 4294901760, %v5103_v7  ;;  %v499_v17 = vand.u32 4294901760, %v498_v45  ;;  %5310 = sst [smem:[#allocation165_spill]] %s3810_s5  ;;  %s3822_s6 = sld [smem:[#allocation10 + $0x284]] }
  0xa8   :  { %2506 = vmatpush1.bf16.msra.mxu1 %v2505_v0  ;;  %v511_v2 = vand.u32 4294901760, %v510_v43  ;;  %v522_v36 = vsub.f32 %v5096_v31, %v521_v37  ;;  %v534_v30 = vsub.f32 %v5097_v35, %v533_v33  ;;  %v505_v60 = vand.u32 4294901760, %v504_v15  ;;  %5311 = sst [smem:[#allocation166_spill]] %s3812_s1  ;;  %s3824_s17 = sld [smem:[#allocation10 + $0x304]] }
  0xa9   :  { %2698 = vmatpush1.bf16.msra.mxu0 %v3367_v25  ;;  %2508 = vmatprep.subr.bf16.mxu1 %v2507_v6  ;;  %v517_v32 = vand.u32 4294901760, %v516_v20  ;;  %v528_v27 = vsub.f32 %v5098_v40, %v527_v46  ;;  %v540_v54 = vsub.f32 %v5099_v47, %v539_v21  ;;  %v2711_v22 = vpack.c.bf16 %v509_v28, %v497_v49  ;;  %v5104_v25 = vld [vmem:[#allocation75_spill] sm:$0xff]  ;;  %v5105_v6 = vld [vmem:[#allocation76_spill] sm:$0xff]  ;;  %5312 = sst [smem:[#allocation167_spill]] %s3814_s14  ;;  %s3826_s8 = sld [smem:[#allocation10 + $0x384]] }
  0xaa   :  { %2700 = vmatprep.subr.bf16.mxu0 %v2699_v9  ;;  %v546_v39 = vsub.f32 %v5100_v38, %v545_v42  ;;  %v558_v0 = vsub.f32 %v5101_v26, %v557_v52  ;;  %v569_v45 = vand.u32 4294901760, %v5104_v25  ;;  %v2517_v43 = vpack.c.bf16 %v493_v63, %v481_v59  ;;  %5313 = sst [smem:[#allocation168_spill]] %s3816_s15  ;;  %s3832_s5 = sld [smem:[#allocation8 + $0x5]] }
  0xab   :  { %v552_v31 = vsub.f32 %v5102_v53, %v551_v41  ;;  %v564_v35 = vsub.f32 %v5103_v7, %v563_v24  ;;  %v581_v9 = vand.u32 4294901760, %v5105_v6  ;;  %v2519_v15 = vpack.c.bf16 %v511_v2, %v499_v17  ;;  %v5106_v53 = vld [vmem:[#allocation78_spill] sm:$0xff]  ;;  %v5107_v2 = vld [vmem:[#allocation79_spill] sm:$0xff]  ;;  %5314 = sst [smem:[#allocation169_spill]] %s3818_s16  ;;  %s3830_s3 = sld [smem:[#allocation7 + $0x281]] }
  0xac   :  { %2510 = vmatpush1.bf16.msra.mxu1 %v2509_v51  ;;  %v2713_v20 = vpack.c.bf16 %v515_v19, %v503_v48  ;;  %v523_v40 = vand.u32 4294901760, %v522_v36  ;;  %v535_v47 = vand.u32 4294901760, %v534_v30  ;;  %v2521_v49 = vpack.c.bf16 %v517_v32, %v505_v60  ;;  %v5113_v60 = vld [vmem:[#allocation93_spill] sm:$0xff]  ;;  %5315 = sst [smem:[#allocation170_spill]] %s3820_s4  ;;  %s3834_s1 = sld [smem:[#allocation10 + $0x5]] }
  0xad   :  { %2702 = vmatpush1.bf16.msra.mxu0 %v2701_v5  ;;  %2512 = vmatprep.subr.bf16.mxu1 %v2511_v1  ;;  %v2715_v28 = vpack.c.bf16 %v533_v33, %v521_v37  ;;  %v529_v26 = vand.u32 4294901760, %v528_v27  ;;  %v541_v38 = vand.u32 4294901760, %v540_v54  ;;  %v547_v61 = vand.u32 4294901760, %v546_v39  ;;  %v5108_v39 = vld [vmem:[#allocation81_spill] sm:$0xff]  ;;  %v5114_v27 = vld [vmem:[#allocation94_spill] sm:$0xff]  ;;  %5316 = sst [smem:[#allocation171_spill]] %s3822_s6 }
  0xae   :  { %2704 = vmatprep.subr.bf16.mxu0 %v2703_v3  ;;  %v559_v63 = vand.u32 4294901760, %v558_v0  ;;  %v570_v59 = vsub.f32 %v5104_v25, %v569_v45  ;;  %v575_v7 = vand.u32 4294901760, %v5106_v53  ;;  %v553_v50 = vand.u32 4294901760, %v552_v31  ;;  %5317 = sst [smem:[#allocation172_spill]] %s3824_s17 }
  0xaf   :  { %v565_v23 = vand.u32 4294901760, %v564_v35  ;;  %v582_v5 = vsub.f32 %v5105_v6, %v581_v9  ;;  %v587_v51 = vand.u32 4294901760, %v3197_v18  ;;  %v2523_v36 = vpack.c.bf16 %v535_v47, %v523_v40  ;;  %v5109_v47 = vld [vmem:[#allocation83_spill] sm:$0xff]  ;;  %5318 = sst [smem:[#allocation173_spill]] %s3826_s8  ;;  %s3836_s14 = sld [smem:[#allocation10 + $0x85]] }
  0xb0   :  { %2514 = vmatpush1.bf16.msra.mxu1 %v3389_v57  ;;  %v2717_v3 = vpack.c.bf16 %v539_v21, %v527_v46  ;;  %v593_v48 = vand.u32 4294901760, %v5107_v2  ;;  %v605_v17 = vand.u32 4294901760, %v5108_v39  ;;  %v2525_v19 = vpack.c.bf16 %v541_v38, %v529_v26  ;;  %v5110_v38 = vld [vmem:[#allocation84_spill] sm:$0xff]  ;;  %5319 = sst [smem:[#allocation174_spill]] %s3828_s7  ;;  %s3838_s15 = sld [smem:[#allocation10 + $0x105]] }
  0xb1   :  { %2706 = vmatpush1.bf16.msra.mxu0 %v3386_v13  ;;  %2516 = vmatprep.subr.bf16.mxu1 %v2515_v10  ;;  %v2719_v1 = vpack.c.bf16 %v557_v52, %v545_v42  ;;  %v3429_v31 = vpack.c.bf16 %v563_v24, %v551_v41  ;;  %v2527_v37 = vpack.c.bf16 %v559_v63, %v547_v61  ;;  %v571_v35 = vand.u32 4294901760, %v570_v59  ;;  %v5111_v42 = vld [vmem:[#allocation86_spill] sm:$0xff]  ;;  %5320 = sst [smem:[#allocation175_spill]] %s3830_s3  ;;  %s3840_s16 = sld [smem:[#allocation10 + $0x185]] }
  0xb2   :  { %2708 = vmatprep.subr.bf16.mxu0 %v3391_v34  ;;  %v3431_v33 = vpack.c.bf16 %v581_v9, %v569_v45  ;;  %v576_v57 = vsub.f32 %v5106_v53, %v575_v7  ;;  %v2529_v13 = vpack.c.bf16 %v565_v23, %v553_v50  ;;  %v583_v40 = vand.u32 4294901760, %v582_v5  ;;  %v5112_v23 = vld [vmem:[#allocation87_spill] sm:$0xff]  ;;  %5321 = sst [smem:[#allocation176_spill]] %s3832_s5  ;;  %s3842_s4 = sld [smem:[#allocation10 + $0x205]] }
  0xb3   :  { %v588_v46 = vsub.f32 %v3197_v18, %v587_v51  ;;  %v599_v21 = vand.u32 4294901760, %v5109_v47  ;;  %v594_v34 = vsub.f32 %v5107_v2, %v593_v48  ;;  %v606_v24 = vsub.f32 %v5108_v39, %v605_v17  ;;  %5322 = sst [smem:[#allocation177_spill]] %s3834_s1  ;;  %s3844_s6 = sld [smem:[#allocation10 + $0x285]] }
  0xb4   :  { %2518 = vmatpush1.bf16.msra.mxu1 %v2517_v43  ;;  %v611_v61 = vand.u32 4294901760, %v5110_v38  ;;  %v617_v26 = vand.u32 4294901760, %v5111_v42  ;;  %v3441_v52 = vpack.c.bf16 %v587_v51, %v575_v7  ;;  %v629_v50 = vand.u32 4294901760, %v5112_v23  ;;  %s3846_s17 = sld [smem:[#allocation10 + $0x305]]  ;;  %s3850_s7 = sld [smem:[#allocation7 + $0x300]] }
  0xb5   :  { %2710 = vmatpush1.bf16.msra.mxu0 %v3403_v12  ;;  %2520 = vmatprep.subr.bf16.mxu1 %v2519_v15  ;;  %v623_v10 = vand.u32 4294901760, %v3223_v29  ;;  %v635_v41 = vand.u32 4294901760, %v3225_v44  ;;  %v577_v30 = vand.u32 4294901760, %v576_v57  ;;  %v641_v12 = vand.u32 4294901760, %v3229_v58  ;;  %5323 = sst [smem:[#allocation178_spill]] %s3836_s14  ;;  %s3848_s8 = sld [smem:[#allocation10 + $0x385]] }
  0xb6   :  { %2712 = vmatprep.subr.bf16.mxu0 %v2711_v22  ;;  %v653_v32 = vand.u32 4294901760, %v5113_v60  ;;  %v647_v54 = vand.u32 4294901760, %v5114_v27  ;;  %v2531_v0 = vpack.c.bf16 %v583_v40, %v571_v35  ;;  %v589_v45 = vand.u32 4294901760, %v588_v46  ;;  %v5115_v22 = vld [vmem:[#allocation96_spill] sm:$0xff]  ;;  %5324 = sst [smem:[#allocation179_spill]] %s3838_s15  ;;  %s3852_s3 = sld [smem:[#allocation7 + $0x301]] }
  0xb7   :  { %v600_v43 = vsub.f32 %v5109_v47, %v599_v21  ;;  %v659_v7 = vand.u32 4294901760, %v5115_v22  ;;  %v595_v9 = vand.u32 4294901760, %v594_v34  ;;  %v607_v15 = vand.u32 4294901760, %v606_v24  ;;  %5325 = sst [smem:[#allocation180_spill]] %s3840_s16  ;;  %s3854_s5 = sld [smem:[#allocation8 + $0x6]] }
  0xb8   :  { %2522 = vmatpush1.bf16.msra.mxu1 %v2521_v49  ;;  %v612_v63 = vsub.f32 %v5110_v38, %v611_v61  ;;  %v618_v59 = vsub.f32 %v5111_v42, %v617_v26  ;;  %v630_v5 = vsub.f32 %v5112_v23, %v629_v50  ;;  %v624_v51 = vsub.f32 %v3223_v29, %v623_v10  ;;  %v5116_v38 = vld [vmem:[#allocation98_spill] sm:$0xff]  ;;  %5326 = sst [smem:[#allocation181_spill]] %s3842_s4 }
  0xb9   :  { %2714 = vmatpush1.bf16.msra.mxu0 %v2713_v20  ;;  %2524 = vmatprep.subr.bf16.mxu1 %v2523_v36  ;;  %v636_v35 = vsub.f32 %v3225_v44, %v635_v41  ;;  %v642_v57 = vsub.f32 %v3229_v58, %v641_v12  ;;  %v654_v40 = vsub.f32 %v5113_v60, %v653_v32  ;;  %v601_v24 = vand.u32 4294901760, %v600_v43  ;;  %5327 = sst [smem:[#allocation182_spill]] %s3844_s6  ;;  %s3856_s1 = sld [smem:[#allocation10 + $0x6]] }
  0xba   :  { %2716 = vmatprep.subr.bf16.mxu0 %v2715_v28  ;;  %v648_v20 = vsub.f32 %v5114_v27, %v647_v54  ;;  %v660_v49 = vsub.f32 %v5115_v22, %v659_v7  ;;  %v2533_v46 = vpack.c.bf16 %v589_v45, %v577_v30  ;;  %v2727_v34 = vpack.c.bf16 %v605_v17, %v593_v48  ;;  %v5119_v45 = vld [vmem:[#allocation104_spill] sm:$0xff]  ;;  %5328 = sst [smem:[#allocation183_spill]] %s3846_s17  ;;  %s3858_s14 = sld [smem:[#allocation10 + $0x86]] }
  0xbb   :  { %v2729_v42 = vpack.c.bf16 %v611_v61, %v599_v21  ;;  %v2535_v28 = vpack.c.bf16 %v607_v15, %v595_v9  ;;  %v613_v36 = vand.u32 4294901760, %v612_v63  ;;  %v619_v23 = vand.u32 4294901760, %v618_v59  ;;  %v5117_v21 = vld [vmem:[#allocation100_spill] sm:$0xff]  ;;  %v5120_v15 = vld [vmem:[#allocation106_spill] sm:$0xff]  ;;  %5329 = sst [smem:[#allocation184_spill]] %s3848_s8  ;;  %s3860_s15 = sld [smem:[#allocation10 + $0x106]] }
  0xbc   :  { %2526 = vmatpush1.bf16.msra.mxu1 %v2525_v19  ;;  %v4828_v29 = vand.u32 4294901760, %v3248_v8  ;;  %v631_v58 = vand.u32 4294901760, %v630_v5  ;;  %v625_v44 = vand.u32 4294901760, %v624_v51  ;;  %v637_v60 = vand.u32 4294901760, %v636_v35  ;;  %v5136_v35 = vld [vmem:[#allocation55_spill] sm:$0xff]  ;;  %5330 = sst [smem:[#allocation185_spill]] %s3850_s7 }
  0xbd   :  { %2718 = vmatpush1.bf16.msra.mxu0 %v2717_v3  ;;  %2528 = vmatprep.subr.bf16.mxu1 %v2527_v37  ;;  %v4827_v27 = vand.u32 4294901760, %v5116_v38  ;;  %v643_v47 = vand.u32 4294901760, %v642_v57  ;;  %v655_v22 = vand.u32 4294901760, %v654_v40  ;;  %v649_v30 = vand.u32 4294901760, %v648_v20  ;;  %v5118_v3 = vld [vmem:[#allocation101_spill] sm:$0xff]  ;;  %v5125_v57 = vld [vmem:[#allocation39_spill] sm:$0xff] }
  0xbe   :  { %2720 = vmatprep.subr.bf16.mxu0 %v2719_v1  ;;  %v661_v48 = vand.u32 4294901760, %v660_v49  ;;  %v2731_v17 = vpack.c.bf16 %v629_v50, %v617_v26  ;;  %v4826_v19 = vand.u32 4294901760, %v5117_v21  ;;  %v4825_v61 = vand.u32 4294901760, %v5118_v3  ;;  %v5126_v40 = vld [vmem:[#allocation40_spill] sm:$0xff]  ;;  %v5140_v49 = vld [vmem:[#allocation61_spill] sm:$0xff]  ;;  %5331 = sst [smem:[#allocation186_spill]] %s3852_s3 }
  0xbf   :  { %v4824_v43 = vand.u32 4294901760, %v5119_v45  ;;  %v2537_v1 = vpack.c.bf16 %v613_v36, %v601_v24  ;;  %v2733_v37 = vpack.c.bf16 %v635_v41, %v623_v10  ;;  %v3469_v9 = vsub.f32 %v3248_v8, %v4828_v29  ;;  %v5128_v24 = vld [vmem:[#allocation44_spill] sm:$0xff]  ;;  %v5141_v36 = vld [vmem:[#allocation110_spill] sm:$0xff]  ;;  %v5157_v20 = vld [vmem:[#allocation93_spill] sm:$0xff]  ;;  %5332 = sst [smem:[#allocation187_spill]] %s3854_s5  ;;  %s3862_s16 = sld [smem:[#allocation10 + $0x186]] }
  0xc0   :  { %2530 = vmatpush1.bf16.msra.mxu1 %v2529_v13  ;;  %v4823_v63 = vand.u32 4294901760, %v5120_v15  ;;  %v2539_v26 = vpack.c.bf16 %v631_v58, %v619_v23  ;;  %v2735_v50 = vpack.c.bf16 %v653_v32, %v641_v12  ;;  %v678_v13 = vsub.f32 %v5116_v38, %v4827_v27  ;;  %v5121_v23 = vld [vmem:[#allocation33_spill] sm:$0xff]  ;;  %v5122_v12 = vld [vmem:[#allocation34_spill] sm:$0xff]  ;;  %v5150_v27 = vld [vmem:[#allocation83_spill] sm:$0xff]  ;;  %5333 = sst [smem:[#allocation188_spill]] %s3856_s1  ;;  %s3864_s4 = sld [smem:[#allocation10 + $0x206]] }
  0xc1   :  { %2722 = vmatpush1.bf16.msra.mxu0 %v3429_v31  ;;  %2532 = vmatprep.subr.bf16.mxu1 %v2531_v0  ;;  %v4822_v31 = vand.u32 4294901760, %v3297_v16  ;;  %v2541_v59 = vpack.c.bf16 %v637_v60, %v625_v44  ;;  %v2543_v10 = vpack.c.bf16 %v655_v22, %v643_v47  ;;  %v2545_v41 = vpack.c.bf16 %v661_v48, %v649_v30  ;;  %v5143_v30 = vld [vmem:[#allocation64_spill] sm:$0xff]  ;;  %v5152_v48 = vld [vmem:[#allocation86_spill] sm:$0xff]  ;;  %v5153_v60 = vld [vmem:[#allocation87_spill] sm:$0xff]  ;;  %5334 = sst [smem:[#allocation189_spill]] %s3858_s14  ;;  %s3872_s3 = sld [smem:[#allocation7 + $0x380]] }
  0xc2   :  { %2724 = vmatprep.subr.bf16.mxu0 %v3431_v33  ;;  %v2737_v5 = vpack.c.bf16 %v659_v7, %v647_v54  ;;  %v672_v51 = vsub.f32 %v5117_v21, %v4826_v19  ;;  %v684_v33 = vsub.f32 %v5118_v3, %v4825_v61  ;;  %v3486_v58 = vsub.f32 %v5119_v45, %v4824_v43  ;;  %v5124_v7 = vld [vmem:[#allocation38_spill] sm:$0xff]  ;;  %v5139_v19 = vld [vmem:[#allocation60_spill] sm:$0xff]  ;;  %5335 = sst [smem:[#allocation190_spill]] %s3860_s15  ;;  %s3866_s6 = sld [smem:[#allocation10 + $0x286]] }
  0xc3   :  { %v667_v44 = vand.u32 4294901760, %v3469_v9  ;;  %v702_v47 = vsub.f32 %v5120_v15, %v4823_v63  ;;  %v679_v0 = vand.u32 4294901760, %v678_v13  ;;  %v696_v22 = vsub.f32 %v3297_v16, %v4822_v31  ;;  %v5135_v31 = vld [vmem:[#allocation54_spill] sm:$0xff]  ;;  %v5151_v9 = vld [vmem:[#allocation84_spill] sm:$0xff]  ;;  %s3868_s8 = sld [smem:[#allocation10 + $0x306]]  ;;  %s3874_s5 = sld [smem:[#allocation7 + $0x381]] }
  0xc4   :  { %2534 = vmatpush1.bf16.msra.mxu1 %v2533_v46  ;;  %v5127_v46 = vld [vmem:[#allocation42_spill] sm:$0xff]  ;;  %v707_v29 = vand.u32 4294901760, %v5141_v36  ;;  %v673_v63 = vand.u32 4294901760, %v672_v51  ;;  %v685_v13 = vand.u32 4294901760, %v684_v33  ;;  %v5160_v43 = vand.u32 4294901760, %v3248_v8  ;;  %s3870_s7 = sld [smem:[#allocation10 + $0x386]] }
  0xc5   :  { %2726 = vmatpush1.bf16.msra.mxu0 %v3441_v52  ;;  %2536 = vmatprep.subr.bf16.mxu1 %v2535_v28  ;;  %v5123_v52 = vld [vmem:[#allocation37_spill] sm:$0xff]  ;;  %v5155_v51 = vld [vmem:[#allocation90_spill] sm:$0xff]  ;;  %v2547_v25 = vpack.c.bf16 %v679_v0, %v667_v44  ;;  %v5162_v28 = vand.u32 4294901760, %v5117_v21  ;;  %v5163_v32 = vand.u32 4294901760, %v5118_v3  ;;  %v697_v61 = vand.u32 4294901760, %v696_v22  ;;  %5336 = sst [smem:[#allocation191_spill]] %s3862_s16 }
  0xc6   :  { %2728 = vmatprep.subr.bf16.mxu0 %v2727_v34  ;;  %v5142_v34 = vld [vmem:[#allocation63_spill] sm:$0xff]  ;;  %v2549_v33 = vpack.c.bf16 %v685_v13, %v673_v63  ;;  %v5164_v44 = vand.u32 4294901760, %v5119_v45  ;;  %v5166_v63 = vand.u32 4294901760, %v3297_v16  ;;  %v5170_v22 = vld [vmem:[#allocation30_spill] sm:$0xff]  ;;  %v5171_v13 = vld [vmem:[#allocation20_spill] sm:$0xff]  ;;  %5337 = sst [smem:[#allocation192_spill]] %s3864_s4 }
  0xc7   :  { %v2741_v54 = vpack.c.bf16 %v5163_v32, %v5162_v28  ;;  %v5168_v32 = vld [vmem:[#allocation28_spill] sm:$0xff]  ;;  %5341 = sst [smem:[#allocation196_spill]] %s3872_s3  ;;  %s3876_s14 = sld [smem:[#allocation8 + $0x7]] }
  0xc8   :  { %2538 = vmatpush1.bf16.msra.mxu1 %v2537_v1  ;;  %v5161_v1 = vand.u32 4294901760, %v5116_v38  ;;  %5338 = sst [smem:[#allocation193_spill]] %s3866_s6  ;;  %s3878_s15 = sld [smem:[#allocation10 + $0x7]] }
  0xc9   :  { %2730 = vmatpush1.bf16.msra.mxu0 %v2729_v42  ;;  %2540 = vmatprep.subr.bf16.mxu1 %v2539_v26  ;;  %v708_v26 = vsub.f32 %v5141_v36, %v707_v29  ;;  %5339 = sst [smem:[#allocation194_spill]] %s3868_s8  ;;  %s3880_s4 = sld [smem:[#allocation10 + $0x87]] }
  0xca   :  { %2732 = vmatprep.subr.bf16.mxu0 %v2731_v17  ;;  %v5154_v17 = vld [vmem:[#allocation89_spill] sm:$0xff]  ;;  %v2739_v42 = vpack.c.bf16 %v5161_v1, %v5160_v43  ;;  %v5165_v43 = vand.u32 4294901760, %v5120_v15  ;;  %v5173_v1 = vld [vmem:[#allocation32_spill] sm:$0xff]  ;;  %5340 = sst [smem:[#allocation195_spill]] %s3870_s7  ;;  %s3882_s6 = sld [smem:[#allocation10 + $0x107]] }
  0xcb   :  { %5342 = sst [smem:[#allocation197_spill]] %s3874_s5  ;;  %s3884_s8 = sld [smem:[#allocation10 + $0x187]] }
  0xcc   :  { %2542 = vmatpush1.bf16.msra.mxu1 %v2541_v59  ;;  %v691_v59 = vand.u32 4294901760, %v3486_v58  ;;  %v2743_v0 = vpack.c.bf16 %v5165_v43, %v5164_v44  ;;  %v5167_v58 = vld [vmem:[#allocation26_spill] sm:$0xff]  ;;  %v5182_v44 = vld [vmem:[#allocation24_spill] sm:$0xff]  ;;  %v5183_v43 = vpack.c.bf16 %v3087_v4, %v3080_v62  ;;  %v5191_v4 = vpack.c.bf16 %v5128_v24, %v5127_v46  ;;  %s3886_s16 = sld [smem:[#allocation10 + $0x207]]  ;;  %s4102_s1 = sld [smem:[#allocation10 + $0x30c]] }
  0xcd   :  { %2734 = vmatpush1.bf16.msra.mxu0 %v2733_v37  ;;  %2544 = vmatprep.subr.bf16.mxu1 %v2543_v10  ;;  %v703_v37 = vand.u32 4294901760, %v702_v47  ;;  %v709_v10 = vand.u32 4294901760, %v708_v26  ;;  %v2555_v47 = vpack.c.bf16 %v5168_v32, %v5167_v58  ;;  %v5176_v26 = vld [vmem:[#allocation22_spill] sm:$0xff]  ;;  %v5190_v62 = vld [vmem:[#allocation36_spill] sm:$0xff]  ;;  %v5198_v58 = vld [vmem:[#allocation47_spill] sm:$0xff]  ;;  %v5205_v24 = vpack.c.bf16 %v5136_v35, %v5135_v31  ;;  %5343 = sst [smem:[#allocation198_spill]] %s3876_s14 }
  0xce   :  { %2736 = vmatprep.subr.bf16.mxu0 %v2735_v50  ;;  %v5204_v46 = vld [vmem:[#allocation50_spill] sm:$0xff]  ;;  %v5215_v35 = vld [vmem:[#allocation67_spill] sm:$0xff]  ;;  %5344 = sst [smem:[#allocation199_spill]] %s3878_s15  ;;  %s3888_s3 = sld [smem:[#allocation10 + $0x287]] }
  0xcf   :  { %v2551_v50 = vpack.c.bf16 %v703_v37, %v691_v59  ;;  %v5177_v59 = vld [vmem:[#allocation107_spill] sm:$0xff]  ;;  %v5178_v37 = vld [vmem:[#allocation102_spill] sm:$0xff]  ;;  %5345 = sst [smem:[#allocation200_spill]] %s3880_s4  ;;  %s3890_s5 = sld [smem:[#allocation10 + $0x307]] }
  0xd0   :  { %2546 = vmatpush1.bf16.msra.mxu1 %v2545_v41  ;;  %v2553_v41 = vpack.c.bf16 %v709_v10, %v697_v61  ;;  %v5174_v61 = vld [vmem:[#allocation103_spill] sm:$0xff]  ;;  %v5214_v31 = vld [vmem:[#allocation62_spill] sm:$0xff]  ;;  %5346 = sst [smem:[#allocation201_spill]] %s3882_s6  ;;  %s3892_s14 = sld [smem:[#allocation10 + $0x387]] }
  0xd1   :  { %2738 = vmatpush1.bf16.msra.mxu0 %v2737_v5  ;;  %2548 = vmatprep.subr.bf16.mxu1 %v2547_v25  ;;  %v2745_v5 = vpack.c.bf16 %v707_v29, %v5166_v63  ;;  %v5169_v25 = vld [vmem:[#allocation29_spill] sm:$0xff]  ;;  %v5180_v10 = vld [vmem:[#allocation23_spill] sm:$0xff]  ;;  %5347 = sst [smem:[#allocation202_spill]] %s3884_s8  ;;  %s3894_s15 = sld [smem:[#allocation7 + $0x400]] }
  0xd2   :  { %2740 = vmatprep.subr.bf16.mxu0 %v2739_v42  ;;  %v2557_v28 = vpack.c.bf16 %v5170_v22, %v5169_v25  ;;  %v5172_v42 = vld [vmem:[#allocation31_spill] sm:$0xff]  ;;  %v5175_v29 = vld [vmem:[#allocation21_spill] sm:$0xff]  ;;  %5348 = sst [smem:[#allocation203_spill]] %s3886_s16  ;;  %s3896_s4 = sld [smem:[#allocation7 + $0x401]] }
  0xd3   :  { %v5194_v63 = vld [vmem:[#allocation45_spill] sm:$0xff]  ;;  %s3900_s8 = sld [smem:[#allocation8 + $0x8]]  ;;  %5486 = sst [smem:[#allocation258_spill]] %s4102_s1 }
  0xd4   :  { %2550 = vmatpush1.bf16.msra.mxu1 %v2549_v33  ;;  %v5179_v33 = vpack.c.bf16 %v5122_v12, %v5121_v23  ;;  %v5186_v23 = vld [vmem:[#allocation27_spill] sm:$0xff]  ;;  %v5187_v12 = vpack.c.bf16 %v5126_v40, %v5125_v57  ;;  %v5197_v40 = vld [vmem:[#allocation49_spill] sm:$0xff]  ;;  %5349 = sst [smem:[#allocation204_spill]] %s3888_s3  ;;  %s3902_s16 = sld [smem:[#allocation10 + $0x8]] }
  0xd5   :  { %2742 = vmatpush1.bf16.msra.mxu0 %v2741_v54  ;;  %2552 = vmatprep.subr.bf16.mxu1 %v2551_v50  ;;  %v2559_v54 = vpack.c.bf16 %v5173_v1, %v5172_v42  ;;  %v5181_v50 = vpack.c.bf16 %v3074_v56, %v3072_v55  ;;  %v5188_v55 = vld [vmem:[#allocation35_spill] sm:$0xff]  ;;  %v5189_v56 = vpack.c.bf16 %v3101_v14, %v3097_v11  ;;  %v5200_v11 = vld [vmem:[#allocation48_spill] sm:$0xff]  ;;  %v5206_v22 = vld [vmem:[#allocation53_spill] sm:$0xff]  ;;  %5350 = sst [smem:[#allocation205_spill]] %s3890_s5  ;;  %s4116_s1 = sld [smem:[#allocation7 + $0x681]] }
  0xd6   :  { %2744 = vmatprep.subr.bf16.mxu0 %v2743_v0  ;;  %v5184_v0 = vld [vmem:[#allocation25_spill] sm:$0xff]  ;;  %v5196_v57 = vld [vmem:[#allocation43_spill] sm:$0xff]  ;;  %v5199_v32 = vpack.c.bf16 %v5197_v40, %v5198_v58  ;;  %v5201_v14 = vld [vmem:[#allocation52_spill] sm:$0xff]  ;;  %v5253_v58 = vpack.c.bf16 %v5141_v36, %v3297_v16  ;;  %5351 = sst [smem:[#allocation206_spill]] %s3892_s14  ;;  %v1491_v16 = vstv %s3702_s0  ;;  %v1577_v36 = vstv %s3712_s22  ;;  %s3908_s14 = sld [smem:[#allocation10 + $0x88]] }
  0xd7   :  { %v5210_v1 = vld [vmem:[#allocation56_spill] sm:$0xff]  ;;  %v5252_v40 = vld [vmem:[#allocation105_spill] sm:$0xff]  ;;  %5352 = sst [smem:[#allocation207_spill]] %s3894_s15  ;;  %s5362_s22 = sld [smem:[#allocation133_spill]] }
  0xd8   :  { %2554 = vmatpush1.bf16.msra.mxu1 %v2553_v41  ;;  %v5185_v41 = vpack.c.bf16 %v5124_v7, %v5123_v52  ;;  %v5192_v52 = vld [vmem:[#allocation41_spill] sm:$0xff]  ;;  %v5193_v7 = vld [vmem:[#allocation46_spill] sm:$0xff]  ;;  %5353 = sst [smem:[#allocation208_spill]] %s3896_s4  ;;  %s3910_s4 = sld [smem:[#allocation10 + $0x108]] }
  0xd9   :  { %2746 = vmatpush1.bf16.msra.mxu0 %v2745_v5  ;;  %2556 = vmatprep.subr.bf16.mxu1 %v2555_v47  ;;  %v5195_v5 = vpack.c.bf16 %v5193_v7, %v5194_v63  ;;  %v5202_v47 = vld [vmem:[#allocation51_spill] sm:$0xff]  ;;  %v5244_v63 = vld [vmem:[#allocation94_spill] sm:$0xff]  ;;  %5354 = sst [smem:[#allocation209_spill]] %s3900_s8  ;;  %s5363_s0 = sld [smem:[#allocation134_spill]] }
  0xda   :  { %2748 = vmatprep.subr.bf16.mxu0 %v5171_v13  ;;  %v5203_v25 = vpack.c.bf16 %v5201_v14, %v5202_v47  ;;  %v5208_v13 = vld [vmem:[#allocation57_spill] sm:$0xff]  ;;  %5355 = sst [smem:[#allocation210_spill]] %s3902_s16  ;;  %v1476_v14 = vstv %s3720_s2  ;;  %v1479_v47 = vstv %s3722_s26  ;;  %s5368_s2 = sld [smem:[#allocation137_spill]] }
  0xdb   :  { %714 = vmatmul.mubr.f32.vlgmr.msra.gmra.mrb[0].mxu1 %v5174_v61  ;;  %s5371_s26 = sld [smem:[#allocation139_spill]]  ;;  %s4110_s16 = sld [smem:[#allocation7 + $0x680]] }
  0xdc   :  { %1323 = vmatmul.mubr.f32.vlgmr.msra.gmra.mrb[0].mxu0 %v5174_v61  ;;  %2558 = vmatpush1.bf16.msra.mxu1 %v2557_v28  ;;  %v5207_v28 = vld [vmem:[#allocation58_spill] sm:$0xff]  ;;  %5356 = sst [smem:[#allocation211_spill]] %s3908_s14  ;;  %s4172_s3 = sld [smem:[#allocation7 + $0x780]] }
  0xdd   :  { %2750 = vmatpush1.bf16.msra.mxu0 %v5175_v29  ;;  %2560 = vmatprep.subr.bf16.mxu1 %v2559_v54  ;;  %v5209_v42 = vpack.c.bf16 %v5207_v28, %v5208_v13  ;;  %v5211_v54 = vpack.c.bf16 %v5140_v49, %v5139_v19  ;;  %v5212_v29 = vld [vmem:[#allocation59_spill] sm:$0xff]  ;;  %v5222_v19 = vld [vmem:[#allocation68_spill] sm:$0xff]  ;;  %v5223_v49 = vld [vmem:[#allocation73_spill] sm:$0xff]  ;;  %v1506_v28 = vstv %s3732_s9  ;;  %v1510_v13 = vstv %s3734_s10  ;;  %s3942_s9 = sld [smem:[#allocation8 + $0x9]]  ;;  %s5591_s14 = sld [smem:[#allocation151_spill]] }
  0xde   :  { %2752 = vmatprep.subr.bf16.mxu0 %v5176_v26  ;;  %914 = vmatprep.mubr.f32.mxu1 %v5177_v59  ;;  %v5213_v26 = vpack.c.bf16 %v5143_v30, %v5142_v34  ;;  %v5216_v59 = vld [vmem:[#allocation66_spill] sm:$0xff]  ;;  %v5226_v30 = vld [vmem:[#allocation71_spill] sm:$0xff]  ;;  %5357 = sst [smem:[#allocation212_spill]] %s3910_s4  ;;  %s3924_s4 = sld [smem:[#allocation10 + $0x288]] }
  0xdf   :  { %1458 = vmatprep.mubr.f32.mxu0 %v5178_v37  ;;  %v5217_v37 = vpack.c.bf16 %v5215_v35, %v5216_v59  ;;  %v5227_v34 = vld [vmem:[#allocation75_spill] sm:$0xff]  ;;  %s5379_s10 = sld [smem:[#allocation144_spill]]  ;;  %v1545_v35 = vstv %s5363_s0  ;;  %s5594_s17 = sld [smem:[#allocation157_spill]] }
  0xe0   :  { %2562 = vmatpush1.bf16.msra.mxu1 %v5179_v33  ;;  %v5218_v33 = vld [vmem:[#allocation65_spill] sm:$0xff]  ;;  %s3958_s0 = sld [smem:[#allocation10 + $0x189]]  ;;  %s5603_s7 = sld [smem:[#allocation162_spill]] }
  0xe1   :  { %2754 = vmatpush1.bf16.msra.mxu0 %v5180_v10  ;;  %2564 = vmatprep.subr.bf16.mxu1 %v5181_v50  ;;  %v5219_v10 = vld [vmem:[#allocation70_spill] sm:$0xff]  ;;  %v5220_v50 = vld [vmem:[#allocation69_spill] sm:$0xff]  ;;  %5492 = sst [smem:[#allocation260_spill]] %s4110_s16 }
  0xe2   :  { %2756 = vmatprep.subr.bf16.mxu0 %v5182_v44  ;;  %v5221_v44 = vpack.c.bf16 %v5219_v10, %v5220_v50  ;;  %v1565_v50 = vstv %s5371_s26  ;;  %s4124_s16 = sld [smem:[#allocation10 + $0xd]] }
  0xe3   :  { %5378 = sst [smem:[#allocation220_spill]] %s3942_s9  ;;  %s3956_s9 = sld [smem:[#allocation10 + $0x109]] }
  0xe4   :  { %2566 = vmatpush1.bf16.msra.mxu1 %v5183_v43  ;;  %v5224_v43 = vld [vmem:[#allocation72_spill] sm:$0xff]  ;;  %5364 = sst [smem:[#allocation215_spill]] %s3924_s4  ;;  %s5375_s4 = sld [smem:[#allocation142_spill]] }
  0xe5   :  { %2758 = vmatpush1.bf16.msra.mxu0 %v5184_v0  ;;  %2568 = vmatprep.subr.bf16.mxu1 %v5185_v41  ;;  %v5225_v0 = vpack.c.bf16 %v5223_v49, %v5224_v43  ;;  %v5228_v41 = vpack.c.bf16 %v5105_v6, %v5227_v34  ;;  %v5235_v6 = vld [vmem:[#allocation82_spill] sm:$0xff]  ;;  %s4148_s26 = sld [smem:[#allocation10 + $0x30d]] }
  0xe6   :  { %2760 = vmatprep.subr.bf16.mxu0 %v5186_v23  ;;  %v5229_v23 = vld [vmem:[#allocation74_spill] sm:$0xff]  ;;  %5390 = sst [smem:[#allocation224_spill]] %s3958_s0  ;;  %s5530_s15 = sld [smem:[#allocation260_spill]] }
  0xe7   :  { %s3972_s0 = sld [smem:[#allocation10 + $0x309]]  ;;  %s5618_s5 = sld [smem:[#allocation172_spill]] }
  0xe8   :  { %2570 = vmatpush1.bf16.msra.mxu1 %v5187_v12  ;;  %v5230_v12 = vpack.c.bf16 %v3197_v18, %v5106_v53  ;;  %v5237_v18 = vld [vmem:[#allocation85_spill] sm:$0xff]  ;;  %v5238_v53 = vpack.c.bf16 %v5155_v51, %v5154_v17  ;;  %v5249_v51 = vpack.c.bf16 %v5118_v3, %v5117_v21  ;;  %v1494_v21 = vstv %s3704_s18  ;;  %s3916_s18 = sld [smem:[#allocation10 + $0x188]]  ;;  %5501 = sst [smem:[#allocation262_spill]] %s4124_s16 }
  0xe9   :  { %2762 = vmatpush1.bf16.msra.mxu0 %v5188_v55  ;;  %2572 = vmatprep.subr.bf16.mxu1 %v5189_v56  ;;  %v5231_v55 = vld [vmem:[#allocation77_spill] sm:$0xff]  ;;  %v5232_v56 = vpack.c.bf16 %v5108_v39, %v5107_v2  ;;  %v5239_v2 = vld [vmem:[#allocation88_spill] sm:$0xff]  ;;  %v1498_v3 = vstv %s3710_s21  ;;  %s5359_s21 = sld [smem:[#allocation131_spill]]  ;;  %5388 = sst [smem:[#allocation223_spill]] %s3956_s9 }
  0xea   :  { %2764 = vmatprep.subr.bf16.mxu0 %v5190_v62  ;;  %v5233_v62 = vld [vmem:[#allocation80_spill] sm:$0xff]  ;;  %v5248_v17 = vld [vmem:[#allocation97_spill] sm:$0xff]  ;;  %v1580_v49 = vstv %s5375_s4  ;;  %s3974_s4 = sld [smem:[#allocation10 + $0x389]]  ;;  %s4006_s9 = sld [smem:[#allocation10 + $0x20a]] }
  0xeb   :  { %v5240_v39 = vld [vmem:[#allocation92_spill] sm:$0xff]  ;;  %5515 = sst [smem:[#allocation268_spill]] %s4148_s26  ;;  %s5624_s26 = sld [smem:[#allocation178_spill]] }
  0xec   :  { %2574 = vmatpush1.bf16.msra.mxu1 %v5191_v4  ;;  %v5234_v4 = vpack.c.bf16 %v5151_v9, %v5150_v27  ;;  %v5241_v7 = vpack.c.bf16 %v5157_v20, %v5240_v39  ;;  %v5242_v27 = vld [vmem:[#allocation91_spill] sm:$0xff]  ;;  %v5243_v9 = vld [vmem:[#allocation96_spill] sm:$0xff]  ;;  %s5588_s16 = sld [smem:[#allocation148_spill]] }
  0xed   :  { %2766 = vmatpush1.bf16.msra.mxu0 %v5192_v52  ;;  %2576 = vmatprep.subr.bf16.mxu1 %v5195_v5  ;;  %v5236_v52 = vpack.c.bf16 %v5153_v60, %v5152_v48  ;;  %v5245_v5 = vpack.c.bf16 %v5243_v9, %v5244_v63  ;;  %v5246_v60 = vld [vmem:[#allocation95_spill] sm:$0xff]  ;;  %v5247_v48 = vpack.c.bf16 %v5116_v38, %v3248_v8  ;;  %v5254_v8 = vld [vmem:[#allocation109_spill] sm:$0xff]  ;;  %v5255_v38 = vld [vmem:[#allocation108_spill] sm:$0xff]  ;;  %5400 = sst [smem:[#allocation227_spill]] %s3972_s0  ;;  %s4022_s0 = sld [smem:[#allocation7 + $0x580]] }
  0xee   :  { %2768 = vmatprep.subr.bf16.mxu0 %v5196_v57  ;;  %v5250_v20 = vld [vmem:[#allocation99_spill] sm:$0xff]  ;;  %v5251_v57 = vpack.c.bf16 %v5120_v15, %v5119_v45  ;;  %v1534_v45 = vstv %s3706_s19  ;;  %v1537_v15 = vstv %s3708_s20  ;;  %5358 = sst [smem:[#allocation213_spill]] %s3916_s18  ;;  %s3918_s19 = sld [smem:[#allocation10 + $0x208]] }
  0xef   :  { %s5361_s20 = sld [smem:[#allocation132_spill]]  ;;  %s5369_s18 = sld [smem:[#allocation138_spill]] }
  0xf0   :  { %2578 = vmatpush1.bf16.msra.mxu1 %v5199_v32  ;;  %v1470_v32 = vstv %s3716_s24  ;;  %s3926_s24 = sld [smem:[#allocation10 + $0x308]]  ;;  %5402 = sst [smem:[#allocation228_spill]] %s3974_s4 }
  0xf1   :  { %2770 = vmatpush1.bf16.msra.mxu0 %v5200_v11  ;;  %2580 = vmatprep.subr.bf16.mxu1 %v5203_v25  ;;  %v1473_v11 = vstv %s3718_s25  ;;  %v1482_v25 = vstv %s3724_s27  ;;  %s5367_s25 = sld [smem:[#allocation136_spill]]  ;;  %s3934_s27 = sld [smem:[#allocation7 + $0x480]] }
  0xf2   :  { %2772 = vmatprep.subr.bf16.mxu0 %v5204_v46  ;;  %v1485_v46 = vstv %s3726_s28  ;;  %s5373_s28 = sld [smem:[#allocation140_spill]]  ;;  %s3988_s4 = sld [smem:[#allocation8 + $0xa]] }
  0xf3   :  { %5426 = sst [smem:[#allocation236_spill]] %s4006_s9  ;;  %s4020_s9 = sld [smem:[#allocation10 + $0x38a]] }
  0xf4   :  { %2582 = vmatpush1.bf16.msra.mxu1 %v5205_v24  ;;  %5360 = sst [smem:[#allocation214_spill]] %s3918_s19  ;;  %v1488_v24 = vstv %s3728_s29  ;;  %s3932_s19 = sld [smem:[#allocation10 + $0x388]] }
  0xf5   :  { %2774 = vmatpush1.bf16.msra.mxu0 %v5206_v22  ;;  %2584 = vmatprep.subr.bf16.mxu1 %v5209_v42  ;;  %v1502_v22 = vstv %s3730_s30  ;;  %v1514_v42 = vstv %s3736_s11  ;;  %s5374_s29 = sld [smem:[#allocation141_spill]]  ;;  %s5377_s30 = sld [smem:[#allocation143_spill]]  ;;  %v1561_v10 = vstv %s5369_s18 }
  0xf6   :  { %2776 = vmatprep.subr.bf16.mxu0 %v5210_v1  ;;  %5366 = sst [smem:[#allocation216_spill]] %s3926_s24  ;;  %v1518_v1 = vstv %s3738_s12  ;;  %s5380_s11 = sld [smem:[#allocation145_spill]] }
  0xf7   :  { %5372 = sst [smem:[#allocation218_spill]] %s3934_s27  ;;  %s3940_s24 = sld [smem:[#allocation7 + $0x481]] }
  0xf8   :  { %2586 = vmatpush1.bf16.msra.mxu1 %v5211_v54  ;;  %v1522_v54 = vstv %s3740_s13  ;;  %s3948_s27 = sld [smem:[#allocation10 + $0x9]]  ;;  %s5383_s12 = sld [smem:[#allocation147_spill]] }
  0xf9   :  { %2778 = vmatpush1.bf16.msra.mxu0 %v5212_v29  ;;  %2588 = vmatprep.subr.bf16.mxu1 %v5213_v26  ;;  %v1526_v29 = vstv %s5359_s21  ;;  %v1530_v26 = vstv %s5361_s20  ;;  %s3950_s13 = sld [smem:[#allocation10 + $0x89]]  ;;  %s5410_s21 = sld [smem:[#allocation165_spill]] }
  0xfa   :  { %2780 = vmatprep.subr.bf16.mxu0 %v5214_v31  ;;  %5370 = sst [smem:[#allocation217_spill]] %s3932_s19  ;;  %v1541_v31 = vstv %s5362_s22  ;;  %s5381_s19 = sld [smem:[#allocation146_spill]] }
  0xfb   :  { %v1584_v43 = vstv %s5377_s30  ;;  %s3966_s18 = sld [smem:[#allocation10 + $0x289]]  ;;  %5412 = sst [smem:[#allocation231_spill]] %s3988_s4 }
  0xfc   :  { %2590 = vmatpush1.bf16.msra.mxu1 %v5217_v37  ;;  %v1553_v37 = vstv %s5367_s25  ;;  %s5392_s25 = sld [smem:[#allocation153_spill]]  ;;  %s5423_s4 = sld [smem:[#allocation174_spill]] }
  0xfd   :  { %2782 = vmatpush1.bf16.msra.mxu0 %v5218_v33  ;;  %2592 = vmatprep.subr.bf16.mxu1 %v5221_v44  ;;  %5376 = sst [smem:[#allocation219_spill]] %s3940_s24  ;;  %v1557_v33 = vstv %s5368_s2  ;;  %v1569_v44 = vstv %s5373_s28  ;;  %s3990_s24 = sld [smem:[#allocation10 + $0xa]] }
  0xfe   :  { %2784 = vmatprep.subr.bf16.mxu0 %v5222_v19  ;;  %5382 = sst [smem:[#allocation221_spill]] %s3948_s27  ;;  %v1573_v19 = vstv %s5374_s29  ;;  %s5393_s27 = sld [smem:[#allocation154_spill]] }
  0xff   :  { %5384 = sst [smem:[#allocation222_spill]] %s3950_s13  ;;  %s3964_s13 = sld [smem:[#allocation10 + $0x209]] }
 0x100   :  { %2594 = vmatpush1.bf16.msra.mxu1 %v5225_v0  ;;  %v1588_v0 = vstv %s5379_s10  ;;  %v1596_v34 = vstv %s5381_s19  ;;  %s3982_s19 = sld [smem:[#allocation7 + $0x501]]  ;;  %s5425_s28 = sld [smem:[#allocation175_spill]] }
 0x101   :  { %2786 = vmatpush1.bf16.msra.mxu0 %v5226_v30  ;;  %2596 = vmatprep.subr.bf16.mxu1 %v5228_v41  ;;  %5396 = sst [smem:[#allocation226_spill]] %s3966_s18  ;;  %v1592_v30 = vstv %s5380_s11  ;;  %v1600_v41 = vstv %s5383_s12  ;;  %s3980_s18 = sld [smem:[#allocation7 + $0x500]] }
 0x102   :  { %2788 = vmatprep.subr.bf16.mxu0 %v5229_v23  ;;  %s5407_s11 = sld [smem:[#allocation163_spill]]  ;;  %s5409_s12 = sld [smem:[#allocation164_spill]] }
 0x103   :  { %5414 = sst [smem:[#allocation232_spill]] %s3990_s24  ;;  %s4004_s24 = sld [smem:[#allocation10 + $0x18a]] }
 0x104   :  { %2598 = vmatpush1.bf16.msra.mxu1 %v5230_v12  ;;  %s5427_s29 = sld [smem:[#allocation176_spill]]  ;;  %5436 = sst [smem:[#allocation239_spill]] %s4020_s9 }
 0x105   :  { %2790 = vmatpush1.bf16.msra.mxu0 %v5231_v55  ;;  %2600 = vmatprep.subr.bf16.mxu1 %v5232_v56  ;;  %5394 = sst [smem:[#allocation225_spill]] %s3964_s13  ;;  %s5454_s10 = sld [smem:[#allocation196_spill]] }
 0x106   :  { %2792 = vmatprep.subr.bf16.mxu0 %v5233_v62  ;;  %5408 = sst [smem:[#allocation230_spill]] %s3982_s19  ;;  %s3996_s19 = sld [smem:[#allocation10 + $0x8a]] }
 0x107   :  { %5406 = sst [smem:[#allocation229_spill]] %s3980_s18  ;;  %s4014_s13 = sld [smem:[#allocation10 + $0x30a]] }
 0x108   :  { %2602 = vmatpush1.bf16.msra.mxu1 %v5234_v4  ;;  %v1623_v4 = vstv %s5392_s25  ;;  %v1663_v63 = vstv %s5407_s11  ;;  %5437 = sst [smem:[#allocation240_spill]] %s4022_s0  ;;  %s5439_s22 = sld [smem:[#allocation185_spill]] }
 0x109   :  { %2794 = vmatpush1.bf16.msra.mxu0 %v5235_v6  ;;  %2604 = vmatprep.subr.bf16.mxu1 %v5236_v52  ;;  %v1627_v6 = vstv %s5393_s27  ;;  %s3998_s27 = sld [smem:[#allocation10 + $0x10a]]  ;;  %5424 = sst [smem:[#allocation235_spill]] %s4004_s24 }
 0x10a   :  { %2796 = vmatprep.subr.bf16.mxu0 %v5237_v18  ;;  %s4030_s18 = sld [smem:[#allocation8 + $0xb]]  ;;  %s5455_s11 = sld [smem:[#allocation197_spill]] }
 0x10b   :  { %s4036_s0 = sld [smem:[#allocation10 + $0xb]]  ;;  %s4070_s25 = sld [smem:[#allocation7 + $0x601]] }
 0x10c   :  { %2606 = vmatpush1.bf16.msra.mxu1 %v5238_v53  ;;  %5418 = sst [smem:[#allocation233_spill]] %s3996_s19  ;;  %s4046_s19 = sld [smem:[#allocation10 + $0x18b]] }
 0x10d   :  { %2798 = vmatpush1.bf16.msra.mxu0 %v5239_v2  ;;  %2608 = vmatprep.subr.bf16.mxu1 %v5241_v7  ;;  %5432 = sst [smem:[#allocation238_spill]] %s4014_s13  ;;  %s4028_s13 = sld [smem:[#allocation7 + $0x581]]  ;;  %v1792_v2 = vstv %s5454_s10 }
 0x10e   :  { %2800 = vmatprep.subr.bf16.mxu0 %v5242_v27  ;;  %s4054_s24 = sld [smem:[#allocation10 + $0x28b]]  ;;  %s4084_s10 = sld [smem:[#allocation10 + $0x8c]] }
 0x10f   :  { %5420 = sst [smem:[#allocation234_spill]] %s3998_s27  ;;  %s4012_s27 = sld [smem:[#allocation10 + $0x28a]] }
 0x110   :  { %2610 = vmatpush1.bf16.msra.mxu1 %v5245_v5  ;;  %v1666_v5 = vstv %s5409_s12  ;;  %5443 = sst [smem:[#allocation242_spill]] %s4030_s18  ;;  %s4086_s30 = sld [smem:[#allocation10 + $0x10c]] }
 0x111   :  { %2802 = vmatpush1.bf16.msra.mxu0 %v5246_v60  ;;  %2612 = vmatprep.subr.bf16.mxu1 %v5247_v48  ;;  %v1670_v60 = vstv %s5410_s21  ;;  %s5440_s21 = sld [smem:[#allocation186_spill]]  ;;  %5446 = sst [smem:[#allocation243_spill]] %s4036_s0 }
 0x112   :  { %2804 = vmatprep.subr.bf16.mxu0 %v5248_v17  ;;  %v1713_v17 = vstv %s5427_s29  ;;  %s4044_s18 = sld [smem:[#allocation10 + $0x10b]]  ;;  %5453 = sst [smem:[#allocation246_spill]] %s4046_s19 }
 0x113   :  { %5441 = sst [smem:[#allocation241_spill]] %s4028_s13  ;;  %s4060_s19 = sld [smem:[#allocation10 + $0x30b]] }
 0x114   :  { %2614 = vmatpush1.bf16.msra.mxu1 %v5249_v51  ;;  %v1709_v51 = vstv %s5425_s28  ;;  %5459 = sst [smem:[#allocation248_spill]] %s4054_s24  ;;  %s4076_s28 = sld [smem:[#allocation8 + $0xc]] }
 0x115   :  { %2806 = vmatpush1.bf16.msra.mxu0 %v5250_v20  ;;  %2616 = vmatprep.subr.bf16.mxu1 %v5251_v57  ;;  %5430 = sst [smem:[#allocation237_spill]] %s4012_s27  ;;  %v1749_v20 = vstv %s5439_s22  ;;  %s4078_s13 = sld [smem:[#allocation10 + $0xc]] }
 0x116   :  { %2808 = vmatprep.subr.bf16.mxu0 %v5252_v40  ;;  %5472 = sst [smem:[#allocation253_spill]] %s4084_s10  ;;  %s4094_s20 = sld [smem:[#allocation10 + $0x20c]] }
 0x117   :  { %v1752_v57 = vstv %s5440_s21  ;;  %s4062_s21 = sld [smem:[#allocation10 + $0x38b]]  ;;  %5474 = sst [smem:[#allocation254_spill]] %s4086_s30 }
 0x118   :  { %2618 = vmatpush1.bf16.msra.mxu1 %v5253_v58  ;;  %5452 = sst [smem:[#allocation245_spill]] %s4044_s18  ;;  %s4100_s30 = sld [smem:[#allocation10 + $0x28c]] }
 0x119   :  { %2810 = vmatpush1.bf16.msra.mxu0 %v5254_v8  ;;  %5462 = sst [smem:[#allocation249_spill]] %s4060_s19  ;;  %v1795_v8 = vstv %s5455_s11  ;;  %s4118_s2 = sld [smem:[#allocation8 + $0xd]] }
 0x11a   :  { %5467 = sst [smem:[#allocation251_spill]] %s4076_s28  ;;  %s4126_s28 = sld [smem:[#allocation10 + $0x8d]] }
 0x11b   :  { %917 = vmatmul.mubr.f32.vlgmr.msra.gmra.mrb[0].mxu1 %v5255_v38  ;;  %v1706_v38 = vstv %s5423_s4  ;;  %s4038_s4 = sld [smem:[#allocation10 + $0x8b]]  ;;  %5468 = sst [smem:[#allocation252_spill]] %s4078_s13 }
 0x11c   :  { %1460 = vmatmul.mubr.f32.vlgmr.msra.gmra.mrb[0].mxu0 %v5174_v61  ;;  %v1467_v61 = vstv %s3714_s23  ;;  %s5365_s23 = sld [smem:[#allocation135_spill]]  ;;  %s4092_s13 = sld [smem:[#allocation10 + $0x18c]] }
 0x11d   :  { %5464 = sst [smem:[#allocation250_spill]] %s4062_s21  ;;  %s4134_s10 = sld [smem:[#allocation10 + $0x18d]] }
 0x11e   :  { %5480 = sst [smem:[#allocation256_spill]] %s4094_s20  ;;  %s4108_s20 = sld [smem:[#allocation10 + $0x38c]] }
 0x11f   :  { %5484 = sst [smem:[#allocation257_spill]] %s4100_s30  ;;  %s4150_s30 = sld [smem:[#allocation10 + $0x38d]] }
 0x120   :  { %5497 = sst [smem:[#allocation261_spill]] %s4118_s2  ;;  %s4132_s2 = sld [smem:[#allocation10 + $0x10d]] }
 0x121   :  { %5448 = sst [smem:[#allocation244_spill]] %s4038_s4  ;;  %s4052_s4 = sld [smem:[#allocation10 + $0x20b]] }
 0x122   :  { %v1549_v59 = vstv %s5365_s23  ;;  %s5391_s23 = sld [smem:[#allocation152_spill]]  ;;  %5478 = sst [smem:[#allocation255_spill]] %s4092_s13 }
 0x123   :  { %5503 = sst [smem:[#allocation263_spill]] %s4126_s28  ;;  %s4140_s28 = sld [smem:[#allocation10 + $0x20d]] }
 0x124   :  { %5490 = sst [smem:[#allocation259_spill]] %s4108_s20  ;;  %s4142_s13 = sld [smem:[#allocation10 + $0x28d]] }
 0x125   :  { %5507 = sst [smem:[#allocation265_spill]] %s4134_s10  ;;  %s4156_s11 = sld [smem:[#allocation7 + $0x700]] }
 0x126   :  { %5506 = sst [smem:[#allocation264_spill]] %s4132_s2  ;;  %s5519_s6 = sld [smem:[#allocation251_spill]] }
 0x127   :  { %5457 = sst [smem:[#allocation247_spill]] %s4052_s4  ;;  %s4158_s20 = sld [smem:[#allocation7 + $0x701]] }
 0x128   :  { %v1620_v62 = vstv %s5391_s23  ;;  %s5442_s23 = sld [smem:[#allocation187_spill]]  ;;  %5516 = sst [smem:[#allocation269_spill]] %s4150_s30 }
 0x129   :  { %5511 = sst [smem:[#allocation266_spill]] %s4140_s28  ;;  %s4164_s27 = sld [smem:[#allocation8 + $0xe]] }
 0x12a   :  { %5512 = sst [smem:[#allocation267_spill]] %s4142_s13  ;;  %s4166_s22 = sld [smem:[#allocation10 + $0xe]] }
 0x12b   :  { %5517 = sst [smem:[#allocation270_spill]] %s4156_s11  ;;  %s4174_s0 = sld [smem:[#allocation7 + $0x781]] }
 0x12c   :  { %s5532_s8 = sld [smem:[#allocation261_spill]]  ;;  %s5534_s21 = sld [smem:[#allocation270_spill]] }
 0x12d   :  { %5518 = sst [smem:[#allocation271_spill]] %s4158_s20  ;;  %s5589_s24 = sld [smem:[#allocation149_spill]] }
 0x12e   :  { %v1756_v40 = vstv %s5442_s23  ;;  %s4068_s23 = sld [smem:[#allocation7 + $0x600]]  ;;  %s5590_s4 = sld [smem:[#allocation150_spill]] }
 0x12f   :  { %5523 = sst [smem:[#allocation251_spill]] %s4164_s27  ;;  %s5535_s19 = sld [smem:[#allocation271_spill]] }
 0x130   :  { %5525 = sst [smem:[#allocation272_spill]] %s4166_s22  ;;  %s5593_s18 = sld [smem:[#allocation156_spill]] }
 0x131   :  { %5531 = sst [smem:[#allocation260_spill]] %s4174_s0  ;;  %s5592_s0 = sld [smem:[#allocation155_spill]] }
 0x132   :  { %v2093_v39 = vstv %s5534_s21  ;;  %s5596_s22 = sld [smem:[#allocation158_spill]]  ;;  %s5598_s9 = sld [smem:[#allocation159_spill]] }
 0x133   :  { %s5600_s11 = sld [smem:[#allocation160_spill]]  ;;  %s5602_s20 = sld [smem:[#allocation161_spill]] }
 0x134   :  { %s5606_s29 = sld [smem:[#allocation166_spill]]  ;;  %s5608_s27 = sld [smem:[#allocation167_spill]] }
 0x135   :  { %s5610_s2 = sld [smem:[#allocation168_spill]]  ;;  %s5612_s10 = sld [smem:[#allocation169_spill]] }
 0x136   :  { %s5614_s28 = sld [smem:[#allocation170_spill]]  ;;  %s5616_s12 = sld [smem:[#allocation171_spill]] }
 0x137   :  { %s5619_s30 = sld [smem:[#allocation173_spill]]  ;;  %s5622_s13 = sld [smem:[#allocation177_spill]] }
 0x138   :  { %s5729_s21 = sld [smem:[#allocation226_spill]] }
 0x1ee   :  { %v918_v52 = vpop.f32.mrb[0].mxu1 }
 0x1ef   :  { %v1461_v56 = vpop.f32.mrb[0].mxu0  ;;  %v920_v18 = vpop.f32.mrb[1].mxu1 }
 0x1f0   :  { %v4200_v53 = vadd.f32 %v1461_v56, %v918_v52  ;;  %v1463_v48 = vpop.f32.mrb[1].mxu0 }
 0x1f1   :  { %v4205_v55 = vadd.f32 %v1463_v48, %v920_v18 }
 0x1f2   :  { %v1492_v56 = vmul.f32 %v4200_v53, %v1491_v16  ;;  %v1535_v52 = vmul.f32 %v4200_v53, %v1534_v45  ;;  %v1578_v9 = vmul.f32 %v4200_v53, %v1577_v36  ;;  %v1621_v27 = vmul.f32 %v4200_v53, %v1620_v62 }
 0x1f3   :  { %v1495_v18 = vmul.f32 %v4205_v55, %v1494_v21  ;;  %v1538_v48 = vmul.f32 %v4205_v55, %v1537_v15  ;;  %v1581_v16 = vmul.f32 %v4205_v55, %v1580_v49  ;;  %v1624_v45 = vmul.f32 %v4205_v55, %v1623_v4 }
 0x1f4   :  { %v1664_v36 = vmul.f32 %v4200_v53, %v1663_v63  ;;  %v1667_v21 = vmul.f32 %v4205_v55, %v1666_v5  ;;  %v1707_v15 = vmul.f32 %v4200_v53, %v1706_v38  ;;  %v1710_v62 = vmul.f32 %v4205_v55, %v1709_v51 }
 0x1f5   :  { %v1496_v49 = vadd.f32 %v1495_v18, %v1492_v56  ;;  %v1539_v7 = vadd.f32 %v1538_v48, %v1535_v52  ;;  %v1582_v58 = vadd.f32 %v1581_v16, %v1578_v9  ;;  %v1625_v4 = vadd.f32 %v1624_v45, %v1621_v27 }
 0x1f6   :  { %v1668_v23 = vadd.f32 %v1667_v21, %v1664_v36  ;;  %v1711_v12 = vadd.f32 %v1710_v62, %v1707_v15  ;;  %v1750_v63 = vmul.f32 %v4200_v53, %v1749_v20  ;;  %v1753_v5 = vmul.f32 %v4205_v55, %v1752_v57 }
 0x1f7   :  { %v1499_v38 = vadd.f32 %v1498_v3, %v1496_v49  ;;  %v1542_v51 = vadd.f32 %v1541_v31, %v1539_v7  ;;  %v1585_v56 = vadd.f32 %v1584_v43, %v1582_v58  ;;  %v1628_v27 = vadd.f32 %v1627_v6, %v1625_v4 }
 0x1f8   :  { %v1671_v9 = vadd.f32 %v1670_v60, %v1668_v23  ;;  %v1714_v20 = vadd.f32 %v1713_v17, %v1711_v12  ;;  %v1754_v57 = vadd.f32 %v1753_v5, %v1750_v63  ;;  %v4267_v3 = vmul.f32 %v4200_v53, %v1792_v2 }
 0x1f9   :  { %v1500_v31 = vmax.f32 %v1499_v38, 0.0  ;;  %v1543_v43 = vmax.f32 %v1542_v51, 0.0  ;;  %v1586_v7 = vmax.f32 %v1585_v56, 0.0  ;;  %v1629_v6 = vmax.f32 %v1628_v27, 0.0 }
 0x1fa   :  { %v4269_v23 = vmax.f32 %v1671_v9, 0.0  ;;  %v4271_v12 = vmax.f32 %v1714_v20, 0.0  ;;  %v4275_v60 = vadd.f32 %v1756_v40, %v1754_v57  ;;  %v4280_v2 = vmul.f32 %v4205_v55, %v1795_v8 }
 0x1fb   :  { %v1503_v17 = vmul.f32 %v1502_v22, %v1500_v31  ;;  %v1507_v58 = vmul.f32 %v1506_v28, %v1500_v31  ;;  %v1511_v52 = vmul.f32 %v1510_v13, %v1500_v31  ;;  %v1515_v18 = vmul.f32 %v1514_v42, %v1500_v31 }
 0x1fc   :  { %v1519_v40 = vmul.f32 %v1518_v1, %v1500_v31  ;;  %v1523_v48 = vmul.f32 %v1522_v54, %v1500_v31  ;;  %v1527_v8 = vmul.f32 %v1526_v29, %v1500_v31  ;;  %v1531_v22 = vmul.f32 %v1530_v26, %v1500_v31 }
 0x1fd   :  { %v1504_v28 = vadd.f32 %v1503_v17, %v1467_v61  ;;  %v1508_v13 = vadd.f32 %v1507_v58, %v1470_v32  ;;  %v1512_v16 = vadd.f32 %v1511_v52, %v1473_v11  ;;  %v1516_v42 = vadd.f32 %v1515_v18, %v1476_v14 }
 0x1fe   :  { %v1520_v1 = vadd.f32 %v1519_v40, %v1479_v47  ;;  %v1524_v45 = vadd.f32 %v1523_v48, %v1482_v25  ;;  %v1528_v54 = vadd.f32 %v1527_v8, %v1485_v46  ;;  %v1532_v29 = vadd.f32 %v1531_v22, %v1488_v24 }
 0x1ff   :  { %v1546_v36 = vmul.f32 %v1545_v35, %v1543_v43  ;;  %v1550_v26 = vmul.f32 %v1549_v59, %v1543_v43  ;;  %v1554_v61 = vmul.f32 %v1553_v37, %v1543_v43  ;;  %v1558_v32 = vmul.f32 %v1557_v33, %v1543_v43 }
 0x200   :  { %v1562_v11 = vmul.f32 %v1561_v10, %v1543_v43  ;;  %v1566_v14 = vmul.f32 %v1565_v50, %v1543_v43  ;;  %v1570_v47 = vmul.f32 %v1569_v44, %v1543_v43  ;;  %v1574_v25 = vmul.f32 %v1573_v19, %v1543_v43 }
 0x201   :  { %v1547_v46 = vadd.f32 %v1546_v36, %v1504_v28  ;;  %v1551_v24 = vadd.f32 %v1550_v26, %v1508_v13  ;;  %v1555_v35 = vadd.f32 %v1554_v61, %v1512_v16  ;;  %v1559_v59 = vadd.f32 %v1558_v32, %v1516_v42 }
 0x202   :  { %v1563_v37 = vadd.f32 %v1562_v11, %v1520_v1  ;;  %v1567_v21 = vadd.f32 %v1566_v14, %v1524_v45  ;;  %v1571_v33 = vadd.f32 %v1570_v47, %v1528_v54  ;;  %v1575_v15 = vadd.f32 %v1574_v25, %v1532_v29 }
 0x203   :  { %v1589_v10 = vmul.f32 %v1588_v0, %v1586_v7  ;;  %v1593_v50 = vmul.f32 %v1592_v30, %v1586_v7  ;;  %v1597_v44 = vmul.f32 %v1596_v34, %v1586_v7  ;;  %v1601_v19 = vmul.f32 %v1600_v41, %v1586_v7 }
 0x204   :  { %v5595_v62 = vstv %s5588_s16  ;;  %v5597_v4 = vstv %s5589_s24  ;;  %v5599_v5 = vstv %s5590_s4  ;;  %v5601_v51 = vstv %s5591_s14  ;;  %s5626_s16 = sld [smem:[#allocation179_spill]]  ;;  %s5628_s24 = sld [smem:[#allocation180_spill]] }
 0x205   :  { %v1605_v49 = vmul.f32 %v5595_v62, %v1586_v7  ;;  %v1609_v63 = vmul.f32 %v5597_v4, %v1586_v7  ;;  %v1613_v38 = vmul.f32 %v5599_v5, %v1586_v7  ;;  %v1617_v0 = vmul.f32 %v5601_v51, %v1586_v7  ;;  %s5630_s4 = sld [smem:[#allocation181_spill]]  ;;  %s5632_s14 = sld [smem:[#allocation182_spill]] }
 0x206   :  { %v1590_v30 = vadd.f32 %v1589_v10, %v1547_v46  ;;  %v1594_v56 = vadd.f32 %v1593_v50, %v1551_v24  ;;  %v1598_v27 = vadd.f32 %v1597_v44, %v1555_v35  ;;  %v1602_v34 = vadd.f32 %v1601_v19, %v1559_v59 }
 0x207   :  { %v1606_v9 = vadd.f32 %v1605_v49, %v1563_v37  ;;  %v1610_v20 = vadd.f32 %v1609_v63, %v1567_v21  ;;  %v1614_v41 = vadd.f32 %v1613_v38, %v1571_v33  ;;  %v1618_v57 = vadd.f32 %v1617_v0, %v1575_v15 }
 0x208   :  { %v5604_v31 = vstv %s5592_s0  ;;  %v5605_v17 = vstv %s5593_s18  ;;  %v5607_v52 = vstv %s5594_s17  ;;  %v5609_v40 = vstv %s5596_s22  ;;  %s5634_s0 = sld [smem:[#allocation183_spill]]  ;;  %s5635_s18 = sld [smem:[#allocation184_spill]] }
 0x209   :  { %v1632_v43 = vmul.f32 %v5604_v31, %v1629_v6  ;;  %v1636_v58 = vmul.f32 %v5605_v17, %v1629_v6  ;;  %v1640_v18 = vmul.f32 %v5607_v52, %v1629_v6  ;;  %v1644_v7 = vmul.f32 %v5609_v40, %v1629_v6  ;;  %s5640_s17 = sld [smem:[#allocation207_spill]]  ;;  %s5642_s22 = sld [smem:[#allocation208_spill]] }
 0x20a   :  { %v5611_v48 = vstv %s5598_s9  ;;  %v5613_v22 = vstv %s5600_s11  ;;  %v5615_v13 = vstv %s5602_s20  ;;  %v5617_v42 = vstv %s5603_s7  ;;  %s5644_s9 = sld [smem:[#allocation218_spill]]  ;;  %s5646_s11 = sld [smem:[#allocation219_spill]] }
 0x20b   :  { %v1648_v8 = vmul.f32 %v5611_v48, %v1629_v6  ;;  %v1652_v28 = vmul.f32 %v5613_v22, %v1629_v6  ;;  %v1656_v16 = vmul.f32 %v5615_v13, %v1629_v6  ;;  %v1660_v1 = vmul.f32 %v5617_v42, %v1629_v6  ;;  %s5648_s20 = sld [smem:[#allocation229_spill]]  ;;  %s5649_s7 = sld [smem:[#allocation230_spill]] }
 0x20c   :  { %v1633_v45 = vadd.f32 %v1632_v43, %v1590_v30  ;;  %v1637_v54 = vadd.f32 %v1636_v58, %v1594_v56  ;;  %v1641_v29 = vadd.f32 %v1640_v18, %v1598_v27  ;;  %v1645_v36 = vadd.f32 %v1644_v7, %v1602_v34 }
 0x20d   :  { %v1649_v26 = vadd.f32 %v1648_v8, %v1606_v9  ;;  %v1653_v61 = vadd.f32 %v1652_v28, %v1610_v20  ;;  %v1657_v32 = vadd.f32 %v1656_v16, %v1614_v41  ;;  %v1661_v11 = vadd.f32 %v1660_v1, %v1618_v57 }
 0x20e   :  { %v5620_v14 = vstv %s5606_s29  ;;  %v5621_v25 = vstv %s5608_s27  ;;  %v5623_v24 = vstv %s5610_s2  ;;  %v5625_v35 = vstv %s5612_s10  ;;  %s5650_s29 = sld [smem:[#allocation188_spill]]  ;;  %s5651_s27 = sld [smem:[#allocation189_spill]] }
 0x20f   :  { %v1675_v47 = vmul.f32 %v5620_v14, %v4269_v23  ;;  %v1679_v46 = vmul.f32 %v5621_v25, %v4269_v23  ;;  %v1683_v6 = vmul.f32 %v5623_v24, %v4269_v23  ;;  %v1687_v59 = vmul.f32 %v5625_v35, %v4269_v23  ;;  %s5652_s2 = sld [smem:[#allocation190_spill]]  ;;  %s5653_s10 = sld [smem:[#allocation191_spill]] }
 0x210   :  { %v5627_v37 = vstv %s5614_s28  ;;  %v5629_v33 = vstv %s5616_s12  ;;  %v5631_v10 = vstv %s5618_s5  ;;  %v5633_v44 = vstv %s5619_s30  ;;  %s5654_s28 = sld [smem:[#allocation192_spill]]  ;;  %s5655_s12 = sld [smem:[#allocation193_spill]] }
 0x211   :  { %v1691_v21 = vmul.f32 %v5627_v37, %v4269_v23  ;;  %v1695_v15 = vmul.f32 %v5629_v33, %v4269_v23  ;;  %v1699_v50 = vmul.f32 %v5631_v10, %v4269_v23  ;;  %v1703_v19 = vmul.f32 %v5633_v44, %v4269_v23  ;;  %s5656_s5 = sld [smem:[#allocation194_spill]]  ;;  %s5657_s30 = sld [smem:[#allocation195_spill]] }
 0x212   :  { %v1676_v62 = vadd.f32 %v1675_v47, %v1633_v45  ;;  %v1680_v49 = vadd.f32 %v1679_v46, %v1637_v54  ;;  %v1684_v4 = vadd.f32 %v1683_v6, %v1641_v29  ;;  %v1688_v63 = vadd.f32 %v1687_v59, %v1645_v36 }
 0x213   :  { %v1692_v5 = vadd.f32 %v1691_v21, %v1649_v26  ;;  %v1696_v38 = vadd.f32 %v1695_v15, %v1653_v61  ;;  %v1700_v51 = vadd.f32 %v1699_v50, %v1657_v32  ;;  %v1704_v0 = vadd.f32 %v1703_v19, %v1661_v11 }
 0x214   :  { %v5636_v30 = vstv %s5622_s13  ;;  %v5637_v27 = vstv %s5624_s26  ;;  %v5638_v9 = vstv %s5626_s16  ;;  %v5639_v23 = vstv %s5628_s24  ;;  %s5666_s13 = sld [smem:[#allocation198_spill]]  ;;  %s5671_s26 = sld [smem:[#allocation240_spill]] }
 0x215   :  { %v1718_v56 = vmul.f32 %v5636_v30, %v4271_v12  ;;  %v1722_v34 = vmul.f32 %v5637_v27, %v4271_v12  ;;  %v1726_v20 = vmul.f32 %v5638_v9, %v4271_v12  ;;  %v1730_v41 = vmul.f32 %v5639_v23, %v4271_v12  ;;  %s5673_s16 = sld [smem:[#allocation241_spill]] }
 0x216   :  { %v5641_v57 = vstv %s5630_s4  ;;  %v5643_v43 = vstv %s5632_s14  ;;  %v5645_v58 = vstv %s5634_s0  ;;  %v5647_v18 = vstv %s5635_s18  ;;  %s5675_s24 = sld [smem:[#allocation209_spill]]  ;;  %s5676_s4 = sld [smem:[#allocation220_spill]] }
 0x217   :  { %v1734_v31 = vmul.f32 %v5641_v57, %v4271_v12  ;;  %v1738_v17 = vmul.f32 %v5643_v43, %v4271_v12  ;;  %v1742_v52 = vmul.f32 %v5645_v58, %v4271_v12  ;;  %v1746_v40 = vmul.f32 %v5647_v18, %v4271_v12  ;;  %s5677_s14 = sld [smem:[#allocation231_spill]]  ;;  %s5680_s18 = sld [smem:[#allocation200_spill]] }
 0x218   :  { %v1719_v7 = vadd.f32 %v1718_v56, %v1676_v62  ;;  %v1723_v48 = vadd.f32 %v1722_v34, %v1680_v49  ;;  %v1727_v8 = vadd.f32 %v1726_v20, %v1684_v4  ;;  %v1731_v22 = vadd.f32 %v1730_v41, %v1688_v63  ;;  %s5679_s0 = sld [smem:[#allocation199_spill]] }
 0x219   :  { %v1735_v28 = vadd.f32 %v1734_v31, %v1692_v5  ;;  %v1739_v13 = vadd.f32 %v1738_v17, %v1696_v38  ;;  %v1743_v16 = vadd.f32 %v1742_v52, %v1700_v51  ;;  %v1747_v42 = vadd.f32 %v1746_v40, %v1704_v0 }
 0x21a   :  { %v1758_v1 = vmax.f32 %v4275_v60, 0.0  ;;  %v1797_v12 = vadd.f32 %v4280_v2, %v4267_v3  ;;  %v5658_v45 = vstv %s5640_s17  ;;  %v5659_v29 = vstv %s5642_s22  ;;  %s5681_s17 = sld [smem:[#allocation201_spill]]  ;;  %s5683_s22 = sld [smem:[#allocation202_spill]] }
 0x21b   :  { %v1836_v54 = vmul.f32 %v4200_v53, %v5658_v45  ;;  %v1839_v36 = vmul.f32 %v4205_v55, %v5659_v29  ;;  %v5660_v26 = vstv %s5644_s9  ;;  %v5661_v32 = vstv %s5646_s11  ;;  %s5685_s9 = sld [smem:[#allocation203_spill]]  ;;  %s5687_s11 = sld [smem:[#allocation204_spill]] }
 0x21c   :  { %v1879_v61 = vmul.f32 %v4200_v53, %v5660_v26  ;;  %v1882_v11 = vmul.f32 %v4205_v55, %v5661_v32  ;;  %v5662_v14 = vstv %s5648_s20  ;;  %v5663_v25 = vstv %s5649_s7  ;;  %s5689_s20 = sld [smem:[#allocation205_spill]]  ;;  %s5690_s7 = sld [smem:[#allocation206_spill]] }
 0x21d   :  { %v1922_v47 = vmul.f32 %v4200_v53, %v5662_v14  ;;  %v1925_v60 = vmul.f32 %v4205_v55, %v5663_v25  ;;  %v5664_v46 = vstv %s5650_s29  ;;  %v5665_v2 = vstv %s5651_s27  ;;  %s5708_s29 = sld [smem:[#allocation213_spill]]  ;;  %s5709_s27 = sld [smem:[#allocation214_spill]] }
 0x21e   :  { %v1761_v3 = vmul.f32 %v5664_v46, %v1758_v1  ;;  %v1765_v24 = vmul.f32 %v5665_v2, %v1758_v1  ;;  %v5667_v6 = vstv %s5652_s2  ;;  %v5668_v59 = vstv %s5653_s10  ;;  %s5710_s2 = sld [smem:[#allocation215_spill]]  ;;  %s5711_s10 = sld [smem:[#allocation216_spill]] }
 0x21f   :  { %v1769_v35 = vmul.f32 %v5667_v6, %v1758_v1  ;;  %v1773_v37 = vmul.f32 %v5668_v59, %v1758_v1  ;;  %v5669_v21 = vstv %s5654_s28  ;;  %v5670_v15 = vstv %s5655_s12  ;;  %s5712_s28 = sld [smem:[#allocation217_spill]]  ;;  %s5718_s12 = sld [smem:[#allocation221_spill]] }
 0x220   :  { %v1777_v33 = vmul.f32 %v5669_v21, %v1758_v1  ;;  %v1781_v10 = vmul.f32 %v5670_v15, %v1758_v1  ;;  %v5672_v50 = vstv %s5656_s5  ;;  %v5674_v19 = vstv %s5657_s30  ;;  %s5720_s5 = sld [smem:[#allocation222_spill]]  ;;  %s5722_s30 = sld [smem:[#allocation223_spill]] }
 0x221   :  { %v1785_v44 = vmul.f32 %v5672_v50, %v1758_v1  ;;  %v1789_v62 = vmul.f32 %v5674_v19, %v1758_v1  ;;  %v1762_v49 = vadd.f32 %v1761_v3, %v1719_v7  ;;  %v1766_v4 = vadd.f32 %v1765_v24, %v1723_v48 }
 0x222   :  { %v1770_v63 = vadd.f32 %v1769_v35, %v1727_v8  ;;  %v1774_v5 = vadd.f32 %v1773_v37, %v1731_v22  ;;  %v1778_v38 = vadd.f32 %v1777_v33, %v1735_v28  ;;  %v1782_v51 = vadd.f32 %v1781_v10, %v1739_v13 }
 0x223   :  { %v1786_v0 = vadd.f32 %v1785_v44, %v1743_v16  ;;  %v1790_v30 = vadd.f32 %v1789_v62, %v1747_v42  ;;  %v5678_v56 = vstv %s5666_s13  ;;  %v1840_v34 = vadd.f32 %v1839_v36, %v1836_v54  ;;  %s5730_s13 = sld [smem:[#allocation227_spill]] }
 0x224   :  { %v1800_v27 = vadd.f32 %v5678_v56, %v1797_v12  ;;  %v1883_v9 = vadd.f32 %v1882_v11, %v1879_v61  ;;  %v1926_v20 = vadd.f32 %v1925_v60, %v1922_v47  ;;  %v5682_v23 = vstv %s5671_s26  ;;  %s5731_s26 = sld [smem:[#allocation228_spill]] }
 0x225   :  { %v1965_v41 = vmul.f32 %v4200_v53, %v5682_v23  ;;  %v5684_v57 = vstv %s5673_s16  ;;  %v5686_v43 = vstv %s4068_s23  ;;  %v5688_v58 = vstv %s4070_s25  ;;  %s5701_s23 = sld [smem:[#allocation242_spill]]  ;;  %s5736_s16 = sld [smem:[#allocation232_spill]] }
 0x226   :  { %v1968_v31 = vmul.f32 %v4205_v55, %v5684_v57  ;;  %v2008_v17 = vmul.f32 %v4200_v53, %v5686_v43  ;;  %v2011_v52 = vmul.f32 %v4205_v55, %v5688_v58  ;;  %v1801_v18 = vmax.f32 %v1800_v27, 0.0  ;;  %s5705_s25 = sld [smem:[#allocation210_spill]] }
 0x227   :  { %v5691_v40 = vstv %s5675_s24  ;;  %v5692_v48 = vstv %s5676_s4  ;;  %v5693_v22 = vstv %s5677_s14  ;;  %v5694_v42 = vstv %s5530_s15  ;;  %s5707_s15 = sld [smem:[#allocation212_spill]]  ;;  %s5737_s24 = sld [smem:[#allocation233_spill]] }
 0x228   :  { %v1843_v7 = vadd.f32 %v5691_v40, %v1840_v34  ;;  %v1886_v8 = vadd.f32 %v5692_v48, %v1883_v9  ;;  %v1929_v28 = vadd.f32 %v5693_v22, %v1926_v20  ;;  %v1969_v13 = vadd.f32 %v1968_v31, %v1965_v41  ;;  %s4523_s4 = sld [smem:[#allocation10 + $0x8e]]  ;;  %s5738_s14 = sld [smem:[#allocation234_spill]] }
 0x229   :  { %v2012_v16 = vadd.f32 %v2011_v52, %v2008_v17  ;;  %v2051_v1 = vmul.f32 %v4200_v53, %v5694_v42  ;;  %v5695_v12 = vstv %s4116_s1  ;;  %v5696_v54 = vstv %s5679_s0  ;;  %s5706_s1 = sld [smem:[#allocation211_spill]]  ;;  %s4525_s0 = sld [smem:[#allocation10 + $0x10e]] }
 0x22a   :  { %v2054_v45 = vmul.f32 %v4205_v55, %v5695_v12  ;;  %v1804_v29 = vmul.f32 %v5696_v54, %v1801_v18  ;;  %v5697_v36 = vstv %s5680_s18  ;;  %v5698_v61 = vstv %s5681_s17  ;;  %s5740_s18 = sld [smem:[#allocation235_spill]]  ;;  %s5742_s17 = sld [smem:[#allocation236_spill]] }
 0x22b   :  { %v1808_v26 = vmul.f32 %v5697_v36, %v1801_v18  ;;  %v1812_v32 = vmul.f32 %v5698_v61, %v1801_v18  ;;  %v5699_v11 = vstv %s5683_s22  ;;  %v5700_v47 = vstv %s5685_s9  ;;  %s5744_s22 = sld [smem:[#allocation237_spill]]  ;;  %s5746_s9 = sld [smem:[#allocation238_spill]] }
 0x22c   :  { %v1816_v14 = vmul.f32 %v5699_v11, %v1801_v18  ;;  %v1820_v25 = vmul.f32 %v5700_v47, %v1801_v18  ;;  %v5702_v60 = vstv %s5687_s11  ;;  %v5703_v3 = vstv %s5689_s20  ;;  %s5747_s11 = sld [smem:[#allocation239_spill]]  ;;  %s5756_s20 = sld [smem:[#allocation260_spill]] }
 0x22d   :  { %v1824_v46 = vmul.f32 %v5702_v60, %v1801_v18  ;;  %v1828_v2 = vmul.f32 %v5703_v3, %v1801_v18  ;;  %v5704_v24 = vstv %s5690_s7  ;;  %v1805_v35 = vadd.f32 %v1804_v29, %v1762_v49  ;;  %s5757_s7 = sld [smem:[#allocation243_spill]] }
 0x22e   :  { %v1832_v6 = vmul.f32 %v5704_v24, %v1801_v18  ;;  %v1809_v59 = vadd.f32 %v1808_v26, %v1766_v4  ;;  %v1813_v37 = vadd.f32 %v1812_v32, %v1770_v63  ;;  %v1817_v21 = vadd.f32 %v1816_v14, %v1774_v5 }
 0x22f   :  { %v1821_v33 = vadd.f32 %v1820_v25, %v1778_v38  ;;  %v1825_v15 = vadd.f32 %v1824_v46, %v1782_v51  ;;  %v1829_v10 = vadd.f32 %v1828_v2, %v1786_v0  ;;  %v1844_v44 = vmax.f32 %v1843_v7, 0.0 }
 0x230   :  { %v1833_v50 = vadd.f32 %v1832_v6, %v1790_v30  ;;  %v1887_v19 = vmax.f32 %v1886_v8, 0.0  ;;  %v1930_v62 = vmax.f32 %v1929_v28, 0.0  ;;  %v5713_v56 = vstv %s5701_s23  ;;  %s5758_s23 = sld [smem:[#allocation244_spill]] }
 0x231   :  { %v1972_v49 = vadd.f32 %v5713_v56, %v1969_v13  ;;  %v5714_v27 = vstv %s5519_s6  ;;  %v2055_v34 = vadd.f32 %v2054_v45, %v2051_v1  ;;  %v2094_v63 = vmul.f32 %v4200_v53, %v2093_v39  ;;  %s5724_s6 = sld [smem:[#allocation224_spill]] }
 0x232   :  { %v2015_v4 = vadd.f32 %v5714_v27, %v2012_v16  ;;  %v5715_v5 = vstv %s5535_s19  ;;  %v5716_v51 = vstv %s5705_s25  ;;  %v5717_v0 = vstv %s5706_s1  ;;  %s5728_s19 = sld [smem:[#allocation225_spill]]  ;;  %s5759_s25 = sld [smem:[#allocation245_spill]] }
 0x233   :  { %v2097_v38 = vmul.f32 %v4205_v55, %v5715_v5  ;;  %v1847_v9 = vmul.f32 %v5716_v51, %v1844_v44  ;;  %v1851_v30 = vmul.f32 %v5717_v0, %v1844_v44  ;;  %v5719_v20 = vstv %s5707_s15  ;;  %s5760_s1 = sld [smem:[#allocation246_spill]]  ;;  %s5761_s15 = sld [smem:[#allocation247_spill]] }
 0x234   :  { %v1855_v23 = vmul.f32 %v5719_v20, %v1844_v44  ;;  %v5721_v41 = vstv %s5708_s29  ;;  %v5723_v31 = vstv %s5709_s27  ;;  %v5725_v17 = vstv %s5710_s2  ;;  %s5762_s29 = sld [smem:[#allocation248_spill]]  ;;  %s5763_s27 = sld [smem:[#allocation249_spill]] }
 0x235   :  { %v1859_v57 = vmul.f32 %v5721_v41, %v1844_v44  ;;  %v1863_v43 = vmul.f32 %v5723_v31, %v1844_v44  ;;  %v1867_v58 = vmul.f32 %v5725_v17, %v1844_v44  ;;  %v5726_v39 = vstv %s5711_s10  ;;  %s5764_s2 = sld [smem:[#allocation250_spill]]  ;;  %s4555_s10 = sld [smem:[#allocation10 + $0x18e]] }
 0x236   :  { %v1871_v52 = vmul.f32 %v5726_v39, %v1844_v44  ;;  %v5727_v18 = vstv %s5712_s28  ;;  %v1848_v7 = vadd.f32 %v1847_v9, %v1805_v35  ;;  %v1852_v48 = vadd.f32 %v1851_v30, %v1809_v59  ;;  %s4571_s28 = sld [smem:[#allocation10 + $0x20e]] }
 0x237   :  { %v1875_v40 = vmul.f32 %v5727_v18, %v1844_v44  ;;  %v1856_v8 = vadd.f32 %v1855_v23, %v1813_v37  ;;  %v1860_v22 = vadd.f32 %v1859_v57, %v1817_v21  ;;  %v1864_v28 = vadd.f32 %v1863_v43, %v1821_v33 }
 0x238   :  { %v1868_v13 = vadd.f32 %v1867_v58, %v1825_v15  ;;  %v1872_v16 = vadd.f32 %v1871_v52, %v1829_v10  ;;  %v5732_v1 = vstv %s5718_s12  ;;  %v5733_v45 = vstv %s5720_s5  ;;  %s4573_s12 = sld [smem:[#allocation10 + $0x28e]]  ;;  %s5776_s5 = sld [smem:[#allocation254_spill]] }
 0x239   :  { %v1876_v42 = vadd.f32 %v1875_v40, %v1833_v50  ;;  %v1890_v12 = vmul.f32 %v5732_v1, %v1887_v19  ;;  %v1894_v54 = vmul.f32 %v5733_v45, %v1887_v19  ;;  %v5734_v29 = vstv %s5722_s30  ;;  %s5778_s30 = sld [smem:[#allocation255_spill]] }
 0x23a   :  { %v1898_v36 = vmul.f32 %v5734_v29, %v1887_v19  ;;  %v5735_v26 = vstv %s5724_s6  ;;  %v5739_v32 = vstv %s5728_s19  ;;  %v5741_v14 = vstv %s5729_s21  ;;  %s5780_s6 = sld [smem:[#allocation256_spill]]  ;;  %s5781_s19 = sld [smem:[#allocation257_spill]] }
 0x23b   :  { %v1902_v61 = vmul.f32 %v5735_v26, %v1887_v19  ;;  %v1906_v11 = vmul.f32 %v5739_v32, %v1887_v19  ;;  %v1910_v47 = vmul.f32 %v5741_v14, %v1887_v19  ;;  %v5743_v25 = vstv %s5730_s13  ;;  %s4583_s21 = sld [smem:[#allocation10 + $0x30e]]  ;;  %s5782_s13 = sld [smem:[#allocation258_spill]] }
 0x23c   :  { %v1914_v60 = vmul.f32 %v5743_v25, %v1887_v19  ;;  %v5745_v46 = vstv %s5731_s26  ;;  %v1891_v2 = vadd.f32 %v1890_v12, %v1848_v7  ;;  %v1895_v24 = vadd.f32 %v1894_v54, %v1852_v48  ;;  %s4585_s26 = sld [smem:[#allocation8 + $0xf]] }
 0x23d   :  { %v1918_v3 = vmul.f32 %v5745_v46, %v1887_v19  ;;  %v1899_v6 = vadd.f32 %v1898_v36, %v1856_v8  ;;  %v1903_v35 = vadd.f32 %v1902_v61, %v1860_v22  ;;  %v1907_v59 = vadd.f32 %v1906_v11, %v1864_v28 }
 0x23e   :  { %v1911_v37 = vadd.f32 %v1910_v47, %v1868_v13  ;;  %v1915_v21 = vadd.f32 %v1914_v60, %v1872_v16  ;;  %v5748_v15 = vstv %s5736_s16  ;;  %v5749_v50 = vstv %s5737_s24  ;;  %s5783_s16 = sld [smem:[#allocation259_spill]]  ;;  %s4603_s24 = sld [smem:[#allocation10 + $0x38e]] }
 0x23f   :  { %v1919_v33 = vadd.f32 %v1918_v3, %v1876_v42  ;;  %v1933_v10 = vmul.f32 %v5748_v15, %v1930_v62  ;;  %v1937_v44 = vmul.f32 %v5749_v50, %v1930_v62  ;;  %v5750_v56 = vstv %s5738_s14  ;;  %s4605_s14 = sld [smem:[#allocation10 + $0xf]] }
 0x240   :  { %v1941_v27 = vmul.f32 %v5750_v56, %v1930_v62  ;;  %v5751_v5 = vstv %s5740_s18  ;;  %v5752_v9 = vstv %s5742_s17  ;;  %v5753_v0 = vstv %s5744_s22  ;;  %s5792_s18 = sld [smem:[#allocation251_spill]]  ;;  %s4607_s17 = sld [smem:[#allocation10 + $0x8f]] }
 0x241   :  { %v1945_v51 = vmul.f32 %v5751_v5, %v1930_v62  ;;  %v1949_v19 = vmul.f32 %v5752_v9, %v1930_v62  ;;  %v1953_v30 = vmul.f32 %v5753_v0, %v1930_v62  ;;  %v5754_v20 = vstv %s5746_s9  ;;  %s5793_s22 = sld [smem:[#allocation262_spill]] }
 0x242   :  { %v1957_v23 = vmul.f32 %v5754_v20, %v1930_v62  ;;  %v5755_v41 = vstv %s5747_s11  ;;  %v1934_v31 = vadd.f32 %v1933_v10, %v1891_v2  ;;  %v1938_v43 = vadd.f32 %v1937_v44, %v1895_v24  ;;  %s4609_s9 = sld [smem:[#allocation10 + $0x10f]]  ;;  %s5794_s11 = sld [smem:[#allocation263_spill]] }
 0x243   :  { %v1961_v57 = vmul.f32 %v5755_v41, %v1930_v62  ;;  %v1942_v17 = vadd.f32 %v1941_v27, %v1899_v6  ;;  %v1946_v58 = vadd.f32 %v1945_v51, %v1903_v35  ;;  %v1950_v39 = vadd.f32 %v1949_v19, %v1907_v59 }
 0x244   :  { %v1954_v52 = vadd.f32 %v1953_v30, %v1911_v37  ;;  %v1958_v18 = vadd.f32 %v1957_v23, %v1915_v21  ;;  %v1973_v7 = vmax.f32 %v1972_v49, 0.0  ;;  %v2098_v48 = vadd.f32 %v2097_v38, %v2094_v63 }
 0x245   :  { %v1962_v40 = vadd.f32 %v1961_v57, %v1919_v33  ;;  %v2108_v62 = vstv %s4523_s4  ;;  %v2112_v8 = vstv %s4525_s0  ;;  %v2016_v22 = vmax.f32 %v2015_v4, 0.0  ;;  %s4658_s4 = sld [smem:[#allocation13 + $0x1]]  ;;  %s4664_s0 = sld [smem:[#allocation13 + $0x2]] }
 0x246   :  { %v5765_v28 = vstv %s5532_s8  ;;  %v5766_v16 = vstv %s4172_s3  ;;  %v5767_v1 = vstv %s5756_s20  ;;  %v5768_v45 = vstv %s5757_s7  ;;  %s5772_s8 = sld [smem:[#allocation252_spill]]  ;;  %s5774_s3 = sld [smem:[#allocation253_spill]] }
 0x247   :  { %v2058_v13 = vadd.f32 %v5765_v28, %v2055_v34  ;;  %v2137_v42 = vmul.f32 %v4200_v53, %v5766_v16  ;;  %v2140_v12 = vmul.f32 %v4205_v55, %v5767_v1  ;;  %v1976_v54 = vmul.f32 %v5768_v45, %v1973_v7  ;;  %s5795_s20 = sld [smem:[#allocation264_spill]]  ;;  %s5796_s7 = sld [smem:[#allocation265_spill]] }
 0x248   :  { %v5769_v49 = vstv %s5758_s23  ;;  %v5770_v63 = vstv %s5759_s25  ;;  %v5771_v36 = vstv %s5760_s1  ;;  %v5773_v4 = vstv %s5761_s15  ;;  %s5797_s23 = sld [smem:[#allocation266_spill]]  ;;  %s5798_s25 = sld [smem:[#allocation267_spill]] }
 0x249   :  { %v1980_v29 = vmul.f32 %v5769_v49, %v1973_v7  ;;  %v1984_v38 = vmul.f32 %v5770_v63, %v1973_v7  ;;  %v1988_v26 = vmul.f32 %v5771_v36, %v1973_v7  ;;  %v1992_v34 = vmul.f32 %v5773_v4, %v1973_v7  ;;  %s4611_s1 = sld [smem:[#allocation10 + $0x18f]]  ;;  %s5799_s15 = sld [smem:[#allocation268_spill]] }
 0x24a   :  { %v5775_v53 = vstv %s5762_s29  ;;  %v5777_v55 = vstv %s5763_s27  ;;  %v5779_v11 = vstv %s5764_s2  ;;  %v1977_v47 = vadd.f32 %v1976_v54, %v1934_v31  ;;  %s4613_s29 = sld [smem:[#allocation10 + $0x20f]]  ;;  %s5800_s27 = sld [smem:[#allocation269_spill]] }
 0x24b   :  { %v1996_v61 = vmul.f32 %v5775_v53, %v1973_v7  ;;  %v2000_v32 = vmul.f32 %v5777_v55, %v1973_v7  ;;  %v2004_v14 = vmul.f32 %v5779_v11, %v1973_v7  ;;  %v1981_v25 = vadd.f32 %v1980_v29, %v1938_v43  ;;  %s4638_s2 = sld [smem:[#allocation10 + $0x28f]] }
 0x24c   :  { %v1985_v60 = vadd.f32 %v1984_v38, %v1942_v17  ;;  %v1989_v46 = vadd.f32 %v1988_v26, %v1946_v58  ;;  %v1993_v3 = vadd.f32 %v1992_v34, %v1950_v39  ;;  %v5784_v35 = vstv %s5772_s8  ;;  %s4642_s8 = sld [smem:[#allocation10 + $0x38f]] }
 0x24d   :  { %v1997_v2 = vadd.f32 %v1996_v61, %v1954_v52  ;;  %v2001_v24 = vadd.f32 %v2000_v32, %v1958_v18  ;;  %v2005_v6 = vadd.f32 %v2004_v14, %v1962_v40  ;;  %v2019_v59 = vmul.f32 %v5784_v35, %v2016_v22 }
 0x24e   :  { %v5785_v37 = vstv %s5774_s3  ;;  %v5786_v33 = vstv %s5776_s5  ;;  %v5787_v10 = vstv %s5778_s30  ;;  %v5788_v44 = vstv %s5780_s6  ;;  %s2422_s3 = sld [smem:[#allocation13 + $0x3]]  ;;  %s2423_s5 = sld [smem:[#allocation13 + $0x4]] }
 0x24f   :  { %v2023_v21 = vmul.f32 %v5785_v37, %v2016_v22  ;;  %v2027_v15 = vmul.f32 %v5786_v33, %v2016_v22  ;;  %v2031_v50 = vmul.f32 %v5787_v10, %v2016_v22  ;;  %v2035_v56 = vmul.f32 %v5788_v44, %v2016_v22 }
 0x250   :  { %v5789_v27 = vstv %s5781_s19  ;;  %v5790_v51 = vstv %s5782_s13  ;;  %v5791_v19 = vstv %s5783_s16  ;;  %v2020_v30 = vadd.f32 %v2019_v59, %v1977_v47  ;;  %s5812_s19 = sld [smem:[#allocation273_spill]]  ;;  %s2956_s16 = smov [#allocation14]  }
 0x251   :  { %v2039_v5 = vmul.f32 %v5789_v27, %v2016_v22  ;;  %v2043_v9 = vmul.f32 %v5790_v51, %v2016_v22  ;;  %v2047_v0 = vmul.f32 %v5791_v19, %v2016_v22  ;;  %v2024_v20 = vadd.f32 %v2023_v21, %v1981_v25  ;;  %s2425_s13 = sld [smem:[#allocation13 + $0x6]] }
 0x252   :  { %v2028_v23 = vadd.f32 %v2027_v15, %v1985_v60  ;;  %v2032_v41 = vadd.f32 %v2031_v50, %v1989_v46  ;;  %v2036_v57 = vadd.f32 %v2035_v56, %v1993_v3  ;;  %v2059_v58 = vmax.f32 %v2058_v13, 0.0 }
 0x253   :  { %v2040_v31 = vadd.f32 %v2039_v5, %v1997_v2  ;;  %v2044_v43 = vadd.f32 %v2043_v9, %v2001_v24  ;;  %v2048_v17 = vadd.f32 %v2047_v0, %v2005_v6  ;;  %v2116_v39 = vstv %s4555_s10  ;;  %s5810_s10 = sld [smem:[#allocation272_spill]] }
 0x254   :  { %v2120_v52 = vstv %s4571_s28  ;;  %v2141_v18 = vadd.f32 %v2140_v12, %v2137_v42  ;;  %v5801_v40 = vstv %s5792_s18  ;;  %v2124_v22 = vstv %s4573_s12  ;;  %s4640_s28 = sld [smem:[#allocation10 + $0x30f]]  ;;  %s4644_s12 = sld [smem:[#allocation13]] }
 0x255   :  { %v2101_v7 = vadd.f32 %v5801_v40, %v2098_v48  ;;  %v2128_v28 = vstv %s4583_s21  ;;  %v2143_v16 = vstv %s4585_s26  ;;  %v5802_v1 = vstv %s5793_s22  ;;  %s2424_s21 = sld [smem:[#allocation13 + $0x5]]  ;;  %s2426_s26 = sld [smem:[#allocation13 + $0x7]] }
 0x256   :  { %v2062_v45 = vmul.f32 %v5802_v1, %v2059_v58  ;;  %v5803_v54 = vstv %s5794_s11  ;;  %v5804_v29 = vstv %s5795_s20  ;;  %v5805_v38 = vstv %s5796_s7 }
 0x257   :  { %v2066_v49 = vmul.f32 %v5803_v54, %v2059_v58  ;;  %v2070_v63 = vmul.f32 %v5804_v29, %v2059_v58  ;;  %v2074_v36 = vmul.f32 %v5805_v38, %v2059_v58  ;;  %v5806_v26 = vstv %s5797_s23 }
 0x258   :  { %v2078_v4 = vmul.f32 %v5806_v26, %v2059_v58  ;;  %v5807_v34 = vstv %s5798_s25  ;;  %v5808_v53 = vstv %s5799_s15  ;;  %v5809_v12 = vstv %s5800_s27 }
 0x259   :  { %v2082_v13 = vmul.f32 %v5807_v34, %v2059_v58  ;;  %v2086_v42 = vmul.f32 %v5808_v53, %v2059_v58  ;;  %v2090_v48 = vmul.f32 %v5809_v12, %v2059_v58  ;;  %v2063_v61 = vadd.f32 %v2062_v45, %v2020_v30 }
 0x25a   :  { %v2067_v55 = vadd.f32 %v2066_v49, %v2024_v20  ;;  %v2071_v32 = vadd.f32 %v2070_v63, %v2028_v23  ;;  %v2075_v11 = vadd.f32 %v2074_v36, %v2032_v41  ;;  %v2079_v14 = vadd.f32 %v2078_v4, %v2036_v57 }
 0x25b   :  { %v2083_v47 = vadd.f32 %v2082_v13, %v2040_v31  ;;  %v2087_v25 = vadd.f32 %v2086_v42, %v2044_v43  ;;  %v2091_v60 = vadd.f32 %v2090_v48, %v2048_v17  ;;  %v2102_v46 = vmax.f32 %v2101_v7, 0.0 }
 0x25c   :  { %v2132_v3 = vstv %s4603_s24  ;;  %v2147_v2 = vstv %s4605_s14  ;;  %v2151_v24 = vstv %s4607_s17  ;;  %v2144_v6 = vadd.f32 %v2143_v16, %v2141_v18  ;;  %s2228_s24 = sshll.u32 %s2956_s16, 4  ;;  %s2229_s24 = int_to_ptr.vmem [resolvable:$true] %s2228_s24 }
 0x25d   :  { %v2155_v35 = vstv %s4609_s9  ;;  %v2159_v59 = vstv %s4611_s1  ;;  %v2163_v37 = vstv %s4613_s29  ;;  %v5811_v21 = vstv %s5810_s10  ;;  %s2914_s14 = scalar_lea.vmem %s2229_s24, 16  ;;  %s2918_s18 = scalar_lea.vmem %s2229_s24, 32 }
 0x25e   :  { %v2105_v33 = vmul.f32 %v5811_v21, %v2102_v46  ;;  %v2109_v15 = vmul.f32 %v2108_v62, %v2102_v46  ;;  %v2113_v10 = vmul.f32 %v2112_v8, %v2102_v46  ;;  %v2117_v50 = vmul.f32 %v2116_v39, %v2102_v46  ;;  %p2915_p5 = scmp.ne.s32.totalorder %s2229_s24, %s2914_s14  ;;  %p2919_p6 = scmp.lt.s32.totalorder %s2229_s24, %s2229_s24 }
 0x25f   :  { %v2121_v44 = vmul.f32 %v2120_v52, %v2102_v46  ;;  %v2125_v56 = vmul.f32 %v2124_v22, %v2102_v46  ;;  %v2129_v27 = vmul.f32 %v2128_v28, %v2102_v46  ;;  %v2133_v5 = vmul.f32 %v2132_v3, %v2102_v46  ;;  %p2920_p7 = scmp.lt.s32.totalorder %s2918_s18, %s2914_s14 }
 0x260   :  { %v2106_v51 = vadd.f32 %v2105_v33, %v2063_v61  ;;  %v2110_v9 = vadd.f32 %v2109_v15, %v2067_v55  ;;  %v2114_v19 = vadd.f32 %v2113_v10, %v2071_v32  ;;  %v2118_v0 = vadd.f32 %v2117_v50, %v2075_v11 }
 0x261   :  { %v2122_v30 = vadd.f32 %v2121_v44, %v2079_v14  ;;  %v2126_v20 = vadd.f32 %v2125_v56, %v2083_v47  ;;  %v2130_v23 = vadd.f32 %v2129_v27, %v2087_v25  ;;  %v2134_v41 = vadd.f32 %v2133_v5, %v2091_v60  ;;  %p2921_p8 = por %p2920_p7, %p2919_p6 }
 0x262   :  { %v2145_v62 = vmax.f32 %v2144_v6, 0.0  ;;  %v2167_v8 = vstv %s4638_s2  ;;  %v2171_v57 = vstv %s4640_s28  ;;  %v2175_v31 = vstv %s4642_s8 }
 0x263   :  { %v2183_v43 = vstv %s4644_s12  ;;  %v2179_v26 = vstv %s5812_s19  ;;  %v2188_v4 = vstv %s4658_s4  ;;  %v2193_v53 = vstv %s4664_s0  ;;  %p2922_p9 = pnand %p2921_p8, %p2915_p5 }
 0x264   :  { %v2148_v17 = vmul.f32 %v2147_v2, %v2145_v62  ;;  %v2152_v58 = vmul.f32 %v2151_v24, %v2145_v62  ;;  %v2156_v39 = vmul.f32 %v2155_v35, %v2145_v62  ;;  %v2160_v52 = vmul.f32 %v2159_v59, %v2145_v62 }
 0x265   :  { %v2164_v18 = vmul.f32 %v2163_v37, %v2145_v62  ;;  %v2168_v40 = vmul.f32 %v2167_v8, %v2145_v62  ;;  %v2172_v7 = vmul.f32 %v2171_v57, %v2145_v62  ;;  %v2176_v22 = vmul.f32 %v2175_v31, %v2145_v62 }
 0x266   :  { %v2149_v28 = vadd.f32 %v2148_v17, %v2106_v51  ;;  %v2153_v16 = vadd.f32 %v2152_v58, %v2110_v9  ;;  %v2157_v1 = vadd.f32 %v2156_v39, %v2114_v19  ;;  %v2161_v45 = vadd.f32 %v2160_v52, %v2118_v0 }
 0x267   :  { %v2165_v54 = vadd.f32 %v2164_v18, %v2122_v30  ;;  %v2169_v49 = vadd.f32 %v2168_v40, %v2126_v20  ;;  %v2173_v29 = vadd.f32 %v2172_v7, %v2130_v23  ;;  %v2177_v63 = vadd.f32 %v2176_v22, %v2134_v41 }
 0x268   :  { %v2182_v38 = vmax.f32 %v2149_v28, 0.0  ;;  %v2187_v36 = vmax.f32 %v2153_v16, 0.0  ;;  %v2192_v13 = vmax.f32 %v2157_v1, 0.0  ;;  %v2197_v48 = vmax.f32 %v2161_v45, 0.0 }
 0x269   :  { %v2198_v61 = vstv %s2422_s3  ;;  %v2202_v11 = vmax.f32 %v2165_v54, 0.0  ;;  %v2203_v14 = vstv %s2423_s5  ;;  %v2207_v60 = vmax.f32 %v2169_v49, 0.0 }
 0x26a   :  { %v2184_v34 = vmul.f32 %v2183_v43, %v2182_v38  ;;  %v2189_v12 = vmul.f32 %v2188_v4, %v2187_v36  ;;  %v2194_v32 = vmul.f32 %v2193_v53, %v2192_v13  ;;  %v2199_v25 = vmul.f32 %v2198_v61, %v2197_v48 }
 0x26b   :  { %v2208_v46 = vstv %s2424_s21  ;;  %v2204_v2 = vmul.f32 %v2203_v14, %v2202_v11  ;;  %v2212_v24 = vmax.f32 %v2173_v29, 0.0  ;;  %v2213_v6 = vstv %s2425_s13 }
 0x26c   :  { %v2185_v42 = vadd.f32 %v2184_v34, %v2179_v26  ;;  %v2209_v59 = vmul.f32 %v2208_v46, %v2207_v60  ;;  %v2217_v37 = vmax.f32 %v2177_v63, 0.0  ;;  %v2218_v21 = vstv %s2426_s26 }
 0x26d   :  { %v2214_v15 = vmul.f32 %v2213_v6, %v2212_v24 }
 0x26e   :  { %v2190_v55 = vadd.f32 %v2189_v12, %v2185_v42  ;;  %v2219_v50 = vmul.f32 %v2218_v21, %v2217_v37 }
 0x270   :  { %v2195_v47 = vadd.f32 %v2194_v32, %v2190_v55 }
 0x272   :  { %v2200_v3 = vadd.f32 %v2199_v25, %v2195_v47 }
 0x274   :  { %v2205_v35 = vadd.f32 %v2204_v2, %v2200_v3 }
 0x276   :  { %v2210_v33 = vadd.f32 %v2209_v59, %v2205_v35 }
 0x278   :  { %v2215_v10 = vadd.f32 %v2214_v15, %v2210_v33 }
 0x27a   :  { %v2220_v44 = vadd.f32 %v2219_v50, %v2215_v10 }
 0x27c   :  { %2221 = vst [vmem:[#allocation14] sm:$0x1] %v2220_v44 }
 0x27d   :  { %2925 = shalt.err (!%p2922_p9)
}
 0x27e   :  { %s5813_s9 = sld [smem:[#allocation274_spill]] }
 0x284   :  { %s2926_s11 = scalar_lea.hbm %s5813_s9, 16 }
 0x285   :  { %p2927_p10 = scmp.ne.s32.totalorder %s5813_s9, %s2926_s11  ;;  %p2930_p11 = scmp.lt.u32.totalorder %s2926_s11, %s5813_s9 }
 0x287   :  { %p2932_p12 = pnand %p2930_p11, %p2927_p10 }
 0x289   :  { %2935 = shalt.err (!%p2932_p12)
}
 0x28a   :  { %2231 = dma.vmem_to_hbm [thread:$0]  %s2229_s24, 16, %s5813_s9, [#allocation5]  }
 0x28b   :  { %2944 = dma.done.wait [#allocation5], 16  }
 0x28c   :  { %2945 = vsyncadd [#allocation5], 4294967280 }
 0x28d   :  { %2235 = vsyncpa [#allocation4], 1 }
 0x28e   :  { %2236 = vsyncpa [#allocation5], 1 }
 0x28f   :  { %2237 = vsyncpa [#allocation6], 1 }
 0x290   :  { %2238 = vsyncpa [#allocation9], 1 }
 0x291   :  { %2239 = vsyncpa [#allocation12], 1 }

</bundles_post_ra>
